<compile_context>
chip_gen: v5e
topology: v5e:2x2
jax: 0.10.0
libtpu: 0.0.40
codegen_flags: <defaults>
</compile_context>

<pallas_src>
import jax
import jax.numpy as jnp
from jax.experimental import pallas as pl
from jax.experimental.pallas import tpu as pltpu

EMBED = 128     # embed_size (lane-friendly; module default was 256)
INPUT = 16      # input_size == number of tokens (required by Flatten + fc)
HEADS = 3       # module hard-codes 3 heads
BATCH = 2
NCLASS = 10
EPS = 1e-5      # nn.LayerNorm default eps


# ----------------------------- fused Pallas kernel -----------------------------

def _vit_fused_kernel(x_ref, wemb_ref, wqkv1_ref, wfc1_ref, bfc1_ref,
                      wqkv2_ref, wfc2_ref, bfc2_ref, gamma_ref, beta_ref,
                      wffn1_ref, wffn2_ref, whead_ref, o_ref, f_scr):
    gamma = gamma_ref[...]
    beta = beta_ref[...]

    def mha_ln_block(h_in, wqkv, wfc, bfc):
        # One wide projection for all 9 head matrices: (B*N, E) @ (E, 9E).
        proj = jnp.dot(h_in, wqkv, preferred_element_type=jnp.float32)
        proj3 = proj.reshape(BATCH, INPUT, 3 * HEADS * EMBED)
        acc = jnp.zeros((BATCH, INPUT, EMBED), jnp.float32)
        for h in range(HEADS):                      # heads unrolled (static)
            q = proj3[:, :, h * EMBED:(h + 1) * EMBED]      # 1/sqrt(E) folded in
            k = proj3[:, :, (HEADS + h) * EMBED:(HEADS + h + 1) * EMBED]
            v = proj3[:, :, (2 * HEADS + h) * EMBED:(2 * HEADS + h + 1) * EMBED]
            s = jnp.einsum("bqe,bke->bqk", q, k,
                           preferred_element_type=jnp.float32)
            # torch.softmax(attention_score, dim=1): normalize over QUERY axis.
            s = s - jnp.max(s, axis=1, keepdims=True)
            p = jnp.exp(s)
            p = p / jnp.sum(p, axis=1, keepdims=True)
            acc = acc + jnp.einsum("bqk,bke->bqe", p, v,
                                   preferred_element_type=jnp.float32)
        att = acc.reshape(BATCH * INPUT, EMBED)
        # head-mean (1/3) is folded into wfc at parameter-prep time
        out = jnp.dot(att, wfc, preferred_element_type=jnp.float32) + bfc
        # residual add + LayerNorm(embed_size)
        y = out + h_in
        mean = jnp.mean(y, axis=-1, keepdims=True)
        var = jnp.mean((y - mean) ** 2, axis=-1, keepdims=True)
        return (y - mean) * jax.lax.rsqrt(var + EPS) * gamma + beta

    # embedding (bias-free linear) on the flattened (B*N, D_in) activation
    emb = jnp.dot(x_ref[...], wemb_ref[...], preferred_element_type=jnp.float32)
    h1 = mha_ln_block(emb, wqkv1_ref[...], wfc1_ref[...], bfc1_ref[...])
    h2 = mha_ln_block(h1, wqkv2_ref[...], wfc2_ref[...], bfc2_ref[...])

    # FFN: linear -> ReLU -> linear (bias-free)
    f = jnp.dot(h2, wffn1_ref[...], preferred_element_type=jnp.float32)
    f = jnp.maximum(f, 0.0)
    f = jnp.dot(f, wffn2_ref[...], preferred_element_type=jnp.float32)  # (B*N, E)

    # Flatten(start_dim=1) + fc(E*N -> 10): contract per token position n,
    # reading the batch rows for token n with a strided VMEM load (avoids any
    # sublane->lane reshape inside the kernel).
    f_scr[...] = f
    logits = jnp.zeros((BATCH, NCLASS), jnp.float32)
    for n in range(INPUT):                                   # static unroll
        fn = f_scr[pl.ds(n, BATCH, stride=INPUT), :]          # rows {n, n+INPUT} -> (B, E)
        wn = whead_ref[n]                                     # (NCLASS, E) lane-dense
        logits = logits + jax.lax.dot_general(
            fn, wn, (((1,), (1,)), ((), ())),
            preferred_element_type=jnp.float32)

    # softmax(dim=1)
    m = jnp.max(logits, axis=1, keepdims=True)
    pz = jnp.exp(logits - m)
    o_ref[...] = pz / jnp.sum(pz, axis=1, keepdims=True)


# ----------------------------- wrapper -----------------------------

@jax.jit
def vit_forward(x, kp):
    B, N, Din = x.shape
    x2 = x.reshape(B * N, Din)
    return pl.pallas_call(
        _vit_fused_kernel,
        out_shape=jax.ShapeDtypeStruct((B, NCLASS), jnp.float32),
        scratch_shapes=[pltpu.VMEM((B * N, EMBED), jnp.float32)],
    )(x2, kp["w_emb"], kp["wqkv1"], kp["wfc1"], kp["bfc1"],
      kp["wqkv2"], kp["wfc2"], kp["bfc2"], kp["gamma"], kp["beta"],
      kp["w_ffn1"], kp["w_ffn2"], kp["w_head"])


def prep_kernel_params(p):
    """One-time weight repacking for the fused kernel (plain JAX, setup only)."""
    scale = 1.0 / float(EMBED) ** 0.5

    def qkv_cat(wq, wk, wv):
        # (HEADS, E, E) each -> (E, 9E); column blocks [Q0 Q1 Q2 | K0 K1 K2 | V0 V1 V2]
        q = jnp.concatenate([wq[h] * scale for h in range(HEADS)], axis=1)
        k = jnp.concatenate([wk[h] for h in range(HEADS)], axis=1)
        v = jnp.concatenate([wv[h] for h in range(HEADS)], axis=1)
        return jnp.concatenate([q, k, v], axis=1)

    # head weight (N*E, C) -> (N, C, E): lane-dense (E on lanes), per-token blocks
    wh = jnp.transpose(p["w_head"].reshape(INPUT, EMBED, NCLASS), (0, 2, 1))

    return {
        "w_emb": p["w_emb"],
        "wqkv1": qkv_cat(p["wq1"], p["wk1"], p["wv1"]),
        "wfc1": p["wfc1"] / 3.0, "bfc1": p["bfc1"],
        "wqkv2": qkv_cat(p["wq2"], p["wk2"], p["wv2"]),
        "wfc2": p["wfc2"] / 3.0, "bfc2": p["bfc2"],
        "gamma": p["gamma"], "beta": p["beta"],
        "w_ffn1": p["w_ffn1"], "w_ffn2": p["w_ffn2"],
        "w_head": wh,
    }


# ----------------------------- pure-JAX reference -----------------------------

def vit_reference(x, p):
    def attn(xe, wq, wk, wv):
        q, k, v = xe @ wq, xe @ wk, xe @ wv
        s = jnp.einsum("bqe,bke->bqk", q, k) / (EMBED ** 0.5)
        w = jax.nn.softmax(s, axis=1)       # torch.softmax(dim=1)
        return jnp.einsum("bqk,bke->bqe", w, v)

    def mha(xe, wq, wk, wv, wfc, bfc):
        a = sum(attn(xe, wq[h], wk[h], wv[h]) for h in range(HEADS)) / 3.0
        return a @ wfc + bfc

    def ln(y, g, b):
        m = y.mean(-1, keepdims=True)
        v = ((y - m) ** 2).mean(-1, keepdims=True)
        return (y - m) / jnp.sqrt(v + EPS) * g + b

    out = x @ p["w_emb"]
    out = ln(mha(out, p["wq1"], p["wk1"], p["wv1"], p["wfc1"], p["bfc1"]) + out,
             p["gamma"], p["beta"])
    out = ln(mha(out, p["wq2"], p["wk2"], p["wv2"], p["wfc2"], p["bfc2"]) + out,
             p["gamma"], p["beta"])
    out = jnp.maximum(out @ p["w_ffn1"], 0.0) @ p["w_ffn2"]
    flat = out.reshape(out.shape[0], -1)
    logits = flat @ p["w_head"]
    return jax.nn.softmax(logits, axis=1)


# ----------------------------- params & main -----------------------------

def make_params(key):
    ks = jax.random.split(key, 16)
    rnd = lambda k, shape: (0.05 * jax.random.normal(k, shape)).astype(jnp.float32)
    # All linear weights stored pre-transposed as (in, out).
    return {
        "w_emb": rnd(ks[0], (INPUT, EMBED)),
        "wq1": rnd(ks[1], (HEADS, EMBED, EMBED)),
        "wk1": rnd(ks[2], (HEADS, EMBED, EMBED)),
        "wv1": rnd(ks[3], (HEADS, EMBED, EMBED)),
        "wfc1": rnd(ks[4], (EMBED, EMBED)),
        "bfc1": rnd(ks[5], (1, EMBED)),
        "wq2": rnd(ks[6], (HEADS, EMBED, EMBED)),
        "wk2": rnd(ks[7], (HEADS, EMBED, EMBED)),
        "wv2": rnd(ks[8], (HEADS, EMBED, EMBED)),
        "wfc2": rnd(ks[9], (EMBED, EMBED)),
        "bfc2": rnd(ks[10], (1, EMBED)),
        "w_ffn1": rnd(ks[11], (EMBED, EMBED)),
        "w_ffn2": rnd(ks[12], (EMBED, EMBED)),
        "w_head": rnd(ks[13], (EMBED * INPUT, NCLASS)),
        # nn.LayerNorm default init (shared module -> shared params)
        "gamma": jnp.ones((1, EMBED), jnp.float32),
        "beta": jnp.zeros((1, EMBED), jnp.float32),
    }


if __name__ == "__main__":
    key = jax.random.PRNGKey(0)
    kx, kparam = jax.random.split(key)
    x = jax.random.normal(kx, (BATCH, INPUT, INPUT), dtype=jnp.float32)
    params = make_params(kparam)
    kernel_params = prep_kernel_params(params)

    out = jax.block_until_ready(vit_forward(x, kernel_params))
    ref = jax.block_until_ready(vit_reference(x, params))

    assert out.shape == (BATCH, NCLASS)
    assert jnp.allclose(jnp.sum(out, axis=1), 1.0, atol=1e-5)
    assert jnp.allclose(out, ref, rtol=2e-4, atol=2e-5), (
        f"max abs err {float(jnp.max(jnp.abs(out - ref)))}")
    print("KERNEL_OK")
</pallas_src>

<mosaic_0001>
module attributes {stable_mosaic.version = 11 : i64} {
  func.func @_vit_fused_kernel(%arg0: memref<32x16xf32, #tpu.memory_space<vmem>>, %arg1: memref<16x128xf32, #tpu.memory_space<vmem>>, %arg2: memref<128x1152xf32, #tpu.memory_space<vmem>>, %arg3: memref<128x128xf32, #tpu.memory_space<vmem>>, %arg4: memref<1x128xf32, #tpu.memory_space<vmem>>, %arg5: memref<128x1152xf32, #tpu.memory_space<vmem>>, %arg6: memref<128x128xf32, #tpu.memory_space<vmem>>, %arg7: memref<1x128xf32, #tpu.memory_space<vmem>>, %arg8: memref<1x128xf32, #tpu.memory_space<vmem>>, %arg9: memref<1x128xf32, #tpu.memory_space<vmem>>, %arg10: memref<128x128xf32, #tpu.memory_space<vmem>>, %arg11: memref<128x128xf32, #tpu.memory_space<vmem>>, %arg12: memref<16x10x128xf32, #tpu.memory_space<vmem>>, %arg13: memref<2x10xf32, #tpu.memory_space<vmem>>, %arg14: memref<32x128xf32, #tpu.memory_space<vmem>>) attributes {dimension_semantics = [], scalar_prefetch = 0 : i64, scratch_operands = 1 : i64, tpu.core_type = #tpu.core_type<tc>} {
    %c0 = arith.constant 0 : index
    %c0_0 = arith.constant 0 : index
    %0 = vector.load %arg8[%c0, %c0_0] : memref<1x128xf32, #tpu.memory_space<vmem>>, vector<1x128xf32>
    %c0_1 = arith.constant 0 : index
    %c0_2 = arith.constant 0 : index
    %1 = vector.load %arg9[%c0_1, %c0_2] : memref<1x128xf32, #tpu.memory_space<vmem>>, vector<1x128xf32>
    %c0_3 = arith.constant 0 : index
    %c0_4 = arith.constant 0 : index
    %2 = vector.load %arg0[%c0_3, %c0_4] : memref<32x16xf32, #tpu.memory_space<vmem>>, vector<32x16xf32>
    %c0_5 = arith.constant 0 : index
    %c0_6 = arith.constant 0 : index
    %3 = vector.load %arg1[%c0_5, %c0_6] : memref<16x128xf32, #tpu.memory_space<vmem>>, vector<16x128xf32>
    %cst = arith.constant dense<0.000000e+00> : vector<32x128xf32>
    %4 = tpu.matmul %2, %3, %cst {dimension_numbers = #tpu.dot_dimension_numbers<[1], [0], [0], [1], [0, 0, 1, 1], [], []>} : vector<32x16xf32>, vector<16x128xf32>, vector<32x128xf32> -> vector<32x128xf32>
    %c0_7 = arith.constant 0 : index
    %c0_8 = arith.constant 0 : index
    %5 = vector.load %arg2[%c0_7, %c0_8] : memref<128x1152xf32, #tpu.memory_space<vmem>>, vector<128x1152xf32>
    %c0_9 = arith.constant 0 : index
    %c0_10 = arith.constant 0 : index
    %6 = vector.load %arg3[%c0_9, %c0_10] : memref<128x128xf32, #tpu.memory_space<vmem>>, vector<128x128xf32>
    %c0_11 = arith.constant 0 : index
    %c0_12 = arith.constant 0 : index
    %7 = vector.load %arg4[%c0_11, %c0_12] : memref<1x128xf32, #tpu.memory_space<vmem>>, vector<1x128xf32>
    %cst_13 = arith.constant dense<0.000000e+00> : vector<32x1152xf32>
    %8 = tpu.matmul %4, %5, %cst_13 {dimension_numbers = #tpu.dot_dimension_numbers<[1], [0], [0], [1], [0, 0, 1, 1], [], []>} : vector<32x128xf32>, vector<128x1152xf32>, vector<32x1152xf32> -> vector<32x1152xf32>
    %9 = vector.shape_cast %8 : vector<32x1152xf32> to vector<2x16x1152xf32>
    %cst_14 = arith.constant 0.000000e+00 : f32
    %10 = vector.broadcast %cst_14 : f32 to vector<2x16x128xf32>
    %11 = vector.extract_strided_slice %9 {offsets = [0, 0, 0], sizes = [2, 16, 128], strides = [1, 1, 1]} : vector<2x16x1152xf32> to vector<2x16x128xf32>
    %12 = vector.extract_strided_slice %9 {offsets = [0, 0, 384], sizes = [2, 16, 128], strides = [1, 1, 1]} : vector<2x16x1152xf32> to vector<2x16x128xf32>
    %13 = vector.extract_strided_slice %9 {offsets = [0, 0, 768], sizes = [2, 16, 128], strides = [1, 1, 1]} : vector<2x16x1152xf32> to vector<2x16x128xf32>
    "tpu.trace_start"() <{level = 10 : i32, message = "bqe,bke->bqk"}> : () -> ()
    %cst_15 = arith.constant dense<0.000000e+00> : vector<2x16x16xf32>
    %14 = tpu.matmul %11, %12, %cst_15 {dimension_numbers = #tpu.dot_dimension_numbers<[2], [2], [1], [1], [0, 0, 0, 1, 1, 1], [0], [0]>} : vector<2x16x128xf32>, vector<2x16x128xf32>, vector<2x16x16xf32> -> vector<2x16x16xf32>
    "tpu.trace_stop"() : () -> ()
    %cst_16 = arith.constant dense<0xFF800000> : vector<2x16xf32>
    %15 = vector.multi_reduction <maximumf>, %14, %cst_16 [1] : vector<2x16x16xf32> to vector<2x16xf32>
    %16 = vector.shape_cast %15 : vector<2x16xf32> to vector<2x1x16xf32>
    %17 = vector.broadcast %16 : vector<2x1x16xf32> to vector<2x16x16xf32>
    %18 = arith.subf %14, %17 : vector<2x16x16xf32>
    %19 = math.exp %18 : vector<2x16x16xf32>
    %cst_17 = arith.constant dense<0.000000e+00> : vector<2x16xf32>
    %20 = vector.multi_reduction <add>, %19, %cst_17 [1] : vector<2x16x16xf32> to vector<2x16xf32>
    %21 = vector.shape_cast %20 : vector<2x16xf32> to vector<2x1x16xf32>
    %22 = vector.broadcast %21 : vector<2x1x16xf32> to vector<2x16x16xf32>
    %23 = arith.divf %19, %22 : vector<2x16x16xf32>
    "tpu.trace_start"() <{level = 10 : i32, message = "bqk,bke->bqe"}> : () -> ()
    %cst_18 = arith.constant dense<0.000000e+00> : vector<2x16x128xf32>
    %24 = tpu.matmul %23, %13, %cst_18 {dimension_numbers = #tpu.dot_dimension_numbers<[2], [1], [1], [2], [0, 0, 0, 1, 1, 2], [0], [0]>} : vector<2x16x16xf32>, vector<2x16x128xf32>, vector<2x16x128xf32> -> vector<2x16x128xf32>
    "tpu.trace_stop"() : () -> ()
    %25 = arith.addf %10, %24 : vector<2x16x128xf32>
    %26 = vector.extract_strided_slice %9 {offsets = [0, 0, 128], sizes = [2, 16, 128], strides = [1, 1, 1]} : vector<2x16x1152xf32> to vector<2x16x128xf32>
    %27 = vector.extract_strided_slice %9 {offsets = [0, 0, 512], sizes = [2, 16, 128], strides = [1, 1, 1]} : vector<2x16x1152xf32> to vector<2x16x128xf32>
    %28 = vector.extract_strided_slice %9 {offsets = [0, 0, 896], sizes = [2, 16, 128], strides = [1, 1, 1]} : vector<2x16x1152xf32> to vector<2x16x128xf32>
    "tpu.trace_start"() <{level = 10 : i32, message = "bqe,bke->bqk"}> : () -> ()
    %cst_19 = arith.constant dense<0.000000e+00> : vector<2x16x16xf32>
    %29 = tpu.matmul %26, %27, %cst_19 {dimension_numbers = #tpu.dot_dimension_numbers<[2], [2], [1], [1], [0, 0, 0, 1, 1, 1], [0], [0]>} : vector<2x16x128xf32>, vector<2x16x128xf32>, vector<2x16x16xf32> -> vector<2x16x16xf32>
    "tpu.trace_stop"() : () -> ()
    %cst_20 = arith.constant dense<0xFF800000> : vector<2x16xf32>
    %30 = vector.multi_reduction <maximumf>, %29, %cst_20 [1] : vector<2x16x16xf32> to vector<2x16xf32>
    %31 = vector.shape_cast %30 : vector<2x16xf32> to vector<2x1x16xf32>
    %32 = vector.broadcast %31 : vector<2x1x16xf32> to vector<2x16x16xf32>
    %33 = arith.subf %29, %32 : vector<2x16x16xf32>
    %34 = math.exp %33 : vector<2x16x16xf32>
    %cst_21 = arith.constant dense<0.000000e+00> : vector<2x16xf32>
    %35 = vector.multi_reduction <add>, %34, %cst_21 [1] : vector<2x16x16xf32> to vector<2x16xf32>
    %36 = vector.shape_cast %35 : vector<2x16xf32> to vector<2x1x16xf32>
    %37 = vector.broadcast %36 : vector<2x1x16xf32> to vector<2x16x16xf32>
    %38 = arith.divf %34, %37 : vector<2x16x16xf32>
    "tpu.trace_start"() <{level = 10 : i32, message = "bqk,bke->bqe"}> : () -> ()
    %cst_22 = arith.constant dense<0.000000e+00> : vector<2x16x128xf32>
    %39 = tpu.matmul %38, %28, %cst_22 {dimension_numbers = #tpu.dot_dimension_numbers<[2], [1], [1], [2], [0, 0, 0, 1, 1, 2], [0], [0]>} : vector<2x16x16xf32>, vector<2x16x128xf32>, vector<2x16x128xf32> -> vector<2x16x128xf32>
    "tpu.trace_stop"() : () -> ()
    %40 = arith.addf %25, %39 : vector<2x16x128xf32>
    %41 = vector.extract_strided_slice %9 {offsets = [0, 0, 256], sizes = [2, 16, 128], strides = [1, 1, 1]} : vector<2x16x1152xf32> to vector<2x16x128xf32>
    %42 = vector.extract_strided_slice %9 {offsets = [0, 0, 640], sizes = [2, 16, 128], strides = [1, 1, 1]} : vector<2x16x1152xf32> to vector<2x16x128xf32>
    %43 = vector.extract_strided_slice %9 {offsets = [0, 0, 1024], sizes = [2, 16, 128], strides = [1, 1, 1]} : vector<2x16x1152xf32> to vector<2x16x128xf32>
    "tpu.trace_start"() <{level = 10 : i32, message = "bqe,bke->bqk"}> : () -> ()
    %cst_23 = arith.constant dense<0.000000e+00> : vector<2x16x16xf32>
    %44 = tpu.matmul %41, %42, %cst_23 {dimension_numbers = #tpu.dot_dimension_numbers<[2], [2], [1], [1], [0, 0, 0, 1, 1, 1], [0], [0]>} : vector<2x16x128xf32>, vector<2x16x128xf32>, vector<2x16x16xf32> -> vector<2x16x16xf32>
    "tpu.trace_stop"() : () -> ()
    %cst_24 = arith.constant dense<0xFF800000> : vector<2x16xf32>
    %45 = vector.multi_reduction <maximumf>, %44, %cst_24 [1] : vector<2x16x16xf32> to vector<2x16xf32>
    %46 = vector.shape_cast %45 : vector<2x16xf32> to vector<2x1x16xf32>
    %47 = vector.broadcast %46 : vector<2x1x16xf32> to vector<2x16x16xf32>
    %48 = arith.subf %44, %47 : vector<2x16x16xf32>
    %49 = math.exp %48 : vector<2x16x16xf32>
    %cst_25 = arith.constant dense<0.000000e+00> : vector<2x16xf32>
    %50 = vector.multi_reduction <add>, %49, %cst_25 [1] : vector<2x16x16xf32> to vector<2x16xf32>
    %51 = vector.shape_cast %50 : vector<2x16xf32> to vector<2x1x16xf32>
    %52 = vector.broadcast %51 : vector<2x1x16xf32> to vector<2x16x16xf32>
    %53 = arith.divf %49, %52 : vector<2x16x16xf32>
    "tpu.trace_start"() <{level = 10 : i32, message = "bqk,bke->bqe"}> : () -> ()
    %cst_26 = arith.constant dense<0.000000e+00> : vector<2x16x128xf32>
    %54 = tpu.matmul %53, %43, %cst_26 {dimension_numbers = #tpu.dot_dimension_numbers<[2], [1], [1], [2], [0, 0, 0, 1, 1, 2], [0], [0]>} : vector<2x16x16xf32>, vector<2x16x128xf32>, vector<2x16x128xf32> -> vector<2x16x128xf32>
    "tpu.trace_stop"() : () -> ()
    %55 = arith.addf %40, %54 : vector<2x16x128xf32>
    %56 = vector.shape_cast %55 : vector<2x16x128xf32> to vector<32x128xf32>
    %cst_27 = arith.constant dense<0.000000e+00> : vector<32x128xf32>
    %57 = tpu.matmul %56, %6, %cst_27 {dimension_numbers = #tpu.dot_dimension_numbers<[1], [0], [0], [1], [0, 0, 1, 1], [], []>} : vector<32x128xf32>, vector<128x128xf32>, vector<32x128xf32> -> vector<32x128xf32>
    %58 = vector.broadcast %7 : vector<1x128xf32> to vector<32x128xf32>
    %59 = arith.addf %57, %58 : vector<32x128xf32>
    %60 = arith.addf %59, %4 : vector<32x128xf32>
    %cst_28 = arith.constant dense<0.000000e+00> : vector<32xf32>
    %61 = vector.multi_reduction <add>, %60, %cst_28 [1] : vector<32x128xf32> to vector<32xf32>
    %62 = vector.shape_cast %61 : vector<32xf32> to vector<32x1xf32>
    %cst_29 = arith.constant 1.280000e+02 : f32
    %63 = vector.broadcast %cst_29 : f32 to vector<32x1xf32>
    %64 = arith.divf %62, %63 : vector<32x1xf32>
    %65 = vector.broadcast %64 : vector<32x1xf32> to vector<32x128xf32>
    %66 = arith.subf %60, %65 : vector<32x128xf32>
    %67 = arith.mulf %66, %66 : vector<32x128xf32>
    %cst_30 = arith.constant dense<0.000000e+00> : vector<32xf32>
    %68 = vector.multi_reduction <add>, %67, %cst_30 [1] : vector<32x128xf32> to vector<32xf32>
    %69 = vector.shape_cast %68 : vector<32xf32> to vector<32x1xf32>
    %cst_31 = arith.constant 1.280000e+02 : f32
    %70 = vector.broadcast %cst_31 : f32 to vector<32x1xf32>
    %71 = arith.divf %69, %70 : vector<32x1xf32>
    %72 = vector.broadcast %64 : vector<32x1xf32> to vector<32x128xf32>
    %73 = arith.subf %60, %72 : vector<32x128xf32>
    %cst_32 = arith.constant 9.99999974E-6 : f32
    %74 = vector.broadcast %cst_32 : f32 to vector<32x1xf32>
    %75 = arith.addf %71, %74 : vector<32x1xf32>
    %76 = math.rsqrt %75 : vector<32x1xf32>
    %77 = vector.broadcast %76 : vector<32x1xf32> to vector<32x128xf32>
    %78 = arith.mulf %73, %77 : vector<32x128xf32>
    %79 = vector.broadcast %0 : vector<1x128xf32> to vector<32x128xf32>
    %80 = arith.mulf %78, %79 : vector<32x128xf32>
    %81 = vector.broadcast %1 : vector<1x128xf32> to vector<32x128xf32>
    %82 = arith.addf %80, %81 : vector<32x128xf32>
    %c0_33 = arith.constant 0 : index
    %c0_34 = arith.constant 0 : index
    %83 = vector.load %arg5[%c0_33, %c0_34] : memref<128x1152xf32, #tpu.memory_space<vmem>>, vector<128x1152xf32>
    %c0_35 = arith.constant 0 : index
    %c0_36 = arith.constant 0 : index
    %84 = vector.load %arg6[%c0_35, %c0_36] : memref<128x128xf32, #tpu.memory_space<vmem>>, vector<128x128xf32>
    %c0_37 = arith.constant 0 : index
    %c0_38 = arith.constant 0 : index
    %85 = vector.load %arg7[%c0_37, %c0_38] : memref<1x128xf32, #tpu.memory_space<vmem>>, vector<1x128xf32>
    %cst_39 = arith.constant dense<0.000000e+00> : vector<32x1152xf32>
    %86 = tpu.matmul %82, %83, %cst_39 {dimension_numbers = #tpu.dot_dimension_numbers<[1], [0], [0], [1], [0, 0, 1, 1], [], []>} : vector<32x128xf32>, vector<128x1152xf32>, vector<32x1152xf32> -> vector<32x1152xf32>
    %87 = vector.shape_cast %86 : vector<32x1152xf32> to vector<2x16x1152xf32>
    %cst_40 = arith.constant 0.000000e+00 : f32
    %88 = vector.broadcast %cst_40 : f32 to vector<2x16x128xf32>
    %89 = vector.extract_strided_slice %87 {offsets = [0, 0, 0], sizes = [2, 16, 128], strides = [1, 1, 1]} : vector<2x16x1152xf32> to vector<2x16x128xf32>
    %90 = vector.extract_strided_slice %87 {offsets = [0, 0, 384], sizes = [2, 16, 128], strides = [1, 1, 1]} : vector<2x16x1152xf32> to vector<2x16x128xf32>
    %91 = vector.extract_strided_slice %87 {offsets = [0, 0, 768], sizes = [2, 16, 128], strides = [1, 1, 1]} : vector<2x16x1152xf32> to vector<2x16x128xf32>
    "tpu.trace_start"() <{level = 10 : i32, message = "bqe,bke->bqk"}> : () -> ()
    %cst_41 = arith.constant dense<0.000000e+00> : vector<2x16x16xf32>
    %92 = tpu.matmul %89, %90, %cst_41 {dimension_numbers = #tpu.dot_dimension_numbers<[2], [2], [1], [1], [0, 0, 0, 1, 1, 1], [0], [0]>} : vector<2x16x128xf32>, vector<2x16x128xf32>, vector<2x16x16xf32> -> vector<2x16x16xf32>
    "tpu.trace_stop"() : () -> ()
    %cst_42 = arith.constant dense<0xFF800000> : vector<2x16xf32>
    %93 = vector.multi_reduction <maximumf>, %92, %cst_42 [1] : vector<2x16x16xf32> to vector<2x16xf32>
    %94 = vector.shape_cast %93 : vector<2x16xf32> to vector<2x1x16xf32>
    %95 = vector.broadcast %94 : vector<2x1x16xf32> to vector<2x16x16xf32>
    %96 = arith.subf %92, %95 : vector<2x16x16xf32>
    %97 = math.exp %96 : vector<2x16x16xf32>
    %cst_43 = arith.constant dense<0.000000e+00> : vector<2x16xf32>
    %98 = vector.multi_reduction <add>, %97, %cst_43 [1] : vector<2x16x16xf32> to vector<2x16xf32>
    %99 = vector.shape_cast %98 : vector<2x16xf32> to vector<2x1x16xf32>
    %100 = vector.broadcast %99 : vector<2x1x16xf32> to vector<2x16x16xf32>
    %101 = arith.divf %97, %100 : vector<2x16x16xf32>
    "tpu.trace_start"() <{level = 10 : i32, message = "bqk,bke->bqe"}> : () -> ()
    %cst_44 = arith.constant dense<0.000000e+00> : vector<2x16x128xf32>
    %102 = tpu.matmul %101, %91, %cst_44 {dimension_numbers = #tpu.dot_dimension_numbers<[2], [1], [1], [2], [0, 0, 0, 1, 1, 2], [0], [0]>} : vector<2x16x16xf32>, vector<2x16x128xf32>, vector<2x16x128xf32> -> vector<2x16x128xf32>
    "tpu.trace_stop"() : () -> ()
    %103 = arith.addf %88, %102 : vector<2x16x128xf32>
    %104 = vector.extract_strided_slice %87 {offsets = [0, 0, 128], sizes = [2, 16, 128], strides = [1, 1, 1]} : vector<2x16x1152xf32> to vector<2x16x128xf32>
    %105 = vector.extract_strided_slice %87 {offsets = [0, 0, 512], sizes = [2, 16, 128], strides = [1, 1, 1]} : vector<2x16x1152xf32> to vector<2x16x128xf32>
    %106 = vector.extract_strided_slice %87 {offsets = [0, 0, 896], sizes = [2, 16, 128], strides = [1, 1, 1]} : vector<2x16x1152xf32> to vector<2x16x128xf32>
    "tpu.trace_start"() <{level = 10 : i32, message = "bqe,bke->bqk"}> : () -> ()
    %cst_45 = arith.constant dense<0.000000e+00> : vector<2x16x16xf32>
    %107 = tpu.matmul %104, %105, %cst_45 {dimension_numbers = #tpu.dot_dimension_numbers<[2], [2], [1], [1], [0, 0, 0, 1, 1, 1], [0], [0]>} : vector<2x16x128xf32>, vector<2x16x128xf32>, vector<2x16x16xf32> -> vector<2x16x16xf32>
    "tpu.trace_stop"() : () -> ()
    %cst_46 = arith.constant dense<0xFF800000> : vector<2x16xf32>
    %108 = vector.multi_reduction <maximumf>, %107, %cst_46 [1] : vector<2x16x16xf32> to vector<2x16xf32>
    %109 = vector.shape_cast %108 : vector<2x16xf32> to vector<2x1x16xf32>
    %110 = vector.broadcast %109 : vector<2x1x16xf32> to vector<2x16x16xf32>
    %111 = arith.subf %107, %110 : vector<2x16x16xf32>
    %112 = math.exp %111 : vector<2x16x16xf32>
    %cst_47 = arith.constant dense<0.000000e+00> : vector<2x16xf32>
    %113 = vector.multi_reduction <add>, %112, %cst_47 [1] : vector<2x16x16xf32> to vector<2x16xf32>
    %114 = vector.shape_cast %113 : vector<2x16xf32> to vector<2x1x16xf32>
    %115 = vector.broadcast %114 : vector<2x1x16xf32> to vector<2x16x16xf32>
    %116 = arith.divf %112, %115 : vector<2x16x16xf32>
    "tpu.trace_start"() <{level = 10 : i32, message = "bqk,bke->bqe"}> : () -> ()
    %cst_48 = arith.constant dense<0.000000e+00> : vector<2x16x128xf32>
    %117 = tpu.matmul %116, %106, %cst_48 {dimension_numbers = #tpu.dot_dimension_numbers<[2], [1], [1], [2], [0, 0, 0, 1, 1, 2], [0], [0]>} : vector<2x16x16xf32>, vector<2x16x128xf32>, vector<2x16x128xf32> -> vector<2x16x128xf32>
    "tpu.trace_stop"() : () -> ()
    %118 = arith.addf %103, %117 : vector<2x16x128xf32>
    %119 = vector.extract_strided_slice %87 {offsets = [0, 0, 256], sizes = [2, 16, 128], strides = [1, 1, 1]} : vector<2x16x1152xf32> to vector<2x16x128xf32>
    %120 = vector.extract_strided_slice %87 {offsets = [0, 0, 640], sizes = [2, 16, 128], strides = [1, 1, 1]} : vector<2x16x1152xf32> to vector<2x16x128xf32>
    %121 = vector.extract_strided_slice %87 {offsets = [0, 0, 1024], sizes = [2, 16, 128], strides = [1, 1, 1]} : vector<2x16x1152xf32> to vector<2x16x128xf32>
    "tpu.trace_start"() <{level = 10 : i32, message = "bqe,bke->bqk"}> : () -> ()
    %cst_49 = arith.constant dense<0.000000e+00> : vector<2x16x16xf32>
    %122 = tpu.matmul %119, %120, %cst_49 {dimension_numbers = #tpu.dot_dimension_numbers<[2], [2], [1], [1], [0, 0, 0, 1, 1, 1], [0], [0]>} : vector<2x16x128xf32>, vector<2x16x128xf32>, vector<2x16x16xf32> -> vector<2x16x16xf32>
    "tpu.trace_stop"() : () -> ()
    %cst_50 = arith.constant dense<0xFF800000> : vector<2x16xf32>
    %123 = vector.multi_reduction <maximumf>, %122, %cst_50 [1] : vector<2x16x16xf32> to vector<2x16xf32>
    %124 = vector.shape_cast %123 : vector<2x16xf32> to vector<2x1x16xf32>
    %125 = vector.broadcast %124 : vector<2x1x16xf32> to vector<2x16x16xf32>
    %126 = arith.subf %122, %125 : vector<2x16x16xf32>
    %127 = math.exp %126 : vector<2x16x16xf32>
    %cst_51 = arith.constant dense<0.000000e+00> : vector<2x16xf32>
    %128 = vector.multi_reduction <add>, %127, %cst_51 [1] : vector<2x16x16xf32> to vector<2x16xf32>
    %129 = vector.shape_cast %128 : vector<2x16xf32> to vector<2x1x16xf32>
    %130 = vector.broadcast %129 : vector<2x1x16xf32> to vector<2x16x16xf32>
    %131 = arith.divf %127, %130 : vector<2x16x16xf32>
    "tpu.trace_start"() <{level = 10 : i32, message = "bqk,bke->bqe"}> : () -> ()
    %cst_52 = arith.constant dense<0.000000e+00> : vector<2x16x128xf32>
    %132 = tpu.matmul %131, %121, %cst_52 {dimension_numbers = #tpu.dot_dimension_numbers<[2], [1], [1], [2], [0, 0, 0, 1, 1, 2], [0], [0]>} : vector<2x16x16xf32>, vector<2x16x128xf32>, vector<2x16x128xf32> -> vector<2x16x128xf32>
    "tpu.trace_stop"() : () -> ()
    %133 = arith.addf %118, %132 : vector<2x16x128xf32>
    %134 = vector.shape_cast %133 : vector<2x16x128xf32> to vector<32x128xf32>
    %cst_53 = arith.constant dense<0.000000e+00> : vector<32x128xf32>
    %135 = tpu.matmul %134, %84, %cst_53 {dimension_numbers = #tpu.dot_dimension_numbers<[1], [0], [0], [1], [0, 0, 1, 1], [], []>} : vector<32x128xf32>, vector<128x128xf32>, vector<32x128xf32> -> vector<32x128xf32>
    %136 = vector.broadcast %85 : vector<1x128xf32> to vector<32x128xf32>
    %137 = arith.addf %135, %136 : vector<32x128xf32>
    %138 = arith.addf %137, %82 : vector<32x128xf32>
    %cst_54 = arith.constant dense<0.000000e+00> : vector<32xf32>
    %139 = vector.multi_reduction <add>, %138, %cst_54 [1] : vector<32x128xf32> to vector<32xf32>
    %140 = vector.shape_cast %139 : vector<32xf32> to vector<32x1xf32>
    %cst_55 = arith.constant 1.280000e+02 : f32
    %141 = vector.broadcast %cst_55 : f32 to vector<32x1xf32>
    %142 = arith.divf %140, %141 : vector<32x1xf32>
    %143 = vector.broadcast %142 : vector<32x1xf32> to vector<32x128xf32>
    %144 = arith.subf %138, %143 : vector<32x128xf32>
    %145 = arith.mulf %144, %144 : vector<32x128xf32>
    %cst_56 = arith.constant dense<0.000000e+00> : vector<32xf32>
    %146 = vector.multi_reduction <add>, %145, %cst_56 [1] : vector<32x128xf32> to vector<32xf32>
    %147 = vector.shape_cast %146 : vector<32xf32> to vector<32x1xf32>
    %cst_57 = arith.constant 1.280000e+02 : f32
    %148 = vector.broadcast %cst_57 : f32 to vector<32x1xf32>
    %149 = arith.divf %147, %148 : vector<32x1xf32>
    %150 = vector.broadcast %142 : vector<32x1xf32> to vector<32x128xf32>
    %151 = arith.subf %138, %150 : vector<32x128xf32>
    %cst_58 = arith.constant 9.99999974E-6 : f32
    %152 = vector.broadcast %cst_58 : f32 to vector<32x1xf32>
    %153 = arith.addf %149, %152 : vector<32x1xf32>
    %154 = math.rsqrt %153 : vector<32x1xf32>
    %155 = vector.broadcast %154 : vector<32x1xf32> to vector<32x128xf32>
    %156 = arith.mulf %151, %155 : vector<32x128xf32>
    %157 = vector.broadcast %0 : vector<1x128xf32> to vector<32x128xf32>
    %158 = arith.mulf %156, %157 : vector<32x128xf32>
    %159 = vector.broadcast %1 : vector<1x128xf32> to vector<32x128xf32>
    %160 = arith.addf %158, %159 : vector<32x128xf32>
    %c0_59 = arith.constant 0 : index
    %c0_60 = arith.constant 0 : index
    %161 = vector.load %arg10[%c0_59, %c0_60] : memref<128x128xf32, #tpu.memory_space<vmem>>, vector<128x128xf32>
    %cst_61 = arith.constant dense<0.000000e+00> : vector<32x128xf32>
    %162 = tpu.matmul %160, %161, %cst_61 {dimension_numbers = #tpu.dot_dimension_numbers<[1], [0], [0], [1], [0, 0, 1, 1], [], []>} : vector<32x128xf32>, vector<128x128xf32>, vector<32x128xf32> -> vector<32x128xf32>
    %cst_62 = arith.constant 0.000000e+00 : f32
    %163 = vector.broadcast %cst_62 : f32 to vector<32x128xf32>
    %164 = arith.maximumf %162, %163 : vector<32x128xf32>
    %c0_63 = arith.constant 0 : index
    %c0_64 = arith.constant 0 : index
    %165 = vector.load %arg11[%c0_63, %c0_64] : memref<128x128xf32, #tpu.memory_space<vmem>>, vector<128x128xf32>
    %cst_65 = arith.constant dense<0.000000e+00> : vector<32x128xf32>
    %166 = tpu.matmul %164, %165, %cst_65 {dimension_numbers = #tpu.dot_dimension_numbers<[1], [0], [0], [1], [0, 0, 1, 1], [], []>} : vector<32x128xf32>, vector<128x128xf32>, vector<32x128xf32> -> vector<32x128xf32>
    %c0_66 = arith.constant 0 : index
    %c0_67 = arith.constant 0 : index
    %167 = vector.load %arg14[%c0_66, %c0_67] : memref<32x128xf32, #tpu.memory_space<vmem>>, vector<32x128xf32>
    tpu.vector_store %arg14[%c0_66, %c0_67], %166 {strides = array<i32>} : memref<32x128xf32, #tpu.memory_space<vmem>>, vector<32x128xf32>,
    %cst_68 = arith.constant 0.000000e+00 : f32
    %168 = vector.broadcast %cst_68 : f32 to vector<2x10xf32>
    %c0_69 = arith.constant 0 : index
    %c0_70 = arith.constant 0 : index
    %169 = tpu.strided_load %arg14[%c0_69, %c0_70] {strides = array<i32: 16, 1>} : memref<32x128xf32, #tpu.memory_space<vmem>>, vector<2x128xf32>
    %c0_71 = arith.constant 0 : index
    %c0_72 = arith.constant 0 : index
    %c0_73 = arith.constant 0 : index
    %170 = vector.load %arg12[%c0_71, %c0_72, %c0_73] : memref<16x10x128xf32, #tpu.memory_space<vmem>>, vector<1x10x128xf32>
    %171 = vector.shape_cast %170 : vector<1x10x128xf32> to vector<10x128xf32>
    %cst_74 = arith.constant dense<0.000000e+00> : vector<2x10xf32>
    %172 = tpu.matmul %169, %171, %cst_74 {dimension_numbers = #tpu.dot_dimension_numbers<[1], [1], [0], [0], [0, 0, 1, 0], [], []>} : vector<2x128xf32>, vector<10x128xf32>, vector<2x10xf32> -> vector<2x10xf32>
    %173 = arith.addf %168, %172 : vector<2x10xf32>
    %c1 = arith.constant 1 : index
    %c0_75 = arith.constant 0 : index
    %174 = tpu.strided_load %arg14[%c1, %c0_75] {strides = array<i32: 16, 1>} : memref<32x128xf32, #tpu.memory_space<vmem>>, vector<2x128xf32>
    %c1_76 = arith.constant 1 : index
    %c0_77 = arith.constant 0 : index
    %c0_78 = arith.constant 0 : index
    %175 = vector.load %arg12[%c1_76, %c0_77, %c0_78] : memref<16x10x128xf32, #tpu.memory_space<vmem>>, vector<1x10x128xf32>
    %176 = vector.shape_cast %175 : vector<1x10x128xf32> to vector<10x128xf32>
    %cst_79 = arith.constant dense<0.000000e+00> : vector<2x10xf32>
    %177 = tpu.matmul %174, %176, %cst_79 {dimension_numbers = #tpu.dot_dimension_numbers<[1], [1], [0], [0], [0, 0, 1, 0], [], []>} : vector<2x128xf32>, vector<10x128xf32>, vector<2x10xf32> -> vector<2x10xf32>
    %178 = arith.addf %173, %177 : vector<2x10xf32>
    %c2 = arith.constant 2 : index
    %c0_80 = arith.constant 0 : index
    %179 = tpu.strided_load %arg14[%c2, %c0_80] {strides = array<i32: 16, 1>} : memref<32x128xf32, #tpu.memory_space<vmem>>, vector<2x128xf32>
    %c2_81 = arith.constant 2 : index
    %c0_82 = arith.constant 0 : index
    %c0_83 = arith.constant 0 : index
    %180 = vector.load %arg12[%c2_81, %c0_82, %c0_83] : memref<16x10x128xf32, #tpu.memory_space<vmem>>, vector<1x10x128xf32>
    %181 = vector.shape_cast %180 : vector<1x10x128xf32> to vector<10x128xf32>
    %cst_84 = arith.constant dense<0.000000e+00> : vector<2x10xf32>
    %182 = tpu.matmul %179, %181, %cst_84 {dimension_numbers = #tpu.dot_dimension_numbers<[1], [1], [0], [0], [0, 0, 1, 0], [], []>} : vector<2x128xf32>, vector<10x128xf32>, vector<2x10xf32> -> vector<2x10xf32>
    %183 = arith.addf %178, %182 : vector<2x10xf32>
    %c3 = arith.constant 3 : index
    %c0_85 = arith.constant 0 : index
    %184 = tpu.strided_load %arg14[%c3, %c0_85] {strides = array<i32: 16, 1>} : memref<32x128xf32, #tpu.memory_space<vmem>>, vector<2x128xf32>
    %c3_86 = arith.constant 3 : index
    %c0_87 = arith.constant 0 : index
    %c0_88 = arith.constant 0 : index
    %185 = vector.load %arg12[%c3_86, %c0_87, %c0_88] : memref<16x10x128xf32, #tpu.memory_space<vmem>>, vector<1x10x128xf32>
    %186 = vector.shape_cast %185 : vector<1x10x128xf32> to vector<10x128xf32>
    %cst_89 = arith.constant dense<0.000000e+00> : vector<2x10xf32>
    %187 = tpu.matmul %184, %186, %cst_89 {dimension_numbers = #tpu.dot_dimension_numbers<[1], [1], [0], [0], [0, 0, 1, 0], [], []>} : vector<2x128xf32>, vector<10x128xf32>, vector<2x10xf32> -> vector<2x10xf32>
    %188 = arith.addf %183, %187 : vector<2x10xf32>
    %c4 = arith.constant 4 : index
    %c0_90 = arith.constant 0 : index
    %189 = tpu.strided_load %arg14[%c4, %c0_90] {strides = array<i32: 16, 1>} : memref<32x128xf32, #tpu.memory_space<vmem>>, vector<2x128xf32>
    %c4_91 = arith.constant 4 : index
    %c0_92 = arith.constant 0 : index
    %c0_93 = arith.constant 0 : index
    %190 = vector.load %arg12[%c4_91, %c0_92, %c0_93] : memref<16x10x128xf32, #tpu.memory_space<vmem>>, vector<1x10x128xf32>
    %191 = vector.shape_cast %190 : vector<1x10x128xf32> to vector<10x128xf32>
    %cst_94 = arith.constant dense<0.000000e+00> : vector<2x10xf32>
    %192 = tpu.matmul %189, %191, %cst_94 {dimension_numbers = #tpu.dot_dimension_numbers<[1], [1], [0], [0], [0, 0, 1, 0], [], []>} : vector<2x128xf32>, vector<10x128xf32>, vector<2x10xf32> -> vector<2x10xf32>
    %193 = arith.addf %188, %192 : vector<2x10xf32>
    %c5 = arith.constant 5 : index
    %c0_95 = arith.constant 0 : index
    %194 = tpu.strided_load %arg14[%c5, %c0_95] {strides = array<i32: 16, 1>} : memref<32x128xf32, #tpu.memory_space<vmem>>, vector<2x128xf32>
    %c5_96 = arith.constant 5 : index
    %c0_97 = arith.constant 0 : index
    %c0_98 = arith.constant 0 : index
    %195 = vector.load %arg12[%c5_96, %c0_97, %c0_98] : memref<16x10x128xf32, #tpu.memory_space<vmem>>, vector<1x10x128xf32>
    %196 = vector.shape_cast %195 : vector<1x10x128xf32> to vector<10x128xf32>
    %cst_99 = arith.constant dense<0.000000e+00> : vector<2x10xf32>
    %197 = tpu.matmul %194, %196, %cst_99 {dimension_numbers = #tpu.dot_dimension_numbers<[1], [1], [0], [0], [0, 0, 1, 0], [], []>} : vector<2x128xf32>, vector<10x128xf32>, vector<2x10xf32> -> vector<2x10xf32>
    %198 = arith.addf %193, %197 : vector<2x10xf32>
    %c6 = arith.constant 6 : index
    %c0_100 = arith.constant 0 : index
    %199 = tpu.strided_load %arg14[%c6, %c0_100] {strides = array<i32: 16, 1>} : memref<32x128xf32, #tpu.memory_space<vmem>>, vector<2x128xf32>
    %c6_101 = arith.constant 6 : index
    %c0_102 = arith.constant 0 : index
    %c0_103 = arith.constant 0 : index
    %200 = vector.load %arg12[%c6_101, %c0_102, %c0_103] : memref<16x10x128xf32, #tpu.memory_space<vmem>>, vector<1x10x128xf32>
    %201 = vector.shape_cast %200 : vector<1x10x128xf32> to vector<10x128xf32>
    %cst_104 = arith.constant dense<0.000000e+00> : vector<2x10xf32>
    %202 = tpu.matmul %199, %201, %cst_104 {dimension_numbers = #tpu.dot_dimension_numbers<[1], [1], [0], [0], [0, 0, 1, 0], [], []>} : vector<2x128xf32>, vector<10x128xf32>, vector<2x10xf32> -> vector<2x10xf32>
    %203 = arith.addf %198, %202 : vector<2x10xf32>
    %c7 = arith.constant 7 : index
    %c0_105 = arith.constant 0 : index
    %204 = tpu.strided_load %arg14[%c7, %c0_105] {strides = array<i32: 16, 1>} : memref<32x128xf32, #tpu.memory_space<vmem>>, vector<2x128xf32>
    %c7_106 = arith.constant 7 : index
    %c0_107 = arith.constant 0 : index
    %c0_108 = arith.constant 0 : index
    %205 = vector.load %arg12[%c7_106, %c0_107, %c0_108] : memref<16x10x128xf32, #tpu.memory_space<vmem>>, vector<1x10x128xf32>
    %206 = vector.shape_cast %205 : vector<1x10x128xf32> to vector<10x128xf32>
    %cst_109 = arith.constant dense<0.000000e+00> : vector<2x10xf32>
    %207 = tpu.matmul %204, %206, %cst_109 {dimension_numbers = #tpu.dot_dimension_numbers<[1], [1], [0], [0], [0, 0, 1, 0], [], []>} : vector<2x128xf32>, vector<10x128xf32>, vector<2x10xf32> -> vector<2x10xf32>
    %208 = arith.addf %203, %207 : vector<2x10xf32>
    %c8 = arith.constant 8 : index
    %c0_110 = arith.constant 0 : index
    %209 = tpu.strided_load %arg14[%c8, %c0_110] {strides = array<i32: 16, 1>} : memref<32x128xf32, #tpu.memory_space<vmem>>, vector<2x128xf32>
    %c8_111 = arith.constant 8 : index
    %c0_112 = arith.constant 0 : index
    %c0_113 = arith.constant 0 : index
    %210 = vector.load %arg12[%c8_111, %c0_112, %c0_113] : memref<16x10x128xf32, #tpu.memory_space<vmem>>, vector<1x10x128xf32>
    %211 = vector.shape_cast %210 : vector<1x10x128xf32> to vector<10x128xf32>
    %cst_114 = arith.constant dense<0.000000e+00> : vector<2x10xf32>
    %212 = tpu.matmul %209, %211, %cst_114 {dimension_numbers = #tpu.dot_dimension_numbers<[1], [1], [0], [0], [0, 0, 1, 0], [], []>} : vector<2x128xf32>, vector<10x128xf32>, vector<2x10xf32> -> vector<2x10xf32>
    %213 = arith.addf %208, %212 : vector<2x10xf32>
    %c9 = arith.constant 9 : index
    %c0_115 = arith.constant 0 : index
    %214 = tpu.strided_load %arg14[%c9, %c0_115] {strides = array<i32: 16, 1>} : memref<32x128xf32, #tpu.memory_space<vmem>>, vector<2x128xf32>
    %c9_116 = arith.constant 9 : index
    %c0_117 = arith.constant 0 : index
    %c0_118 = arith.constant 0 : index
    %215 = vector.load %arg12[%c9_116, %c0_117, %c0_118] : memref<16x10x128xf32, #tpu.memory_space<vmem>>, vector<1x10x128xf32>
    %216 = vector.shape_cast %215 : vector<1x10x128xf32> to vector<10x128xf32>
    %cst_119 = arith.constant dense<0.000000e+00> : vector<2x10xf32>
    %217 = tpu.matmul %214, %216, %cst_119 {dimension_numbers = #tpu.dot_dimension_numbers<[1], [1], [0], [0], [0, 0, 1, 0], [], []>} : vector<2x128xf32>, vector<10x128xf32>, vector<2x10xf32> -> vector<2x10xf32>
    %218 = arith.addf %213, %217 : vector<2x10xf32>
    %c10 = arith.constant 10 : index
    %c0_120 = arith.constant 0 : index
    %219 = tpu.strided_load %arg14[%c10, %c0_120] {strides = array<i32: 16, 1>} : memref<32x128xf32, #tpu.memory_space<vmem>>, vector<2x128xf32>
    %c10_121 = arith.constant 10 : index
    %c0_122 = arith.constant 0 : index
    %c0_123 = arith.constant 0 : index
    %220 = vector.load %arg12[%c10_121, %c0_122, %c0_123] : memref<16x10x128xf32, #tpu.memory_space<vmem>>, vector<1x10x128xf32>
    %221 = vector.shape_cast %220 : vector<1x10x128xf32> to vector<10x128xf32>
    %cst_124 = arith.constant dense<0.000000e+00> : vector<2x10xf32>
    %222 = tpu.matmul %219, %221, %cst_124 {dimension_numbers = #tpu.dot_dimension_numbers<[1], [1], [0], [0], [0, 0, 1, 0], [], []>} : vector<2x128xf32>, vector<10x128xf32>, vector<2x10xf32> -> vector<2x10xf32>
    %223 = arith.addf %218, %222 : vector<2x10xf32>
    %c11 = arith.constant 11 : index
    %c0_125 = arith.constant 0 : index
    %224 = tpu.strided_load %arg14[%c11, %c0_125] {strides = array<i32: 16, 1>} : memref<32x128xf32, #tpu.memory_space<vmem>>, vector<2x128xf32>
    %c11_126 = arith.constant 11 : index
    %c0_127 = arith.constant 0 : index
    %c0_128 = arith.constant 0 : index
    %225 = vector.load %arg12[%c11_126, %c0_127, %c0_128] : memref<16x10x128xf32, #tpu.memory_space<vmem>>, vector<1x10x128xf32>
    %226 = vector.shape_cast %225 : vector<1x10x128xf32> to vector<10x128xf32>
    %cst_129 = arith.constant dense<0.000000e+00> : vector<2x10xf32>
    %227 = tpu.matmul %224, %226, %cst_129 {dimension_numbers = #tpu.dot_dimension_numbers<[1], [1], [0], [0], [0, 0, 1, 0], [], []>} : vector<2x128xf32>, vector<10x128xf32>, vector<2x10xf32> -> vector<2x10xf32>
    %228 = arith.addf %223, %227 : vector<2x10xf32>
    %c12 = arith.constant 12 : index
    %c0_130 = arith.constant 0 : index
    %229 = tpu.strided_load %arg14[%c12, %c0_130] {strides = array<i32: 16, 1>} : memref<32x128xf32, #tpu.memory_space<vmem>>, vector<2x128xf32>
    %c12_131 = arith.constant 12 : index
    %c0_132 = arith.constant 0 : index
    %c0_133 = arith.constant 0 : index
    %230 = vector.load %arg12[%c12_131, %c0_132, %c0_133] : memref<16x10x128xf32, #tpu.memory_space<vmem>>, vector<1x10x128xf32>
    %231 = vector.shape_cast %230 : vector<1x10x128xf32> to vector<10x128xf32>
    %cst_134 = arith.constant dense<0.000000e+00> : vector<2x10xf32>
    %232 = tpu.matmul %229, %231, %cst_134 {dimension_numbers = #tpu.dot_dimension_numbers<[1], [1], [0], [0], [0, 0, 1, 0], [], []>} : vector<2x128xf32>, vector<10x128xf32>, vector<2x10xf32> -> vector<2x10xf32>
    %233 = arith.addf %228, %232 : vector<2x10xf32>
    %c13 = arith.constant 13 : index
    %c0_135 = arith.constant 0 : index
    %234 = tpu.strided_load %arg14[%c13, %c0_135] {strides = array<i32: 16, 1>} : memref<32x128xf32, #tpu.memory_space<vmem>>, vector<2x128xf32>
    %c13_136 = arith.constant 13 : index
    %c0_137 = arith.constant 0 : index
    %c0_138 = arith.constant 0 : index
    %235 = vector.load %arg12[%c13_136, %c0_137, %c0_138] : memref<16x10x128xf32, #tpu.memory_space<vmem>>, vector<1x10x128xf32>
    %236 = vector.shape_cast %235 : vector<1x10x128xf32> to vector<10x128xf32>
    %cst_139 = arith.constant dense<0.000000e+00> : vector<2x10xf32>
    %237 = tpu.matmul %234, %236, %cst_139 {dimension_numbers = #tpu.dot_dimension_numbers<[1], [1], [0], [0], [0, 0, 1, 0], [], []>} : vector<2x128xf32>, vector<10x128xf32>, vector<2x10xf32> -> vector<2x10xf32>
    %238 = arith.addf %233, %237 : vector<2x10xf32>
    %c14 = arith.constant 14 : index
    %c0_140 = arith.constant 0 : index
    %239 = tpu.strided_load %arg14[%c14, %c0_140] {strides = array<i32: 16, 1>} : memref<32x128xf32, #tpu.memory_space<vmem>>, vector<2x128xf32>
    %c14_141 = arith.constant 14 : index
    %c0_142 = arith.constant 0 : index
    %c0_143 = arith.constant 0 : index
    %240 = vector.load %arg12[%c14_141, %c0_142, %c0_143] : memref<16x10x128xf32, #tpu.memory_space<vmem>>, vector<1x10x128xf32>
    %241 = vector.shape_cast %240 : vector<1x10x128xf32> to vector<10x128xf32>
    %cst_144 = arith.constant dense<0.000000e+00> : vector<2x10xf32>
    %242 = tpu.matmul %239, %241, %cst_144 {dimension_numbers = #tpu.dot_dimension_numbers<[1], [1], [0], [0], [0, 0, 1, 0], [], []>} : vector<2x128xf32>, vector<10x128xf32>, vector<2x10xf32> -> vector<2x10xf32>
    %243 = arith.addf %238, %242 : vector<2x10xf32>
    %c15 = arith.constant 15 : index
    %c0_145 = arith.constant 0 : index
    %244 = tpu.strided_load %arg14[%c15, %c0_145] {strides = array<i32: 16, 1>} : memref<32x128xf32, #tpu.memory_space<vmem>>, vector<2x128xf32>
    %c15_146 = arith.constant 15 : index
    %c0_147 = arith.constant 0 : index
    %c0_148 = arith.constant 0 : index
    %245 = vector.load %arg12[%c15_146, %c0_147, %c0_148] : memref<16x10x128xf32, #tpu.memory_space<vmem>>, vector<1x10x128xf32>
    %246 = vector.shape_cast %245 : vector<1x10x128xf32> to vector<10x128xf32>
    %cst_149 = arith.constant dense<0.000000e+00> : vector<2x10xf32>
    %247 = tpu.matmul %244, %246, %cst_149 {dimension_numbers = #tpu.dot_dimension_numbers<[1], [1], [0], [0], [0, 0, 1, 0], [], []>} : vector<2x128xf32>, vector<10x128xf32>, vector<2x10xf32> -> vector<2x10xf32>
    %248 = arith.addf %243, %247 : vector<2x10xf32>
    %cst_150 = arith.constant dense<0xFF800000> : vector<2xf32>
    %249 = vector.multi_reduction <maximumf>, %248, %cst_150 [1] : vector<2x10xf32> to vector<2xf32>
    %250 = vector.shape_cast %249 : vector<2xf32> to vector<2x1xf32>
    %251 = vector.broadcast %250 : vector<2x1xf32> to vector<2x10xf32>
    %252 = arith.subf %248, %251 : vector<2x10xf32>
    %253 = math.exp %252 : vector<2x10xf32>
    %cst_151 = arith.constant dense<0.000000e+00> : vector<2xf32>
    %254 = vector.multi_reduction <add>, %253, %cst_151 [1] : vector<2x10xf32> to vector<2xf32>
    %255 = vector.shape_cast %254 : vector<2xf32> to vector<2x1xf32>
    %256 = vector.broadcast %255 : vector<2x1xf32> to vector<2x10xf32>
    %257 = arith.divf %253, %256 : vector<2x10xf32>
    %c0_152 = arith.constant 0 : index
    %c0_153 = arith.constant 0 : index
    %258 = vector.load %arg13[%c0_152, %c0_153] : memref<2x10xf32, #tpu.memory_space<vmem>>, vector<2x10xf32>
    tpu.vector_store %arg13[%c0_152, %c0_153], %257 {strides = array<i32>} : memref<2x10xf32, #tpu.memory_space<vmem>>, vector<2x10xf32>,
    return
  }
}

</mosaic_0001>

<bundles_post_ra>
// kernel: vit_forward.1
= control target key start
LH: loop header
LB: loop body
LE: loop exit
PB: predicated region body
PF: predicated region fallthrough
CT: control target
= control target key end

     0   :  { %18 = vsyncpa [#allocation4], 0  ;;  %s4107_s0 = inlined_call_operand.vmem [shape: f32[32,16], index: 0, kind: input, shape index: {}]   ;;  %s4108_s1 = inlined_call_operand.hbm [shape: f32[16,128], index: 1, kind: input, shape index: {}]   ;;  %s4109_s2 = inlined_call_operand.hbm [shape: f32[128,1152], index: 2, kind: input, shape index: {}]   ;;  %s4110_s3 = inlined_call_operand.vmem [shape: f32[128,128], index: 3, kind: input, shape index: {}]   ;;  %s4111_s4 = inlined_call_operand.hbm [shape: f32[1,128], index: 4, kind: input, shape index: {}]   ;;  %s4112_s5 = inlined_call_operand.hbm [shape: f32[128,1152], index: 5, kind: input, shape index: {}]   ;;  %s4113_s6 = inlined_call_operand.vmem [shape: f32[128,128], index: 6, kind: input, shape index: {}]   ;;  %s4114_s7 = inlined_call_operand.hbm [shape: f32[1,128], index: 7, kind: input, shape index: {}]   ;;  %s4115_s8 = inlined_call_operand.vmem [shape: f32[1,128], index: 8, kind: input, shape index: {}]   ;;  %s4116_s9 = inlined_call_operand.hbm [shape: f32[1,128], index: 9, kind: input, shape index: {}]   ;;  %s4117_s10 = inlined_call_operand.vmem [shape: f32[128,128], index: 10, kind: input, shape index: {}]   ;;  %s4118_s11 = inlined_call_operand.hbm [shape: f32[128,128], index: 11, kind: input, shape index: {}]   ;;  %s4119_s12 = inlined_call_operand.vmem [shape: f32[16,10,128], index: 12, kind: input, shape index: {}]   ;;  %s4120_s13 = inlined_call_operand.hbm [shape: f32[2,10], index: 13, kind: output, shape index: {}]  }
   0x1   :  { %19 = vsyncpa [#allocation7], 0 }
   0x2   :  { %20 = vsyncpa [#allocation10], 0 }
   0x3   :  { %21 = vsyncpa [#allocation13], 0  ;;  %s42_s27 = sshll.u32 %s4109_s2, 4  ;;  %s43_s27 = int_to_ptr.hbm [resolvable:$true] %s42_s27 }
   0x4   :  { %22 = vsyncpa [#allocation5], 0  ;;  %s3344_s28 = smov [#allocation6]   ;;  %s68_s15 = sshll.u32 %s4112_s5, 4  ;;  %s69_s15 = int_to_ptr.hbm [resolvable:$true] %s68_s15 }
   0x5   :  { %s44_s29 = sshll.u32 %s3344_s28, 4  ;;  %s3345_s16 = smov 1152   ;;  %s45_s29 = int_to_ptr.vmem [resolvable:$true] %s44_s29 }
   0x6   :  { %s3346_s17 = smov 72   ;;  %s3347_s18 = smov [#allocation9]  }
   0x7   :  { %50 = dma.hbm_to_vmem [thread:$0]  %s43_s27, 18432, %s45_s29, [#allocation7], %s3345_s16, %s3345_s16, %s3346_s17  }
   0x8   :  { %s70_s19 = sshll.u32 %s3347_s18, 4  ;;  %s97_s22 = sshll.u32 %s4116_s9, 4  ;;  %s71_s19 = int_to_ptr.vmem [resolvable:$true] %s70_s19  ;;  %s98_s22 = int_to_ptr.hbm [resolvable:$true] %s97_s22 }
   0x9   :  { %76 = dma.hbm_to_vmem [thread:$0]  %s69_s15, 18432, %s71_s19, [#allocation10], %s3345_s16, %s3345_s16, %s3346_s17  }
   0xa   :  { %s29_s24 = sshll.u32 %s4108_s1, 4  ;;  %s3348_s25 = smov [#allocation12]   ;;  %s30_s24 = int_to_ptr.hbm [resolvable:$true] %s29_s24 }
   0xb   :  { %s99_s26 = sshll.u32 %s3348_s25, 4  ;;  %s3349_s5 = smov [#allocation3]   ;;  %s100_s26 = int_to_ptr.vmem [resolvable:$true] %s99_s26 }
   0xc   :  { %102 = dma.hbm_to_vmem [thread:$0]  %s98_s22, 16, %s100_s26, [#allocation13]  }
   0xd   :  { %s31_s27 = sshll.u32 %s3349_s5, 4  ;;  %s3350_s28 = smov 128   ;;  %s32_s27 = int_to_ptr.vmem [resolvable:$true] %s31_s27 }
   0xe   :  { %s3351_s29 = smov 8   ;;  %s58_s14 = sshll.u32 %s4111_s4, 4  ;;  %s59_s14 = int_to_ptr.hbm [resolvable:$true] %s58_s14 }
   0xf   :  { %37 = dma.hbm_to_vmem [thread:$0]  %s30_s24, 256, %s32_s27, [#allocation4], %s3350_s28, %s3350_s28, %s3351_s29  }
  0x10   :  { %s3352_s15 = smov [#allocation8]   ;;  %s84_s18 = sshll.u32 %s4114_s7, 4  ;;  %s85_s18 = int_to_ptr.hbm [resolvable:$true] %s84_s18 }
  0x11   :  { %s60_s16 = sshll.u32 %s3352_s15, 4  ;;  %s3353_s19 = smov [#allocation11]   ;;  %s61_s16 = int_to_ptr.vmem [resolvable:$true] %s60_s16 }
  0x12   :  { %63 = dma.hbm_to_vmem [thread:$0]  %s59_s14, 16, %s61_s16, [#allocation7]  }
  0x13   :  { %s86_s20 = sshll.u32 %s3353_s19, 4  ;;  %s109_s2 = sshll.u32 %s4118_s11, 4  ;;  %s87_s20 = int_to_ptr.vmem [resolvable:$true] %s86_s20  ;;  %s110_s2 = int_to_ptr.hbm [resolvable:$true] %s109_s2 }
  0x14   :  { %89 = dma.hbm_to_vmem [thread:$0]  %s85_s18, 16, %s87_s20, [#allocation10]  }
  0x15   :  { %s3354_s4 = smov [#allocation14]  }
  0x16   :  { %s111_s23 = sshll.u32 %s3354_s4, 4  ;;  %s112_s23 = int_to_ptr.vmem [resolvable:$true] %s111_s23 }
  0x17   :  { %117 = dma.hbm_to_vmem [thread:$0]  %s110_s2, 2048, %s112_s23, [#allocation13], %s3350_s28, %s3350_s28, %s3351_s29  }
  0x18   :  { %3334 = dma.done.wait [#allocation4], 256  }
  0x19   :  { %3335 = vsyncadd [#allocation4], 4294967040 }
  0x1a   :  { %3336 = dma.done.wait [#allocation7], 18448  }
  0x1b   :  { %3337 = vsyncadd [#allocation7], 4294948848 }
  0x1c   :  { %3338 = dma.done.wait [#allocation10], 18448  }
  0x1d   :  { %3339 = vsyncadd [#allocation10], 4294948848 }
  0x1e   :  { %3340 = dma.done.wait [#allocation13], 2064  }
  0x1f   :  { %3341 = vsyncadd [#allocation13], 4294965232  ;;  %v155_v0 = vld [vmem:[#allocation3 + $0x8] sm:$0xff]  ;;  %v154_v1 = vld [vmem:[#allocation3] sm:$0xff]  ;;  %vm156_vm0 = vcmask 130048   ;;  %s2958_s30 = sshll.u32 %s4120_s13, 4  ;;  %s2959_s30 = int_to_ptr.hbm [resolvable:$true] %s2958_s30 }
  0x20   :  { %183 = vmatpush.msra.mxu0 %v155_v0  ;;  %v150_v2 = vld [vmem:[%s4107_s0] sm:$0xff]  ;;  %v333_v3 = vld [vmem:[#allocation6 + $0x438] sm:$0xff]  ;;  %v334_v4 = vld [vmem:[#allocation6 + $0x440] sm:$0xff] }
  0x21   :  { %v335_v5 = vld [vmem:[#allocation6 + $0x448] sm:$0xff]  ;;  %359 = vmatpush.msra.mxu1 %v333_v3  ;;  %v336_v6 = vld [vmem:[#allocation6 + $0x450] sm:$0xff]  ;;  %v325_v8 = vld [vmem:[#allocation6 + $0x3f8] sm:$0xff]  ;;  %388 = vmatpush.msra.mxu2 %v334_v4 }
  0x22   :  { %184 = vmatpush.msra.mxu0 %v154_v1  ;;  %v324_v7 = vld [vmem:[#allocation6 + $0x3f0] sm:$0xff]  ;;  %v326_v9 = vld [vmem:[#allocation6 + $0x400] sm:$0xff]  ;;  %v327_v10 = vld [vmem:[#allocation6 + $0x408] sm:$0xff]  ;;  %417 = vmatpush.msra.mxu3 %v335_v5 }
  0x23   :  { %2971 = vmatmul.msk.f32.vlgmr.msra.gmra.mxu0 %vm156_vm0, %v150_v2  ;;  %v315_v11 = vld [vmem:[#allocation6 + $0x3a8] sm:$0xff]  ;;  %v316_v12 = vld [vmem:[#allocation6 + $0x3b0] sm:$0xff]  ;;  %360 = vmatpush.msra.mxu1 %v324_v7  ;;  %v317_v13 = vld [vmem:[#allocation6 + $0x3b8] sm:$0xff] }
  0x24   :  { %446 = vmatpush.msrb.mxu0 %v336_v6  ;;  %389 = vmatpush.msra.mxu2 %v325_v8  ;;  %v318_v14 = vld [vmem:[#allocation6 + $0x3c0] sm:$0xff]  ;;  %v307_v16 = vld [vmem:[#allocation6 + $0x368] sm:$0xff]  ;;  %v308_v17 = vld [vmem:[#allocation6 + $0x370] sm:$0xff] }
  0x25   :  { %418 = vmatpush.msra.mxu3 %v326_v9  ;;  %v306_v15 = vld [vmem:[#allocation6 + $0x360] sm:$0xff]  ;;  %361 = vmatpush.msra.mxu1 %v315_v11  ;;  %v309_v18 = vld [vmem:[#allocation6 + $0x378] sm:$0xff]  ;;  %v299_v22 = vld [vmem:[#allocation6 + $0x328] sm:$0xff] }
  0x26   :  { %447 = vmatpush.msrb.mxu0 %v327_v10  ;;  %390 = vmatpush.msra.mxu2 %v316_v12  ;;  %v151_v19 = vld [vmem:[%s4107_s0 + $0x8] sm:$0xff]  ;;  %v298_v21 = vld [vmem:[#allocation6 + $0x320] sm:$0xff]  ;;  %v300_v23 = vld [vmem:[#allocation6 + $0x330] sm:$0xff] }
  0x27   :  { %419 = vmatpush.msra.mxu3 %v317_v13  ;;  %v297_v20 = vld [vmem:[#allocation6 + $0x318] sm:$0xff]  ;;  %362 = vmatpush.msra.mxu1 %v306_v15  ;;  %v288_v24 = vld [vmem:[#allocation6 + $0x2d0] sm:$0xff]  ;;  %v290_v26 = vld [vmem:[#allocation6 + $0x2e0] sm:$0xff] }
  0x28   :  { %448 = vmatpush.msrb.mxu0 %v318_v14  ;;  %391 = vmatpush.msra.mxu2 %v307_v16  ;;  %v289_v25 = vld [vmem:[#allocation6 + $0x2d8] sm:$0xff]  ;;  %v291_v27 = vld [vmem:[#allocation6 + $0x2e8] sm:$0xff]  ;;  %v280_v29 = vld [vmem:[#allocation6 + $0x290] sm:$0xff] }
  0x29   :  { %420 = vmatpush.msra.mxu3 %v308_v17  ;;  %363 = vmatpush.msra.mxu1 %v297_v20  ;;  %v279_v28 = vld [vmem:[#allocation6 + $0x288] sm:$0xff]  ;;  %v281_v30 = vld [vmem:[#allocation6 + $0x298] sm:$0xff]  ;;  %v282_v31 = vld [vmem:[#allocation6 + $0x2a0] sm:$0xff] }
  0x2a   :  { %449 = vmatpush.msrb.mxu0 %v309_v18  ;;  %392 = vmatpush.msra.mxu2 %v298_v21  ;;  %v270_v32 = vld [vmem:[#allocation6 + $0x240] sm:$0xff]  ;;  %v271_v33 = vld [vmem:[#allocation6 + $0x248] sm:$0xff]  ;;  %v272_v34 = vld [vmem:[#allocation6 + $0x250] sm:$0xff] }
  0x2b   :  { %2972 = vmatmul.msk.f32.gmra.mxu0 %vm156_vm0, %v151_v19  ;;  %421 = vmatpush.msra.mxu3 %v299_v22  ;;  %v152_v35 = vld [vmem:[%s4107_s0 + $0x10] sm:$0xff]  ;;  %v261_v36 = vld [vmem:[#allocation6 + $0x1f8] sm:$0xff]  ;;  %v263_v39 = vld [vmem:[#allocation6 + $0x208] sm:$0xff] }
  0x2c   :  { %450 = vmatpush.msrb.mxu0 %v300_v23  ;;  %364 = vmatpush.msra.mxu1 %v288_v24  ;;  %v273_v37 = vld [vmem:[#allocation6 + $0x258] sm:$0xff]  ;;  %v262_v38 = vld [vmem:[#allocation6 + $0x200] sm:$0xff]  ;;  %v252_v40 = vld [vmem:[#allocation6 + $0x1b0] sm:$0xff] }
  0x2d   :  { %393 = vmatpush.msra.mxu2 %v289_v25  ;;  %422 = vmatpush.msra.mxu3 %v290_v26  ;;  %v264_v41 = vld [vmem:[#allocation6 + $0x210] sm:$0xff]  ;;  %v253_v42 = vld [vmem:[#allocation6 + $0x1b8] sm:$0xff]  ;;  %v254_v43 = vld [vmem:[#allocation6 + $0x1c0] sm:$0xff] }
  0x2e   :  { %451 = vmatpush.msrb.mxu0 %v291_v27  ;;  %365 = vmatpush.msra.mxu1 %v279_v28  ;;  %v255_v44 = vld [vmem:[#allocation6 + $0x1c8] sm:$0xff]  ;;  %v244_v46 = vld [vmem:[#allocation6 + $0x170] sm:$0xff]  ;;  %v245_v47 = vld [vmem:[#allocation6 + $0x178] sm:$0xff] }
  0x2f   :  { %394 = vmatpush.msra.mxu2 %v280_v29  ;;  %423 = vmatpush.msra.mxu3 %v281_v30  ;;  %v243_v45 = vld [vmem:[#allocation6 + $0x168] sm:$0xff]  ;;  %v234_v48 = vld [vmem:[#allocation6 + $0x120] sm:$0xff]  ;;  %v236_v52 = vld [vmem:[#allocation6 + $0x130] sm:$0xff] }
  0x30   :  { %452 = vmatpush.msrb.mxu0 %v282_v31  ;;  %366 = vmatpush.msra.mxu1 %v270_v32  ;;  %v246_v49 = vld [vmem:[#allocation6 + $0x180] sm:$0xff]  ;;  %v235_v50 = vld [vmem:[#allocation6 + $0x128] sm:$0xff]  ;;  %v237_v53 = vld [vmem:[#allocation6 + $0x138] sm:$0xff] }
  0x31   :  { %395 = vmatpush.msra.mxu2 %v271_v33  ;;  %424 = vmatpush.msra.mxu3 %v272_v34  ;;  %v153_v51 = vld [vmem:[%s4107_s0 + $0x18] sm:$0xff]  ;;  %v225_v54 = vld [vmem:[#allocation6 + $0xd8] sm:$0xff]  ;;  %v226_v55 = vld [vmem:[#allocation6 + $0xe0] sm:$0xff] }
  0x32   :  { %367 = vmatpush.msra.mxu1 %v261_v36  ;;  %453 = vmatpush.msrb.mxu0 %v273_v37  ;;  %v227_v56 = vld [vmem:[#allocation6 + $0xe8] sm:$0xff]  ;;  %v228_v57 = vld [vmem:[#allocation6 + $0xf0] sm:$0xff]  ;;  %v217_v59 = vld [vmem:[#allocation6 + $0x98] sm:$0xff] }
  0x33   :  { %2973 = vmatmul.msk.f32.gmra.mxu0 %vm156_vm0, %v152_v35  ;;  %396 = vmatpush.msra.mxu2 %v262_v38  ;;  %v216_v58 = vld [vmem:[#allocation6 + $0x90] sm:$0xff]  ;;  %v218_v60 = vld [vmem:[#allocation6 + $0xa0] sm:$0xff]  ;;  %v219_v61 = vld [vmem:[#allocation6 + $0xa8] sm:$0xff] }
  0x34   :  { %425 = vmatpush.msra.mxu3 %v263_v39  ;;  %368 = vmatpush.msra.mxu1 %v252_v40  ;;  %v207_v62 = vld [vmem:[#allocation6 + $0x48] sm:$0xff]  ;;  %v208_v63 = vld [vmem:[#allocation6 + $0x50] sm:$0xff]  ;;  %v209_v0 = vld [vmem:[#allocation6 + $0x58] sm:$0xff] }
  0x35   :  { %454 = vmatpush.msrb.mxu0 %v264_v41  ;;  %397 = vmatpush.msra.mxu2 %v253_v42  ;;  %v210_v1 = vld [vmem:[#allocation6 + $0x60] sm:$0xff]  ;;  %v199_v3 = vld [vmem:[#allocation6 + $0x8] sm:$0xff]  ;;  %v200_v4 = vld [vmem:[#allocation6 + $0x10] sm:$0xff] }
  0x36   :  { %426 = vmatpush.msra.mxu3 %v254_v43  ;;  %369 = vmatpush.msra.mxu1 %v243_v45  ;;  %v198_v2 = vld [vmem:[#allocation6] sm:$0xff]  ;;  %v201_v5 = vld [vmem:[#allocation6 + $0x18] sm:$0xff]  ;;  %v339_v8 = vld [vmem:[#allocation6 + $0x468] sm:$0xff] }
  0x37   :  { %455 = vmatpush.msrb.mxu0 %v255_v44  ;;  %398 = vmatpush.msra.mxu2 %v244_v46  ;;  %v337_v6 = vld [vmem:[#allocation6 + $0x458] sm:$0xff]  ;;  %v338_v7 = vld [vmem:[#allocation6 + $0x460] sm:$0xff]  ;;  %v340_v9 = vld [vmem:[#allocation6 + $0x470] sm:$0xff] }
  0x38   :  { %427 = vmatpush.msra.mxu3 %v245_v47  ;;  %370 = vmatpush.msra.mxu1 %v234_v48  ;;  %v328_v10 = vld [vmem:[#allocation6 + $0x410] sm:$0xff]  ;;  %v329_v11 = vld [vmem:[#allocation6 + $0x418] sm:$0xff]  ;;  %v330_v12 = vld [vmem:[#allocation6 + $0x420] sm:$0xff] }
  0x39   :  { %456 = vmatpush.msrb.mxu0 %v246_v49  ;;  %399 = vmatpush.msra.mxu2 %v235_v50  ;;  %v331_v13 = vld [vmem:[#allocation6 + $0x428] sm:$0xff]  ;;  %v320_v15 = vld [vmem:[#allocation6 + $0x3d0] sm:$0xff]  ;;  %v321_v16 = vld [vmem:[#allocation6 + $0x3d8] sm:$0xff] }
  0x3a   :  { %428 = vmatpush.msra.mxu3 %v236_v52  ;;  %371 = vmatpush.msra.mxu1 %v225_v54  ;;  %v319_v14 = vld [vmem:[#allocation6 + $0x3c8] sm:$0xff]  ;;  %v322_v17 = vld [vmem:[#allocation6 + $0x3e0] sm:$0xff]  ;;  %v312_v20 = vld [vmem:[#allocation6 + $0x390] sm:$0xff] }
  0x3b   :  { %2974 = vmatmul.msk.f32.gmra.mxu0 %vm156_vm0, %v153_v51  ;;  %400 = vmatpush.msra.mxu2 %v226_v55  ;;  %v310_v18 = vld [vmem:[#allocation6 + $0x380] sm:$0xff]  ;;  %v311_v19 = vld [vmem:[#allocation6 + $0x388] sm:$0xff]  ;;  %v313_v21 = vld [vmem:[#allocation6 + $0x398] sm:$0xff] }
  0x3c   :  { %457 = vmatpush.msrb.mxu0 %v237_v53  ;;  %429 = vmatpush.msra.mxu3 %v227_v56  ;;  %v301_v22 = vld [vmem:[#allocation6 + $0x338] sm:$0xff]  ;;  %v302_v23 = vld [vmem:[#allocation6 + $0x340] sm:$0xff]  ;;  %v303_v24 = vld [vmem:[#allocation6 + $0x348] sm:$0xff] }
  0x3d   :  { %372 = vmatpush.msra.mxu1 %v216_v58  ;;  %401 = vmatpush.msra.mxu2 %v217_v59  ;;  %v304_v25 = vld [vmem:[#allocation6 + $0x350] sm:$0xff]  ;;  %v293_v27 = vld [vmem:[#allocation6 + $0x2f8] sm:$0xff]  ;;  %v294_v28 = vld [vmem:[#allocation6 + $0x300] sm:$0xff] }
  0x3e   :  { %458 = vmatpush.msrb.mxu0 %v228_v57  ;;  %430 = vmatpush.msra.mxu3 %v218_v60  ;;  %v292_v26 = vld [vmem:[#allocation6 + $0x2f0] sm:$0xff]  ;;  %v295_v29 = vld [vmem:[#allocation6 + $0x308] sm:$0xff]  ;;  %v285_v32 = vld [vmem:[#allocation6 + $0x2b8] sm:$0xff] }
  0x3f   :  { %373 = vmatpush.msra.mxu1 %v207_v62  ;;  %402 = vmatpush.msra.mxu2 %v208_v63  ;;  %v283_v30 = vld [vmem:[#allocation6 + $0x2a8] sm:$0xff]  ;;  %v284_v31 = vld [vmem:[#allocation6 + $0x2b0] sm:$0xff]  ;;  %v286_v33 = vld [vmem:[#allocation6 + $0x2c0] sm:$0xff] }
  0x40   :  { %459 = vmatpush.msrb.mxu0 %v219_v61  ;;  %431 = vmatpush.msra.mxu3 %v209_v0  ;;  %v274_v34 = vld [vmem:[#allocation6 + $0x260] sm:$0xff]  ;;  %v275_v35 = vld [vmem:[#allocation6 + $0x268] sm:$0xff]  ;;  %v276_v36 = vld [vmem:[#allocation6 + $0x270] sm:$0xff] }
  0x41   :  { %374 = vmatpush.msra.mxu1 %v198_v2  ;;  %403 = vmatpush.msra.mxu2 %v199_v3  ;;  %v277_v37 = vld [vmem:[#allocation6 + $0x278] sm:$0xff]  ;;  %v266_v39 = vld [vmem:[#allocation6 + $0x220] sm:$0xff]  ;;  %v267_v40 = vld [vmem:[#allocation6 + $0x228] sm:$0xff] }
  0x42   :  { %460 = vmatpush.msrb.mxu0 %v210_v1  ;;  %432 = vmatpush.msra.mxu3 %v200_v4  ;;  %v265_v38 = vld [vmem:[#allocation6 + $0x218] sm:$0xff]  ;;  %v268_v41 = vld [vmem:[#allocation6 + $0x230] sm:$0xff]  ;;  %v258_v44 = vld [vmem:[#allocation6 + $0x1e0] sm:$0xff] }
  0x43   :  { %475 = vmatpush.msrb.mxu1 %v337_v6  ;;  %504 = vmatpush.msrb.mxu2 %v338_v7  ;;  %v256_v42 = vld [vmem:[#allocation6 + $0x1d0] sm:$0xff]  ;;  %v257_v43 = vld [vmem:[#allocation6 + $0x1d8] sm:$0xff]  ;;  %v259_v45 = vld [vmem:[#allocation6 + $0x1e8] sm:$0xff] }
  0x44   :  { %461 = vmatpush.msrb.mxu0 %v201_v5  ;;  %533 = vmatpush.msrb.mxu3 %v339_v8  ;;  %v247_v46 = vld [vmem:[#allocation6 + $0x188] sm:$0xff]  ;;  %v248_v47 = vld [vmem:[#allocation6 + $0x190] sm:$0xff]  ;;  %v249_v48 = vld [vmem:[#allocation6 + $0x198] sm:$0xff] }
  0x45   :  { %476 = vmatpush.msrb.mxu1 %v328_v10  ;;  %505 = vmatpush.msrb.mxu2 %v329_v11  ;;  %v250_v49 = vld [vmem:[#allocation6 + $0x1a0] sm:$0xff]  ;;  %v239_v51 = vld [vmem:[#allocation6 + $0x148] sm:$0xff]  ;;  %v240_v52 = vld [vmem:[#allocation6 + $0x150] sm:$0xff] }
  0x46   :  { %562 = vmatpush.msra.mxu0 %v340_v9  ;;  %534 = vmatpush.msrb.mxu3 %v330_v12  ;;  %v238_v50 = vld [vmem:[#allocation6 + $0x140] sm:$0xff]  ;;  %v241_v53 = vld [vmem:[#allocation6 + $0x158] sm:$0xff]  ;;  %v231_v56 = vld [vmem:[#allocation6 + $0x108] sm:$0xff] }
  0x47   :  { %477 = vmatpush.msrb.mxu1 %v319_v14  ;;  %506 = vmatpush.msrb.mxu2 %v320_v15  ;;  %v229_v54 = vld [vmem:[#allocation6 + $0xf8] sm:$0xff]  ;;  %v230_v55 = vld [vmem:[#allocation6 + $0x100] sm:$0xff]  ;;  %v232_v57 = vld [vmem:[#allocation6 + $0x110] sm:$0xff] }
  0x48   :  { %563 = vmatpush.msra.mxu0 %v331_v13  ;;  %535 = vmatpush.msrb.mxu3 %v321_v16  ;;  %v220_v58 = vld [vmem:[#allocation6 + $0xb0] sm:$0xff]  ;;  %v221_v59 = vld [vmem:[#allocation6 + $0xb8] sm:$0xff]  ;;  %v222_v60 = vld [vmem:[#allocation6 + $0xc0] sm:$0xff] }
  0x49   :  { %478 = vmatpush.msrb.mxu1 %v310_v18  ;;  %507 = vmatpush.msrb.mxu2 %v311_v19  ;;  %v223_v61 = vld [vmem:[#allocation6 + $0xc8] sm:$0xff]  ;;  %v212_v63 = vld [vmem:[#allocation6 + $0x70] sm:$0xff]  ;;  %v213_v0 = vld [vmem:[#allocation6 + $0x78] sm:$0xff] }
  0x4a   :  { %564 = vmatpush.msra.mxu0 %v322_v17  ;;  %536 = vmatpush.msrb.mxu3 %v312_v20  ;;  %v211_v62 = vld [vmem:[#allocation6 + $0x68] sm:$0xff]  ;;  %v214_v1 = vld [vmem:[#allocation6 + $0x80] sm:$0xff]  ;;  %v204_v5 = vld [vmem:[#allocation6 + $0x30] sm:$0xff] }
  0x4b   :  { %479 = vmatpush.msrb.mxu1 %v301_v22  ;;  %508 = vmatpush.msrb.mxu2 %v302_v23  ;;  %v202_v3 = vld [vmem:[#allocation6 + $0x20] sm:$0xff]  ;;  %v203_v4 = vld [vmem:[#allocation6 + $0x28] sm:$0xff]  ;;  %v205_v6 = vld [vmem:[#allocation6 + $0x38] sm:$0xff] }
  0x4c   :  { %565 = vmatpush.msra.mxu0 %v313_v21  ;;  %537 = vmatpush.msrb.mxu3 %v303_v24  ;;  %v341_v7 = vld [vmem:[#allocation6 + $0x478] sm:$0xff]  ;;  %v332_v8 = vld [vmem:[#allocation6 + $0x430] sm:$0xff]  ;;  %v323_v10 = vld [vmem:[#allocation6 + $0x3e8] sm:$0xff] }
  0x4d   :  { %480 = vmatpush.msrb.mxu1 %v292_v26  ;;  %509 = vmatpush.msrb.mxu2 %v293_v27  ;;  %v314_v11 = vld [vmem:[#allocation6 + $0x3a0] sm:$0xff]  ;;  %v305_v12 = vld [vmem:[#allocation6 + $0x358] sm:$0xff]  ;;  %v296_v14 = vld [vmem:[#allocation6 + $0x310] sm:$0xff] }
  0x4e   :  { %566 = vmatpush.msra.mxu0 %v304_v25  ;;  %538 = vmatpush.msrb.mxu3 %v294_v28  ;;  %v287_v15 = vld [vmem:[#allocation6 + $0x2c8] sm:$0xff]  ;;  %v278_v16 = vld [vmem:[#allocation6 + $0x280] sm:$0xff]  ;;  %v269_v18 = vld [vmem:[#allocation6 + $0x238] sm:$0xff] }
  0x4f   :  { %481 = vmatpush.msrb.mxu1 %v283_v30  ;;  %510 = vmatpush.msrb.mxu2 %v284_v31  ;;  %v260_v19 = vld [vmem:[#allocation6 + $0x1f0] sm:$0xff]  ;;  %v251_v20 = vld [vmem:[#allocation6 + $0x1a8] sm:$0xff]  ;;  %v242_v21 = vld [vmem:[#allocation6 + $0x160] sm:$0xff] }
  0x50   :  { %567 = vmatpush.msra.mxu0 %v295_v29  ;;  %539 = vmatpush.msrb.mxu3 %v285_v32  ;;  %v233_v22 = vld [vmem:[#allocation6 + $0x118] sm:$0xff]  ;;  %v224_v23 = vld [vmem:[#allocation6 + $0xd0] sm:$0xff]  ;;  %v215_v24 = vld [vmem:[#allocation6 + $0x88] sm:$0xff] }
  0x51   :  { %482 = vmatpush.msrb.mxu1 %v274_v34  ;;  %511 = vmatpush.msrb.mxu2 %v275_v35  ;;  %v206_v25 = vld [vmem:[#allocation6 + $0x40] sm:$0xff] }
  0x52   :  { %568 = vmatpush.msra.mxu0 %v286_v33  ;;  %540 = vmatpush.msrb.mxu3 %v276_v36 }
  0x53   :  { %483 = vmatpush.msrb.mxu1 %v265_v38  ;;  %512 = vmatpush.msrb.mxu2 %v266_v39 }
  0x54   :  { %569 = vmatpush.msra.mxu0 %v277_v37  ;;  %541 = vmatpush.msrb.mxu3 %v267_v40 }
  0x55   :  { %484 = vmatpush.msrb.mxu1 %v256_v42  ;;  %513 = vmatpush.msrb.mxu2 %v257_v43 }
  0x56   :  { %570 = vmatpush.msra.mxu0 %v268_v41  ;;  %542 = vmatpush.msrb.mxu3 %v258_v44 }
  0x57   :  { %485 = vmatpush.msrb.mxu1 %v247_v46  ;;  %514 = vmatpush.msrb.mxu2 %v248_v47 }
  0x58   :  { %571 = vmatpush.msra.mxu0 %v259_v45  ;;  %543 = vmatpush.msrb.mxu3 %v249_v48 }
  0x59   :  { %486 = vmatpush.msrb.mxu1 %v238_v50  ;;  %515 = vmatpush.msrb.mxu2 %v239_v51 }
  0x5a   :  { %572 = vmatpush.msra.mxu0 %v250_v49  ;;  %544 = vmatpush.msrb.mxu3 %v240_v52 }
  0x5b   :  { %487 = vmatpush.msrb.mxu1 %v229_v54  ;;  %516 = vmatpush.msrb.mxu2 %v230_v55 }
  0x5c   :  { %573 = vmatpush.msra.mxu0 %v241_v53  ;;  %545 = vmatpush.msrb.mxu3 %v231_v56 }
  0x5d   :  { %488 = vmatpush.msrb.mxu1 %v220_v58  ;;  %517 = vmatpush.msrb.mxu2 %v221_v59 }
  0x5e   :  { %574 = vmatpush.msra.mxu0 %v232_v57  ;;  %546 = vmatpush.msrb.mxu3 %v222_v60 }
  0x5f   :  { %489 = vmatpush.msrb.mxu1 %v211_v62  ;;  %518 = vmatpush.msrb.mxu2 %v212_v63 }
  0x60   :  { %575 = vmatpush.msra.mxu0 %v223_v61  ;;  %547 = vmatpush.msrb.mxu3 %v213_v0 }
  0x61   :  { %490 = vmatpush.msrb.mxu1 %v202_v3  ;;  %519 = vmatpush.msrb.mxu2 %v203_v4 }
  0x62   :  { %576 = vmatpush.msra.mxu0 %v214_v1  ;;  %548 = vmatpush.msrb.mxu3 %v204_v5 }
  0x64   :  { %577 = vmatpush.msra.mxu0 %v205_v6 }
  0xa0   :  { %v3464_v2 = vpop.f32.mrf.mxu0 }
  0xa1   :  { %375 = vmatmul.f32.vlgmr.msra.gmra.mxu1 %v3464_v2  ;;  %404 = vmatmul.f32.vlgmr.msra.gmra.mxu2 %v3464_v2 }
  0xa2   :  { %433 = vmatmul.f32.vlgmr.msra.gmra.mxu3 %v3464_v2  ;;  %462 = vmatmul.f32.vlgmr.msrb.gmra.mxu0 %v3464_v2 }
  0xa3   :  { %591 = vmatpush.msra.mxu1 %v341_v7 }
  0xa5   :  { %592 = vmatpush.msra.mxu1 %v332_v8 }
  0xa7   :  { %593 = vmatpush.msra.mxu1 %v323_v10 }
  0xa8   :  { %v3470_v9 = vpop.f32.mrf.mxu0 }
  0xa9   :  { %378 = vmatmul.f32.gmra.mxu1 %v3470_v9  ;;  %407 = vmatmul.f32.gmra.mxu2 %v3470_v9 }
  0xaa   :  { %436 = vmatmul.f32.gmra.mxu3 %v3470_v9  ;;  %465 = vmatmul.f32.gmra.mxu0 %v3470_v9 }
  0xab   :  { %594 = vmatpush.msra.mxu1 %v314_v11 }
  0xad   :  { %595 = vmatpush.msra.mxu1 %v305_v12 }
  0xaf   :  { %596 = vmatpush.msra.mxu1 %v296_v14 }
  0xb0   :  { %v3476_v13 = vpop.f32.mrf.mxu0 }
  0xb1   :  { %381 = vmatmul.f32.gmra.mxu1 %v3476_v13  ;;  %410 = vmatmul.f32.gmra.mxu2 %v3476_v13 }
  0xb2   :  { %439 = vmatmul.f32.gmra.mxu3 %v3476_v13  ;;  %468 = vmatmul.f32.gmra.mxu0 %v3476_v13 }
  0xb3   :  { %597 = vmatpush.msra.mxu1 %v287_v15 }
  0xb5   :  { %598 = vmatpush.msra.mxu1 %v278_v16 }
  0xb7   :  { %599 = vmatpush.msra.mxu1 %v269_v18 }
  0xb8   :  { %v3482_v17 = vpop.f32.mrf.mxu0 }
  0xb9   :  { %384 = vmatmul.f32.gmra.mxu1 %v3482_v17  ;;  %413 = vmatmul.f32.gmra.mxu2 %v3482_v17 }
  0xba   :  { %442 = vmatmul.f32.gmra.mxu3 %v3482_v17  ;;  %471 = vmatmul.f32.gmra.mxu0 %v3482_v17 }
  0xbb   :  { %600 = vmatpush.msra.mxu1 %v260_v19 }
  0xbd   :  { %601 = vmatpush.msra.mxu1 %v251_v20 }
  0xbf   :  { %602 = vmatpush.msra.mxu1 %v242_v21 }
  0xc1   :  { %491 = vmatmul.f32.vlgmr.msrb.gmra.mxu1 %v3464_v2  ;;  %520 = vmatmul.f32.vlgmr.msrb.gmra.mxu2 %v3464_v2 }
  0xc2   :  { %549 = vmatmul.f32.vlgmr.msrb.gmra.mxu3 %v3464_v2  ;;  %578 = vmatmul.f32.vlgmr.msra.gmra.mxu0 %v3464_v2 }
  0xc3   :  { %603 = vmatpush.msra.mxu1 %v233_v22 }
  0xc5   :  { %604 = vmatpush.msra.mxu1 %v224_v23 }
  0xc7   :  { %605 = vmatpush.msra.mxu1 %v215_v24 }
  0xc9   :  { %494 = vmatmul.f32.gmra.mxu1 %v3470_v9  ;;  %523 = vmatmul.f32.gmra.mxu2 %v3470_v9 }
  0xca   :  { %552 = vmatmul.f32.gmra.mxu3 %v3470_v9  ;;  %581 = vmatmul.f32.gmra.mxu0 %v3470_v9 }
  0xcb   :  { %606 = vmatpush.msra.mxu1 %v206_v25 }
  0xd1   :  { %497 = vmatmul.f32.gmra.mxu1 %v3476_v13  ;;  %526 = vmatmul.f32.gmra.mxu2 %v3476_v13 }
  0xd2   :  { %555 = vmatmul.f32.gmra.mxu3 %v3476_v13  ;;  %584 = vmatmul.f32.gmra.mxu0 %v3476_v13 }
  0xd9   :  { %500 = vmatmul.f32.gmra.mxu1 %v3482_v17  ;;  %529 = vmatmul.f32.gmra.mxu2 %v3482_v17 }
  0xda   :  { %558 = vmatmul.f32.gmra.mxu3 %v3482_v17  ;;  %587 = vmatmul.f32.gmra.mxu0 %v3482_v17 }
  0xe1   :  { %607 = vmatmul.f32.vlgmr.msra.gmra.mxu1 %v3464_v2 }
  0xe9   :  { %610 = vmatmul.f32.gmra.mxu1 %v3470_v9 }
  0xf1   :  { %613 = vmatmul.f32.gmra.mxu1 %v3476_v13 }
  0xf9   :  { %616 = vmatmul.f32.gmra.mxu1 %v3482_v17 }
 0x11e   :  { %v376_v26 = vpop.f32.mrf.mxu1 }
 0x11f   :  { %v463_v27 = vpop.f32.mrf.mxu0 }
 0x124   :  { %v405_v28 = vpop.f32.mrf.mxu2 }
 0x125   :  { %v3508_v29 = vpop.f32.mrf.mxu3 }
 0x126   :  { %v379_v30 = vpop.f32.mrf.mxu1 }
 0x127   :  { %v466_v31 = vpop.f32.mrf.mxu0 }
 0x128   :  { %634 = vmatpush.xpose.msra.mxu2 %v466_v31 }
 0x12c   :  { %635 = vmatpush.xpose.msra.mxu2 %v463_v27  ;;  %v408_v32 = vpop.f32.mrf.mxu2 }
 0x12d   :  { %v3510_v33 = vpop.f32.mrf.mxu3 }
 0x12e   :  { %v382_v34 = vpop.f32.mrf.mxu1 }
 0x12f   :  { %v469_v35 = vpop.f32.mrf.mxu0  ;;  %636 = vmatmul.f32.vlgmr.msra.gmra.mxu2 %v376_v26 }
 0x134   :  { %v411_v36 = vpop.f32.mrf.mxu2 }
 0x135   :  { %v3512_v37 = vpop.f32.mrf.mxu3 }
 0x136   :  { %v385_v38 = vpop.f32.mrf.mxu1 }
 0x137   :  { %v472_v39 = vpop.f32.mrf.mxu0  ;;  %639 = vmatmul.f32.gmra.mxu2 %v379_v30 }
 0x138   :  { %657 = vmatpush.xpose.msra.mxu3 %v472_v39 }
 0x13c   :  { %658 = vmatpush.xpose.msra.mxu3 %v469_v35  ;;  %v414_v40 = vpop.f32.mrf.mxu2 }
 0x13d   :  { %v3514_v41 = vpop.f32.mrf.mxu3 }
 0x13e   :  { %v492_v42 = vpop.f32.mrf.mxu1 }
 0x13f   :  { %v579_v43 = vpop.f32.mrf.mxu0  ;;  %659 = vmatmul.f32.vlgmr.msra.gmra.mxu3 %v382_v34 }
 0x144   :  { %v521_v44 = vpop.f32.mrf.mxu2 }
 0x145   :  { %v550_v45 = vpop.f32.mrf.mxu3 }
 0x146   :  { %v495_v46 = vpop.f32.mrf.mxu1 }
 0x147   :  { %v582_v47 = vpop.f32.mrf.mxu0  ;;  %662 = vmatmul.f32.gmra.mxu3 %v385_v38  ;;  %760 = vmatpush.xpose.msrb.mxu0 %v495_v46 }
 0x148   :  { %892 = vmatpush.msrb.mxu3 %v582_v47 }
 0x14a   :  { %893 = vmatpush.msrb.mxu3 %v579_v43 }
 0x14b   :  { %761 = vmatpush.xpose.msrb.mxu0 %v492_v42 }
 0x14c   :  { %v524_v48 = vpop.f32.mrf.mxu2 }
 0x14d   :  { %v553_v49 = vpop.f32.mrf.mxu3  ;;  %1002 = vmatpush.xpose.msra.mxu3 %v524_v48 }
 0x14e   :  { %950 = vmatpush.msrb.mxu1 %v553_v49  ;;  %v498_v50 = vpop.f32.mrf.mxu1  ;;  %762 = vmatmul.f32.vlgmr.msrb.gmra.mxu0 %v405_v28 }
 0x14f   :  { %v585_v51 = vpop.f32.mrf.mxu0 }
 0x150   :  { %951 = vmatpush.msrb.mxu1 %v550_v45 }
 0x151   :  { %1003 = vmatpush.xpose.msra.mxu3 %v521_v44 }
 0x154   :  { %v527_v52 = vpop.f32.mrf.mxu2 }
 0x155   :  { %v556_v53 = vpop.f32.mrf.mxu3 }
 0x156   :  { %v501_v54 = vpop.f32.mrf.mxu1  ;;  %765 = vmatmul.f32.gmra.mxu0 %v408_v32 }
 0x157   :  { %v588_v55 = vpop.f32.mrf.mxu0  ;;  %783 = vmatpush.xpose.msrb.mxu2 %v501_v54 }
 0x158   :  { %921 = vmatpush.msra.mxu0 %v588_v55 }
 0x15a   :  { %922 = vmatpush.msra.mxu0 %v585_v51 }
 0x15b   :  { %784 = vmatpush.xpose.msrb.mxu2 %v498_v50 }
 0x15c   :  { %v530_v56 = vpop.f32.mrf.mxu2 }
 0x15d   :  { %v559_v57 = vpop.f32.mrf.mxu3  ;;  %1025 = vmatpush.xpose.msrb.mxu0 %v530_v56 }
 0x15e   :  { %v608_v58 = vpop.f32.mrf.mxu1  ;;  %785 = vmatmul.f32.vlgmr.msrb.gmra.mxu2 %v411_v36 }
 0x15f   :  { %979 = vmatpush.msra.mxu2 %v559_v57 }
 0x161   :  { %980 = vmatpush.msra.mxu2 %v556_v53  ;;  %1026 = vmatpush.xpose.msrb.mxu0 %v527_v52 }
 0x166   :  { %v611_v59 = vpop.f32.mrf.mxu1  ;;  %788 = vmatmul.f32.gmra.mxu2 %v414_v40 }
 0x167   :  { %1134 = vmatpush.msra.mxu1 %v611_v59 }
 0x169   :  { %1135 = vmatpush.msra.mxu1 %v608_v58 }
 0x16e   :  { %v614_v60 = vpop.f32.mrf.mxu1 }
 0x176   :  { %v617_v61 = vpop.f32.mrf.mxu1 }
 0x177   :  { %1163 = vmatpush.msrb.mxu2 %v617_v61 }
 0x179   :  { %1164 = vmatpush.msrb.mxu2 %v614_v60 }
 0x1b2   :  { %v637_v62 = vpop.f32.mrf.mxu2 }
 0x1b3   :  { %v666_v0 = vsel %vm156_vm0, %v637_v62, -inf }
 0x1ba   :  { %v640_v63 = vpop.f32.mrf.mxu2 }
 0x1bb   :  { %v667_v1 = vsel %vm156_vm0, %v640_v63, -inf }
 0x1bc   :  { %v668_v3 = vmax.f32 %v666_v0, %v667_v1 }
 0x1be   :  { %v669_v4 = vrot.slane %v668_v3, 4 }
 0x1c0   :  { %v670_v5 = vmax.f32 %v668_v3, %v669_v4 }
 0x1c2   :  { %v671_v6 = vrot.slane %v670_v5, 2  ;;  %v660_v7 = vpop.f32.mrf.mxu3 }
 0x1c3   :  { %v675_v16 = vsel %vm156_vm0, %v660_v7, -inf }
 0x1c4   :  { %v672_v8 = vmax.f32 %v670_v5, %v671_v6 }
 0x1c6   :  { %v673_v10 = vrot.slane %v672_v8, 1 }
 0x1c8   :  { %v674_v11 = vmax.f32 %v672_v8, %v673_v10 }
 0x1ca   :  { %v684_v12 = vsub.f32 %v637_v62, %v674_v11  ;;  %v685_v14 = vsub.f32 %v640_v63, %v674_v11  ;;  %v663_v15 = vpop.f32.mrf.mxu3 }
 0x1cb   :  { %v676_v18 = vsel %vm156_vm0, %v663_v15, -inf  ;;  %v763_v19 = vpop.f32.mrf.mxu0 }
 0x1cc   :  { %v688_v20 = vmul.f32 1.442695, %v684_v12  ;;  %v690_v21 = vmul.f32 1.442695, %v685_v14  ;;  %v677_v22 = vmax.f32 %v675_v16, %v676_v18  ;;  %v792_v30 = vsel %vm156_vm0, %v763_v19, -inf }
 0x1ce   :  { %3046 = vpow2.f32 %v688_v20  ;;  %v678_v23 = vrot.slane %v677_v22, 4 }
 0x1cf   :  { %3048 = vpow2.f32 %v690_v21 }
 0x1d0   :  { %v679_v24 = vmax.f32 %v677_v22, %v678_v23 }
 0x1d2   :  { %v680_v25 = vrot.slane %v679_v24, 2 }
 0x1d3   :  { %v766_v26 = vpop.f32.mrf.mxu0 }
 0x1d4   :  { %v3520_v27 = vpop.eup %3046  ;;  %v681_v28 = vmax.f32 %v679_v24, %v680_v25  ;;  %v793_v31 = vsel %vm156_vm0, %v766_v26, -inf }
 0x1d5   :  { %v3524_v32 = vpop.eup %3048  ;;  %v696_v34 = vsel %vm156_vm0, %v3520_v27, 0.0  ;;  %v794_v35 = vmax.f32 %v792_v30, %v793_v31 }
 0x1d6   :  { %v697_v36 = vsel %vm156_vm0, %v3524_v32, 0.0  ;;  %v682_v38 = vrot.slane %v681_v28, 1 }
 0x1d7   :  { %v698_v39 = vadd.f32 %v697_v36, %v696_v34  ;;  %v795_v40 = vrot.slane %v794_v35, 4 }
 0x1d8   :  { %v683_v42 = vmax.f32 %v681_v28, %v682_v38 }
 0x1d9   :  { %v699_v43 = vrot.slane %v698_v39, 4  ;;  %v796_v44 = vmax.f32 %v794_v35, %v795_v40 }
 0x1da   :  { %v686_v45 = vsub.f32 %v660_v7, %v683_v42  ;;  %v687_v46 = vsub.f32 %v663_v15, %v683_v42 }
 0x1db   :  { %v700_v47 = vadd.f32 %v699_v43, %v698_v39  ;;  %v797_v48 = vrot.slane %v796_v44, 2 }
 0x1dc   :  { %v692_v49 = vmul.f32 1.442695, %v686_v45  ;;  %v694_v50 = vmul.f32 1.442695, %v687_v46 }
 0x1dd   :  { %v701_v51 = vrot.slane %v700_v47, 2  ;;  %v798_v52 = vmax.f32 %v796_v44, %v797_v48 }
 0x1de   :  { %3050 = vpow2.f32 %v692_v49 }
 0x1df   :  { %v702_v53 = vadd.f32 %v701_v51, %v700_v47  ;;  %3052 = vpow2.f32 %v694_v50  ;;  %v799_v54 = vrot.slane %v798_v52, 1 }
 0x1e1   :  { %v703_v55 = vrot.slane %v702_v53, 1  ;;  %v800_v56 = vmax.f32 %v798_v52, %v799_v54  ;;  %v786_v57 = vpop.f32.mrf.mxu2 }
 0x1e2   :  { %v801_v10 = vsel %vm156_vm0, %v786_v57, -inf }
 0x1e3   :  { %v704_v58 = vadd.f32 %v703_v55, %v702_v53  ;;  %v810_v59 = vsub.f32 %v763_v19, %v800_v56  ;;  %v811_v60 = vsub.f32 %v766_v26, %v800_v56 }
 0x1e4   :  { %v3530_v61 = vpop.eup %3050 }
 0x1e5   :  { %v3532_v62 = vpop.eup %3052  ;;  %3054 = vrcp.f32 %v704_v58  ;;  %v705_v63 = vsel %vm156_vm0, %v3530_v61, 0.0  ;;  %v814_v0 = vmul.f32 1.442695, %v810_v59  ;;  %v816_v1 = vmul.f32 1.442695, %v811_v60 }
 0x1e6   :  { %v706_v3 = vsel %vm156_vm0, %v3532_v62, 0.0  ;;  %v723_v24 = vand.u32 2147483647, %v704_v58  ;;  %v725_v25 = vand.u32 2147483648, %v704_v58  ;;  %vm719_vm2 = vweird.f32 %v704_v58 }
 0x1e7   :  { %v707_v4 = vadd.f32 %v706_v3, %v705_v63  ;;  %3056 = vpow2.f32 %v814_v0 }
 0x1e8   :  { %3058 = vpow2.f32 %v816_v1  ;;  %v726_v39 = vor.u32 1.1754944e-38, %v725_v25  ;;  %vm724_vm4 = vcmp.eq.f32.partialorder %v723_v24, 8.507059e+37 }
 0x1e9   :  { %v708_v5 = vrot.slane %v707_v4, 4  ;;  %v789_v6 = vpop.f32.mrf.mxu2 }
 0x1ea   :  { %v802_v11 = vsel %vm156_vm0, %v789_v6, -inf }
 0x1eb   :  { %v3055_v7 = vpop.eup %3054  ;;  %v709_v8 = vadd.f32 %v708_v5, %v707_v4  ;;  %v803_v12 = vmax.f32 %v801_v10, %v802_v11 }
 0x1ec   :  { %v715_v14 = vmul.f32 %v3055_v7, %v704_v58  ;;  %vm720_vm1 = vweird.f32 %v3055_v7 }
 0x1ed   :  { %v3540_v15 = vpop.eup %3056  ;;  %v710_v16 = vrot.slane %v709_v8, 2  ;;  %v804_v20 = vrot.slane %v803_v12, 4  ;;  %vm721_vm3 = vmor %vm719_vm2, %vm720_vm1 }
 0x1ee   :  { %v3542_v18 = vpop.eup %3058  ;;  %v822_v19 = vsel %vm156_vm0, %v3540_v15, 0.0  ;;  %v716_v21 = vsub.f32 1.0, %v715_v14 }
 0x1ef   :  { %v711_v22 = vadd.f32 %v710_v16, %v709_v8  ;;  %v823_v23 = vsel %vm156_vm0, %v3542_v18, 0.0  ;;  %v805_v28 = vmax.f32 %v803_v12, %v804_v20 }
 0x1f0   :  { %v824_v26 = vadd.f32 %v823_v23, %v822_v19  ;;  %v717_v30 = vmul.f32 %v3055_v7, %v716_v21 }
 0x1f1   :  { %v712_v31 = vrot.slane %v711_v22, 1  ;;  %v806_v35 = vrot.slane %v805_v28, 2 }
 0x1f2   :  { %v825_v34 = vrot.slane %v824_v26, 4  ;;  %v718_v36 = vadd.f32 %v3055_v7, %v717_v30 }
 0x1f3   :  { %v713_v38 = vadd.f32 %v712_v31, %v711_v22  ;;  %v807_v42 = vmax.f32 %v805_v28, %v806_v35 }
 0x1f4   :  { %v826_v40 = vadd.f32 %v825_v34, %v824_v26  ;;  %v722_v43 = vsel %vm721_vm3, %v3055_v7, %v718_v36 }
 0x1f5   :  { %3060 = vrcp.f32 %v713_v38  ;;  %v727_v44 = vsel %vm724_vm4, %v726_v39, %v722_v43  ;;  %v808_v46 = vrot.slane %v807_v42, 1  ;;  %v741_v63 = vand.u32 2147483648, %v713_v38 }
 0x1f6   :  { %v827_v45 = vrot.slane %v826_v40, 2  ;;  %v728_v47 = vmul.f32 %v3520_v27, %v727_v44  ;;  %v729_v59 = vmul.f32 %v3524_v32, %v727_v44  ;;  %v739_v0 = vand.u32 2147483647, %v713_v38 }
 0x1f7   :  { %v809_v49 = vmax.f32 %v807_v42, %v808_v46  ;;  %vm735_vm6 = vweird.f32 %v713_v38 }
 0x1f8   :  { %v828_v48 = vadd.f32 %v827_v45, %v826_v40  ;;  %2979 = vmatmul.msk.f32.vlgmr.msrb.gmra.mxu1 %vm156_vm0, %v728_v47  ;;  %vm740_vm8 = vcmp.eq.f32.partialorder %v739_v0, 8.507059e+37 }
 0x1f9   :  { %v812_v51 = vsub.f32 %v786_v57, %v809_v49  ;;  %v813_v52 = vsub.f32 %v789_v6, %v809_v49  ;;  %v742_v57 = vor.u32 1.1754944e-38, %v741_v63 }
 0x1fa   :  { %v829_v50 = vrot.slane %v828_v48, 1 }
 0x1fb   :  { %v3061_v53 = vpop.eup %3060  ;;  %v818_v55 = vmul.f32 1.442695, %v812_v51  ;;  %v820_v56 = vmul.f32 1.442695, %v813_v52 }
 0x1fc   :  { %v830_v54 = vadd.f32 %v829_v50, %v828_v48  ;;  %v731_v58 = vmul.f32 %v3061_v53, %v713_v38  ;;  %vm736_vm5 = vweird.f32 %v3061_v53 }
 0x1fd   :  { %vm737_vm7 = vmor %vm735_vm6, %vm736_vm5 }
 0x1fe   :  { %3062 = vrcp.f32 %v830_v54  ;;  %v732_v60 = vsub.f32 1.0, %v731_v58  ;;  %v851_v16 = vand.u32 2147483648, %v830_v54  ;;  %v849_v20 = vand.u32 2147483647, %v830_v54 }
 0x1ff   :  { %3064 = vpow2.f32 %v818_v55  ;;  %vm845_vm10 = vweird.f32 %v830_v54 }
 0x200   :  { %3066 = vpow2.f32 %v820_v56  ;;  %2980 = vmatmul.msk.f32.gmra.mxu1 %vm156_vm0, %v729_v59  ;;  %v733_v27 = vmul.f32 %v3061_v53, %v732_v60  ;;  %v852_v24 = vor.u32 1.1754944e-38, %v851_v16  ;;  %vm850_vm12 = vcmp.eq.f32.partialorder %v849_v20, 8.507059e+37 }
 0x202   :  { %v734_v1 = vadd.f32 %v3061_v53, %v733_v27 }
 0x204   :  { %v3063_v3 = vpop.eup %3062  ;;  %v738_v4 = vsel %vm737_vm7, %v3061_v53, %v734_v1 }
 0x205   :  { %v3065_v5 = vpop.eup %3064  ;;  %v743_v6 = vsel %vm740_vm8, %v742_v57, %v738_v4  ;;  %v841_v7 = vmul.f32 %v3063_v3, %v830_v54  ;;  %vm846_vm9 = vweird.f32 %v3063_v3 }
 0x206   :  { %v3067_v32 = vpop.eup %3066  ;;  %v831_v8 = vsel %vm156_vm0, %v3065_v5, 0.0  ;;  %v744_v10 = vmul.f32 %v3530_v61, %v743_v6  ;;  %vm847_vm11 = vmor %vm845_vm10, %vm846_vm9  ;;  %v745_v61 = vmul.f32 %v3532_v62, %v743_v6 }
 0x207   :  { %v832_v11 = vsel %vm156_vm0, %v3067_v32, 0.0  ;;  %v842_v12 = vsub.f32 1.0, %v841_v7 }
 0x208   :  { %v833_v14 = vadd.f32 %v832_v11, %v831_v8  ;;  %2981 = vmatmul.msk.f32.vlgmr.msra.gmra.mxu2 %vm156_vm0, %v744_v10 }
 0x209   :  { %v843_v19 = vmul.f32 %v3063_v3, %v842_v12 }
 0x20a   :  { %v834_v21 = vrot.slane %v833_v14, 4 }
 0x20b   :  { %v844_v22 = vadd.f32 %v3063_v3, %v843_v19 }
 0x20c   :  { %v835_v23 = vadd.f32 %v834_v21, %v833_v14 }
 0x20d   :  { %v848_v25 = vsel %vm847_vm11, %v3063_v3, %v844_v22 }
 0x20e   :  { %v836_v26 = vrot.slane %v835_v23, 2  ;;  %v853_v28 = vsel %vm850_vm12, %v852_v24, %v848_v25 }
 0x20f   :  { %v854_v30 = vmul.f32 %v3540_v15, %v853_v28  ;;  %v855_v36 = vmul.f32 %v3542_v18, %v853_v28 }
 0x210   :  { %v837_v31 = vadd.f32 %v836_v26, %v835_v23  ;;  %2982 = vmatmul.msk.f32.gmra.mxu2 %vm156_vm0, %v745_v61 }
 0x211   :  { %2975 = vmatmul.msk.f32.vlgmr.msrb.gmra.mxu3 %vm156_vm0, %v854_v30 }
 0x212   :  { %v838_v34 = vrot.slane %v837_v31, 1 }
 0x214   :  { %v839_v35 = vadd.f32 %v838_v34, %v837_v31 }
 0x216   :  { %3068 = vrcp.f32 %v839_v35  ;;  %v867_v42 = vand.u32 2147483648, %v839_v35  ;;  %v865_v15 = vand.u32 2147483647, %v839_v35  ;;  %vm861_vm14 = vweird.f32 %v839_v35 }
 0x218   :  { %v868_v44 = vor.u32 1.1754944e-38, %v867_v42  ;;  %vm866_vm1 = vcmp.eq.f32.partialorder %v865_v15, 8.507059e+37 }
 0x219   :  { %2976 = vmatmul.msk.f32.gmra.mxu3 %vm156_vm0, %v855_v36 }
 0x21c   :  { %v3069_v38 = vpop.eup %3068 }
 0x21d   :  { %v857_v39 = vmul.f32 %v3069_v38, %v839_v35  ;;  %vm862_vm13 = vweird.f32 %v3069_v38 }
 0x21e   :  { %vm863_vm15 = vmor %vm861_vm14, %vm862_vm13 }
 0x21f   :  { %v858_v40 = vsub.f32 1.0, %v857_v39 }
 0x221   :  { %1004 = vmatmul.f32.vlgmr.msra.gmra.mxu3 %v3508_v29  ;;  %v859_v62 = vmul.f32 %v3069_v38, %v858_v40 }
 0x223   :  { %v860_v43 = vadd.f32 %v3069_v38, %v859_v62 }
 0x225   :  { %v864_v45 = vsel %vm863_vm15, %v3069_v38, %v860_v43 }
 0x226   :  { %v869_v46 = vsel %vm866_vm1, %v868_v44, %v864_v45 }
 0x227   :  { %v870_v47 = vmul.f32 %v3065_v5, %v869_v46  ;;  %v871_v18 = vmul.f32 %v3067_v32, %v869_v46 }
 0x229   :  { %2977 = vmatmul.msk.f32.vlgmr.msra.gmra.mxu0 %vm156_vm0, %v870_v47  ;;  %1007 = vmatmul.f32.gmra.mxu3 %v3510_v33 }
 0x231   :  { %2978 = vmatmul.msk.f32.gmra.mxu0 %vm156_vm0, %v871_v18 }
 0x239   :  { %1027 = vmatmul.f32.vlgmr.msrb.gmra.mxu0 %v3512_v37 }
 0x241   :  { %1030 = vmatmul.f32.gmra.mxu0 %v3514_v41 }
 0x294   :  { %v3568_v29 = vpop.f32.mrf.mxu3 }
 0x29c   :  { %v3570_v48 = vpop.f32.mrf.mxu3 }
 0x2a4   :  { %v1005_v49 = vpop.f32.mrf.mxu3 }
 0x2a5   :  { %v1034_v52 = vsel %vm156_vm0, %v1005_v49, -inf }
 0x2a6   :  { %v3572_v50 = vpop.f32.mrf.mxu0 }
 0x2ac   :  { %v1008_v51 = vpop.f32.mrf.mxu3 }
 0x2ad   :  { %v1035_v53 = vsel %vm156_vm0, %v1008_v51, -inf }
 0x2ae   :  { %v3576_v33 = vpop.f32.mrf.mxu0  ;;  %v1036_v54 = vmax.f32 %v1034_v52, %v1035_v53  ;;  %v356_v52 = vld [vmem:[%s4110_s3 + $0x70] sm:$0xff] }
 0x2b0   :  { %v1037_v55 = vrot.slane %v1036_v54, 4 }
 0x2b2   :  { %v1038_v56 = vmax.f32 %v1036_v54, %v1037_v55 }
 0x2b4   :  { %v1039_v37 = vrot.slane %v1038_v56, 2 }
 0x2b6   :  { %v1040_v58 = vmax.f32 %v1038_v56, %v1039_v37  ;;  %v1028_v41 = vpop.f32.mrf.mxu0  ;;  %v355_v56 = vld [vmem:[%s4110_s3 + $0x68] sm:$0xff] }
 0x2b7   :  { %v1043_v3 = vsel %vm156_vm0, %v1028_v41, -inf }
 0x2b8   :  { %v1041_v59 = vrot.slane %v1040_v58, 1 }
 0x2ba   :  { %v1042_v60 = vmax.f32 %v1040_v58, %v1041_v59  ;;  %v354_v59 = vld [vmem:[%s4110_s3 + $0x60] sm:$0xff] }
 0x2bc   :  { %v1052_v63 = vsub.f32 %v1005_v49, %v1042_v60  ;;  %v1053_v27 = vsub.f32 %v1008_v51, %v1042_v60  ;;  %v357_v51 = vld [vmem:[%s4110_s3 + $0x78] sm:$0xff] }
 0x2bd   :  { %1179 = vmatpush.msrb.mxu3 %v357_v51  ;;  %v353_v60 = vld [vmem:[%s4110_s3 + $0x58] sm:$0xff] }
 0x2be   :  { %v1056_v0 = vmul.f32 1.442695, %v1052_v63  ;;  %v1058_v1 = vmul.f32 1.442695, %v1053_v27  ;;  %v1031_v57 = vpop.f32.mrf.mxu0  ;;  %v352_v63 = vld [vmem:[%s4110_s3 + $0x50] sm:$0xff]  ;;  %v351_v27 = vld [vmem:[%s4110_s3 + $0x48] sm:$0xff] }
 0x2bf   :  { %v1044_v4 = vsel %vm156_vm0, %v1031_v57, -inf  ;;  %1180 = vmatpush.msrb.mxu3 %v356_v52 }
 0x2c0   :  { %3070 = vpow2.f32 %v1056_v0  ;;  %v1045_v5 = vmax.f32 %v1043_v3, %v1044_v4  ;;  %v350_v3 = vld [vmem:[%s4110_s3 + $0x40] sm:$0xff] }
 0x2c1   :  { %3072 = vpow2.f32 %v1058_v1  ;;  %1181 = vmatpush.msrb.mxu3 %v355_v56 }
 0x2c2   :  { %v1046_v6 = vrot.slane %v1045_v5, 4 }
 0x2c3   :  { %1182 = vmatpush.msrb.mxu3 %v354_v59 }
 0x2c4   :  { %v1047_v7 = vmax.f32 %v1045_v5, %v1046_v6  ;;  %v349_v5 = vld [vmem:[%s4110_s3 + $0x38] sm:$0xff] }
 0x2c5   :  { %1183 = vmatpush.msrb.mxu3 %v353_v60 }
 0x2c6   :  { %v3071_v32 = vpop.eup %3070  ;;  %v1048_v8 = vrot.slane %v1047_v7, 2 }
 0x2c7   :  { %v3073_v10 = vpop.eup %3072  ;;  %v1064_v11 = vsel %vm156_vm0, %v3071_v32, 0.0  ;;  %1184 = vmatpush.msrb.mxu3 %v352_v63 }
 0x2c8   :  { %v1065_v12 = vsel %vm156_vm0, %v3073_v10, 0.0  ;;  %v1049_v14 = vmax.f32 %v1047_v7, %v1048_v8  ;;  %v348_v8 = vld [vmem:[%s4110_s3 + $0x30] sm:$0xff] }
 0x2c9   :  { %v1066_v16 = vadd.f32 %v1065_v12, %v1064_v11  ;;  %1185 = vmatpush.msrb.mxu3 %v351_v27  ;;  %v347_v11 = vld [vmem:[%s4110_s3 + $0x28] sm:$0xff]  ;;  %v1449_v27 = vld [vmem:[#allocation9 + $0x440] sm:$0xff] }
 0x2ca   :  { %v1050_v19 = vrot.slane %v1049_v14, 1  ;;  %1503 = vmatpush.msrb.mxu1 %v1449_v27  ;;  %v1343_v27 = vld [vmem:[#allocation9 + $0xf0] sm:$0xff] }
 0x2cb   :  { %v1067_v20 = vrot.slane %v1066_v16, 4  ;;  %1186 = vmatpush.msrb.mxu3 %v350_v3  ;;  %v1439_v3 = vld [vmem:[#allocation9 + $0x3f0] sm:$0xff] }
 0x2cc   :  { %v1051_v21 = vmax.f32 %v1049_v14, %v1050_v19 }
 0x2cd   :  { %v1068_v22 = vadd.f32 %v1067_v20, %v1066_v16  ;;  %1187 = vmatpush.msrb.mxu3 %v349_v5  ;;  %v346_v16 = vld [vmem:[%s4110_s3 + $0x20] sm:$0xff] }
 0x2ce   :  { %v1054_v23 = vsub.f32 %v1028_v41, %v1051_v21  ;;  %v1055_v24 = vsub.f32 %v1031_v57, %v1051_v21  ;;  %v345_v21 = vld [vmem:[%s4110_s3 + $0x18] sm:$0xff] }
 0x2cf   :  { %v1069_v25 = vrot.slane %v1068_v22, 2  ;;  %1188 = vmatpush.msrb.mxu3 %v348_v8 }
 0x2d0   :  { %v1060_v26 = vmul.f32 1.442695, %v1054_v23  ;;  %v1062_v61 = vmul.f32 1.442695, %v1055_v24  ;;  %v343_v24 = vld [vmem:[%s4110_s3 + $0x8] sm:$0xff] }
 0x2d1   :  { %v1070_v28 = vadd.f32 %v1069_v25, %v1068_v22  ;;  %1189 = vmatpush.msrb.mxu3 %v347_v11  ;;  %v344_v22 = vld [vmem:[%s4110_s3 + $0x10] sm:$0xff]  ;;  %v342_v25 = vld [vmem:[%s4110_s3] sm:$0xff] }
 0x2d2   :  { %3074 = vpow2.f32 %v1060_v26  ;;  %v953_v26 = vpop.f32.mrf.mxu1 }
 0x2d3   :  { %v1071_v30 = vrot.slane %v1070_v28, 1  ;;  %3076 = vpow2.f32 %v1062_v61  ;;  %1190 = vmatpush.msrb.mxu3 %v346_v16 }
 0x2d5   :  { %v1072_v31 = vadd.f32 %v1071_v30, %v1070_v28  ;;  %1191 = vmatpush.msrb.mxu3 %v345_v21  ;;  %v954_v28 = vadd.f32 %v953_v26, %v3568_v29  ;;  %v3042_v29 = vld [vmem:[#allocation8] ss:$0 sm:$0xff]  ;;  %v1421_v26 = vld [vmem:[#allocation9 + $0x360] sm:$0xff] }
 0x2d7   :  { %3078 = vrcp.f32 %v1072_v31  ;;  %v1093_v45 = vand.u32 2147483648, %v1072_v31  ;;  %v1091_v47 = vand.u32 2147483647, %v1072_v31  ;;  %vm1087_vm3 = vweird.f32 %v1072_v31  ;;  %1192 = vmatpush.msrb.mxu3 %v344_v22  ;;  %v1430_v22 = vld [vmem:[#allocation9 + $0x3a8] sm:$0xff] }
 0x2d8   :  { %v3582_v34 = vpop.eup %3074 }
 0x2d9   :  { %v3584_v35 = vpop.eup %3076  ;;  %v1073_v36 = vsel %vm156_vm0, %v3582_v34, 0.0  ;;  %v1094_v54 = vor.u32 1.1754944e-38, %v1093_v45  ;;  %vm1092_vm5 = vcmp.eq.f32.partialorder %v1091_v47, 8.507059e+37  ;;  %1193 = vmatpush.msrb.mxu3 %v343_v24  ;;  %v1432_v24 = vld [vmem:[#allocation9 + $0x3b8] sm:$0xff] }
 0x2da   :  { %v1074_v38 = vsel %vm156_vm0, %v3584_v35, 0.0  ;;  %v956_v61 = vpop.f32.mrf.mxu1 }
 0x2db   :  { %v1075_v39 = vadd.f32 %v1074_v38, %v1073_v36  ;;  %1194 = vmatpush.msrb.mxu3 %v342_v25  ;;  %v1433_v25 = vld [vmem:[#allocation9 + $0x3c0] sm:$0xff] }
 0x2dd   :  { %v3079_v40 = vpop.eup %3078  ;;  %v1076_v42 = vrot.slane %v1075_v39, 4 }
 0x2de   :  { %v1083_v62 = vmul.f32 %v3079_v40, %v1072_v31  ;;  %vm1088_vm2 = vweird.f32 %v3079_v40 }
 0x2df   :  { %v1077_v15 = vadd.f32 %v1076_v42, %v1075_v39  ;;  %vm1089_vm4 = vmor %vm1087_vm3, %vm1088_vm2 }
 0x2e0   :  { %v1084_v43 = vsub.f32 1.0, %v1083_v62 }
 0x2e1   :  { %v1078_v44 = vrot.slane %v1077_v15, 2 }
 0x2e2   :  { %v1085_v46 = vmul.f32 %v3079_v40, %v1084_v43 }
 0x2e3   :  { %v1079_v18 = vadd.f32 %v1078_v44, %v1077_v15 }
 0x2e4   :  { %v1086_v49 = vadd.f32 %v3079_v40, %v1085_v46 }
 0x2e5   :  { %v1080_v53 = vrot.slane %v1079_v18, 1 }
 0x2e6   :  { %v1090_v55 = vsel %vm1089_vm4, %v3079_v40, %v1086_v49 }
 0x2e7   :  { %v1081_v37 = vadd.f32 %v1080_v53, %v1079_v18  ;;  %v1095_v58 = vsel %vm1092_vm5, %v1094_v54, %v1090_v55  ;;  %v3355_v55 = vmov 128.0  }
 0x2e8   :  { %v1096_v41 = vmul.f32 %v3071_v32, %v1095_v58  ;;  %v1097_v1 = vmul.f32 %v3073_v10, %v1095_v58 }
 0x2e9   :  { %3080 = vrcp.f32 %v1081_v37  ;;  %v1109_v6 = vand.u32 2147483648, %v1081_v37  ;;  %v1107_v32 = vand.u32 2147483647, %v1081_v37  ;;  %vm1103_vm7 = vweird.f32 %v1081_v37 }
 0x2ea   :  { %2983 = vmatmul.msk.f32.vlgmr.msra.gmra.mxu1 %vm156_vm0, %v1096_v41  ;;  %3082 = vrcp.f32 %v3355_v55  ;;  %v1359_v55 = vld [vmem:[#allocation9 + $0x170] sm:$0xff] }
 0x2eb   :  { %v1110_v12 = vor.u32 1.1754944e-38, %v1109_v6  ;;  %vm1108_vm9 = vcmp.eq.f32.partialorder %v1107_v32, 8.507059e+37  ;;  %v1441_v6 = vld [vmem:[#allocation9 + $0x400] sm:$0xff] }
 0x2ef   :  { %v3081_v0 = vpop.eup %3080 }
 0x2f0   :  { %v1099_v57 = vmul.f32 %v3081_v0, %v1081_v37  ;;  %vm1104_vm6 = vweird.f32 %v3081_v0  ;;  %v3083_v56 = vpop.eup %3082 }
 0x2f1   :  { %vm1105_vm8 = vmor %vm1103_vm7, %vm1104_vm6  ;;  %vm1225_vm10 = vweird.f32 %v3083_v56 }
 0x2f2   :  { %2984 = vmatmul.msk.f32.gmra.mxu1 %vm156_vm0, %v1097_v1  ;;  %v1100_v4 = vsub.f32 1.0, %v1099_v57  ;;  %v1451_v57 = vld [vmem:[#allocation9 + $0x450] sm:$0xff] }
 0x2f3   :  { %1561 = vmatpush.msra.mxu3 %v1451_v57  ;;  %v1333_v57 = vld [vmem:[#allocation9 + $0xa0] sm:$0xff] }
 0x2f4   :  { %v1101_v7 = vmul.f32 %v3081_v0, %v1100_v4  ;;  %v1440_v4 = vld [vmem:[#allocation9 + $0x3f8] sm:$0xff] }
 0x2f5   :  { %1504 = vmatpush.msrb.mxu1 %v1440_v4  ;;  %v1322_v4 = vld [vmem:[#allocation9 + $0x48] sm:$0xff] }
 0x2f6   :  { %v1102_v10 = vadd.f32 %v3081_v0, %v1101_v7  ;;  %v1442_v7 = vld [vmem:[#allocation9 + $0x408] sm:$0xff] }
 0x2f7   :  { %1562 = vmatpush.msra.mxu3 %v1442_v7  ;;  %v1325_v7 = vld [vmem:[#allocation9 + $0x60] sm:$0xff] }
 0x2f8   :  { %v1106_v14 = vsel %vm1105_vm8, %v3081_v0, %v1102_v10  ;;  %v1450_v0 = vld [vmem:[#allocation9 + $0x448] sm:$0xff] }
 0x2f9   :  { %v1111_v19 = vsel %vm1108_vm9, %v1110_v12, %v1106_v14  ;;  %1532 = vmatpush.msra.mxu2 %v1450_v0  ;;  %1563 = vmatpush.msra.mxu3 %v1433_v25  ;;  %v1331_v0 = vld [vmem:[#allocation9 + $0x90] sm:$0xff] }
 0x2fa   :  { %v1112_v20 = vmul.f32 %v3582_v34, %v1111_v19  ;;  %v1113_v23 = vmul.f32 %v3584_v35, %v1111_v19  ;;  %v982_v34 = vpop.f32.mrf.mxu2  ;;  %v957_v35 = vadd.f32 %v956_v61, %v3570_v48  ;;  %v1422_v61 = vld [vmem:[#allocation9 + $0x368] sm:$0xff]  ;;  %v1455_v25 = vld [vmem:[#allocation9 + $0x470] sm:$0xff] }
 0x2fb   :  { %v983_v40 = vadd.f32 %v982_v34, %v3572_v50  ;;  %1533 = vmatpush.msra.mxu2 %v1441_v6  ;;  %v1413_v34 = vld [vmem:[#allocation9 + $0x320] sm:$0xff]  ;;  %v1324_v6 = vld [vmem:[#allocation9 + $0x58] sm:$0xff] }
 0x2fc   :  { %2985 = vmatmul.msk.f32.vlgmr.msrb.gmra.mxu2 %vm156_vm0, %v1112_v20 }
 0x2fd   :  { %1534 = vmatpush.msra.mxu2 %v1432_v24  ;;  %v1454_v24 = vld [vmem:[#allocation9 + $0x468] sm:$0xff] }
 0x302   :  { %v985_v39 = vpop.f32.mrf.mxu2 }
 0x303   :  { %v986_v15 = vadd.f32 %v985_v39, %v3576_v33  ;;  %v1404_v39 = vld [vmem:[#allocation9 + $0x2d8] sm:$0xff] }
 0x304   :  { %2986 = vmatmul.msk.f32.gmra.mxu2 %vm156_vm0, %v1113_v23  ;;  %v1431_v23 = vld [vmem:[#allocation9 + $0x3b0] sm:$0xff] }
 0x305   :  { %1505 = vmatpush.msrb.mxu1 %v1431_v23  ;;  %v1453_v23 = vld [vmem:[#allocation9 + $0x460] sm:$0xff] }
 0x307   :  { %1506 = vmatpush.msrb.mxu1 %v1422_v61  ;;  %v1444_v61 = vld [vmem:[#allocation9 + $0x418] sm:$0xff] }
 0x309   :  { %1507 = vmatpush.msrb.mxu1 %v1413_v34 }
 0x30b   :  { %1508 = vmatpush.msrb.mxu1 %v1404_v39  ;;  %v1437_v39 = vld [vmem:[#allocation9 + $0x3e0] sm:$0xff] }
 0x367   :  { %v1137_v30 = vpop.f32.mrf.mxu1 }
 0x368   :  { %v1172_v31 = vadd.f32 %v1137_v30, %v954_v28  ;;  %v1423_v28 = vld [vmem:[#allocation9 + $0x370] sm:$0xff]  ;;  %v1424_v30 = vld [vmem:[#allocation9 + $0x378] sm:$0xff] }
 0x369   :  { %1535 = vmatpush.msra.mxu2 %v1423_v28  ;;  %1564 = vmatpush.msra.mxu3 %v1424_v30  ;;  %v1445_v28 = vld [vmem:[#allocation9 + $0x420] sm:$0xff] }
 0x36a   :  { %1195 = vmatmul.f32.vlgmr.msrb.gmra.mxu3 %v1172_v31  ;;  %v1412_v31 = vld [vmem:[#allocation9 + $0x318] sm:$0xff] }
 0x36f   :  { %v1140_v36 = vpop.f32.mrf.mxu1 }
 0x370   :  { %v1173_v38 = vadd.f32 %v1140_v36, %v957_v35  ;;  %v1414_v35 = vld [vmem:[#allocation9 + $0x328] sm:$0xff]  ;;  %v1415_v36 = vld [vmem:[#allocation9 + $0x330] sm:$0xff] }
 0x371   :  { %1536 = vmatpush.msra.mxu2 %v1414_v35  ;;  %1565 = vmatpush.msra.mxu3 %v1415_v36  ;;  %v1434_v35 = vld [vmem:[#allocation9 + $0x3c8] sm:$0xff]  ;;  %v1435_v36 = vld [vmem:[#allocation9 + $0x3d0] sm:$0xff] }
 0x372   :  { %1198 = vmatmul.f32.gmra.mxu3 %v1173_v38  ;;  %v1403_v38 = vld [vmem:[#allocation9 + $0x2d0] sm:$0xff] }
 0x37f   :  { %v1166_v42 = vpop.f32.mrf.mxu2 }
 0x380   :  { %v1174_v62 = vadd.f32 %v1166_v42, %v983_v40  ;;  %v1405_v40 = vld [vmem:[#allocation9 + $0x2e0] sm:$0xff]  ;;  %v1406_v42 = vld [vmem:[#allocation9 + $0x2e8] sm:$0xff] }
 0x381   :  { %1537 = vmatpush.msra.mxu2 %v1405_v40  ;;  %1566 = vmatpush.msra.mxu3 %v1406_v42 }
 0x382   :  { %1201 = vmatmul.f32.gmra.mxu3 %v1174_v62  ;;  %v1394_v62 = vld [vmem:[#allocation9 + $0x288] sm:$0xff] }
 0x387   :  { %v1169_v43 = vpop.f32.mrf.mxu2 }
 0x388   :  { %v1175_v44 = vadd.f32 %v1169_v43, %v986_v15  ;;  %v1395_v15 = vld [vmem:[#allocation9 + $0x290] sm:$0xff]  ;;  %v1396_v43 = vld [vmem:[#allocation9 + $0x298] sm:$0xff] }
 0x389   :  { %1509 = vmatpush.msrb.mxu1 %v1395_v15  ;;  %1538 = vmatpush.msra.mxu2 %v1396_v43  ;;  %v1426_v15 = vld [vmem:[#allocation9 + $0x388] sm:$0xff]  ;;  %v1427_v43 = vld [vmem:[#allocation9 + $0x390] sm:$0xff] }
 0x38a   :  { %1204 = vmatmul.f32.gmra.mxu3 %v1175_v44  ;;  %v1397_v44 = vld [vmem:[#allocation9 + $0x2a0] sm:$0xff] }
 0x38b   :  { %1567 = vmatpush.msra.mxu3 %v1397_v44 }
 0x3ed   :  { %v1196_v45 = vpop.f32.mrf.mxu3 }
 0x3ee   :  { %v1197_v46 = vadd.f32 %v3042_v29, %v1196_v45  ;;  %v1386_v45 = vld [vmem:[#allocation9 + $0x248] sm:$0xff] }
 0x3ef   :  { %1510 = vmatpush.msrb.mxu1 %v1386_v45  ;;  %v1416_v45 = vld [vmem:[#allocation9 + $0x338] sm:$0xff] }
 0x3f0   :  { %v1208_v47 = vadd.f32 %v1197_v46, %v3464_v2  ;;  %v1221_v2 = vmul.f32 128.0, %v3083_v56  ;;  %v1387_v46 = vld [vmem:[#allocation9 + $0x250] sm:$0xff] }
 0x3f1   :  { %1539 = vmatpush.msra.mxu2 %v1387_v46  ;;  %v1417_v46 = vld [vmem:[#allocation9 + $0x340] sm:$0xff] }
 0x3f2   :  { %1212 = vadd.xlane.f32.xlu0 %v1208_v47  ;;  %v1222_v37 = vsub.f32 1.0, %v1221_v2  ;;  %v1361_v2 = vld [vmem:[#allocation9 + $0x180] sm:$0xff] }
 0x3f4   :  { %v1223_v58 = vmul.f32 %v3083_v56, %v1222_v37  ;;  %v1349_v37 = vld [vmem:[#allocation9 + $0x120] sm:$0xff] }
 0x3f5   :  { %v1199_v48 = vpop.f32.mrf.mxu3 }
 0x3f6   :  { %v1200_v18 = vadd.f32 %v3042_v29, %v1199_v48  ;;  %v1224_v41 = vadd.f32 %v3083_v56, %v1223_v58  ;;  %v1376_v48 = vld [vmem:[#allocation9 + $0x1f8] sm:$0xff]  ;;  %v1350_v58 = vld [vmem:[#allocation9 + $0x128] sm:$0xff] }
 0x3f8   :  { %v1209_v49 = vadd.f32 %v1200_v18, %v3470_v9  ;;  %v3652_v9 = vsel %vm1225_vm10, %v3083_v56, %v1224_v41  ;;  %v1377_v18 = vld [vmem:[#allocation9 + $0x200] sm:$0xff]  ;;  %v1360_v56 = vld [vmem:[#allocation9 + $0x178] sm:$0xff]  ;;  %v1351_v41 = vld [vmem:[#allocation9 + $0x130] sm:$0xff] }
 0x3f9   :  { %1511 = vmatpush.msrb.mxu1 %v1377_v18  ;;  %v1419_v18 = vld [vmem:[#allocation9 + $0x350] sm:$0xff] }
 0x3fa   :  { %1214 = vadd.xlane.f32.xlu0 %v1209_v49 }
 0x405   :  { %v1202_v50 = vpop.f32.mrf.mxu3 }
 0x406   :  { %v1203_v51 = vadd.f32 %v3042_v29, %v1202_v50  ;;  %v1379_v50 = vld [vmem:[#allocation9 + $0x210] sm:$0xff] }
 0x408   :  { %v1210_v52 = vadd.f32 %v1203_v51, %v3476_v13  ;;  %v1367_v51 = vld [vmem:[#allocation9 + $0x1b0] sm:$0xff] }
 0x40a   :  { %1216 = vadd.xlane.f32.xlu1 %v1210_v52 }
 0x40d   :  { %v1205_v33 = vpop.f32.mrf.mxu3 }
 0x40e   :  { %v1206_v53 = vadd.f32 %v3042_v29, %v1205_v33  ;;  %v1385_v29 = vld [vmem:[#allocation9 + $0x240] sm:$0xff] }
 0x40f   :  { %v1369_v33 = vld [vmem:[#allocation9 + $0x1c0] sm:$0xff] }
 0x410   :  { %v1211_v54 = vadd.f32 %v1206_v53, %v3482_v17  ;;  %v1448_v17 = vld [vmem:[#allocation9 + $0x438] sm:$0xff]  ;;  %v1370_v53 = vld [vmem:[#allocation9 + $0x1c8] sm:$0xff] }
 0x411   :  { %1474 = vmatpush.msra.mxu0 %v1448_v17  ;;  %v1342_v17 = vld [vmem:[#allocation9 + $0xe8] sm:$0xff] }
 0x412   :  { %1218 = vadd.xlane.f32.xlu1 %v1211_v54 }
 0x413   :  { %1475 = vmatpush.msra.mxu0 %v1439_v3  ;;  %v1334_v3 = vld [vmem:[#allocation9 + $0xa8] sm:$0xff] }
 0x415   :  { %1476 = vmatpush.msra.mxu0 %v1430_v22  ;;  %v1452_v22 = vld [vmem:[#allocation9 + $0x458] sm:$0xff] }
 0x417   :  { %1477 = vmatpush.msra.mxu0 %v1421_v26  ;;  %v1443_v26 = vld [vmem:[#allocation9 + $0x410] sm:$0xff] }
 0x419   :  { %1478 = vmatpush.msra.mxu0 %v1412_v31  ;;  %v1446_v31 = vld [vmem:[#allocation9 + $0x428] sm:$0xff] }
 0x41b   :  { %1479 = vmatpush.msra.mxu0 %v1403_v38  ;;  %v1436_v38 = vld [vmem:[#allocation9 + $0x3d8] sm:$0xff] }
 0x41d   :  { %1480 = vmatpush.msra.mxu0 %v1394_v62  ;;  %v1425_v62 = vld [vmem:[#allocation9 + $0x380] sm:$0xff] }
 0x41f   :  { %1481 = vmatpush.msra.mxu0 %v1385_v29  ;;  %v1428_v29 = vld [vmem:[#allocation9 + $0x398] sm:$0xff] }
 0x421   :  { %1482 = vmatpush.msra.mxu0 %v1376_v48  ;;  %v1418_v48 = vld [vmem:[#allocation9 + $0x348] sm:$0xff] }
 0x423   :  { %1483 = vmatpush.msra.mxu0 %v1367_v51  ;;  %v1409_v51 = vld [vmem:[#allocation9 + $0x300] sm:$0xff] }
 0x465   :  { %v1213_v59 = vpop.xlane.xlu0 %1212 }
 0x466   :  { %v1227_v60 = vmul.f32 %v3652_v9, %v1213_v59  ;;  %v1352_v59 = vld [vmem:[#allocation9 + $0x138] sm:$0xff] }
 0x468   :  { %v3655_v13 = vsub.f32 %v1208_v47, %v1227_v60  ;;  %v1388_v47 = vld [vmem:[#allocation9 + $0x258] sm:$0xff] }
 0x469   :  { %1568 = vmatpush.msra.mxu3 %v1388_v47  ;;  %v1340_v60 = vld [vmem:[#allocation9 + $0xd8] sm:$0xff] }
 0x46a   :  { %v1235_v63 = vmul.f32 %v3655_v13, %v3655_v13 }
 0x46b   :  { %1569 = vmatpush.msra.mxu3 %v1379_v50  ;;  %v1408_v50 = vld [vmem:[#allocation9 + $0x2f8] sm:$0xff] }
 0x46c   :  { %1239 = vadd.xlane.f32.xlu2 %v1235_v63  ;;  %v1341_v63 = vld [vmem:[#allocation9 + $0xe0] sm:$0xff] }
 0x46d   :  { %v1215_v1 = vpop.xlane.xlu0 %1214  ;;  %1570 = vmatpush.msra.mxu3 %v1370_v53  ;;  %v1398_v53 = vld [vmem:[#allocation9 + $0x2a8] sm:$0xff] }
 0x46e   :  { %v1228_v5 = vmul.f32 %v3652_v9, %v1215_v1  ;;  %v1332_v1 = vld [vmem:[#allocation9 + $0x98] sm:$0xff] }
 0x46f   :  { %1571 = vmatpush.msra.mxu3 %v1361_v2  ;;  %v1401_v2 = vld [vmem:[#allocation9 + $0x2c0] sm:$0xff] }
 0x470   :  { %v3660_v32 = vsub.f32 %v1209_v49, %v1228_v5  ;;  %v1378_v49 = vld [vmem:[#allocation9 + $0x208] sm:$0xff]  ;;  %v1323_v5 = vld [vmem:[#allocation9 + $0x50] sm:$0xff] }
 0x471   :  { %1540 = vmatpush.msra.mxu2 %v1378_v49  ;;  %1572 = vmatpush.msra.mxu3 %v1352_v59  ;;  %v1407_v49 = vld [vmem:[#allocation9 + $0x2f0] sm:$0xff] }
 0x472   :  { %v1236_v8 = vmul.f32 %v3660_v32, %v3660_v32  ;;  %v1391_v59 = vld [vmem:[#allocation9 + $0x270] sm:$0xff] }
 0x473   :  { %1541 = vmatpush.msra.mxu2 %v1369_v33  ;;  %1573 = vmatpush.msra.mxu3 %v1343_v27  ;;  %v1410_v33 = vld [vmem:[#allocation9 + $0x308] sm:$0xff] }
 0x474   :  { %1241 = vadd.xlane.f32.xlu2 %v1236_v8  ;;  %v1313_v8 = vld [vmem:[#allocation9] sm:$0xff]  ;;  %v3692_v27 = vld [vmem:[%s4115_s8] ss:$0 sm:$0xff] }
 0x475   :  { %1542 = vmatpush.msra.mxu2 %v1360_v56  ;;  %1574 = vmatpush.msra.mxu3 %v1334_v3  ;;  %v1381_v3 = vld [vmem:[#allocation9 + $0x220] sm:$0xff] }
 0x477   :  { %1543 = vmatpush.msra.mxu2 %v1351_v41  ;;  %1575 = vmatpush.msra.mxu3 %v1325_v7  ;;  %v1390_v41 = vld [vmem:[#allocation9 + $0x268] sm:$0xff]  ;;  %v1383_v7 = vld [vmem:[#allocation9 + $0x230] sm:$0xff] }
 0x479   :  { %1544 = vmatpush.msra.mxu2 %v1342_v17  ;;  %v1392_v17 = vld [vmem:[#allocation9 + $0x278] sm:$0xff] }
 0x47b   :  { %1545 = vmatpush.msra.mxu2 %v1333_v57  ;;  %v1380_v57 = vld [vmem:[#allocation9 + $0x218] sm:$0xff] }
 0x47d   :  { %v1217_v10 = vpop.xlane.xlu1 %1216  ;;  %1546 = vmatpush.msra.mxu2 %v1324_v6  ;;  %v3696_v6 = vld [vmem:[#allocation12] ss:$0 sm:$0xff] }
 0x47e   :  { %v1229_v11 = vmul.f32 %v3652_v9, %v1217_v10  ;;  %v1314_v10 = vld [vmem:[#allocation9 + $0x8] sm:$0xff] }
 0x480   :  { %v3665_v12 = vsub.f32 %v1210_v52, %v1229_v11  ;;  %v1368_v52 = vld [vmem:[#allocation9 + $0x1b8] sm:$0xff]  ;;  %v1315_v11 = vld [vmem:[#allocation9 + $0x10] sm:$0xff] }
 0x481   :  { %1512 = vmatpush.msrb.mxu1 %v1368_v52  ;;  %1547 = vmatpush.msra.mxu2 %v1315_v11  ;;  %v1371_v11 = vld [vmem:[#allocation9 + $0x1d0] sm:$0xff] }
 0x482   :  { %v1237_v14 = vmul.f32 %v3665_v12, %v3665_v12 }
 0x483   :  { %1513 = vmatpush.msrb.mxu1 %v1359_v55  ;;  %1648 = vmatpush.msrb.mxu2 %v1454_v24  ;;  %v1400_v55 = vld [vmem:[#allocation9 + $0x2b8] sm:$0xff]  ;;  %v1363_v24 = vld [vmem:[#allocation9 + $0x190] sm:$0xff] }
 0x484   :  { %1243 = vadd.xlane.f32.xlu0 %v1237_v14  ;;  %v1316_v14 = vld [vmem:[#allocation9 + $0x18] sm:$0xff] }
 0x485   :  { %v1219_v16 = vpop.xlane.xlu1 %1218  ;;  %1514 = vmatpush.msrb.mxu1 %v1350_v58  ;;  %1576 = vmatpush.msra.mxu3 %v1316_v14  ;;  %v1389_v58 = vld [vmem:[#allocation9 + $0x260] sm:$0xff]  ;;  %v1372_v14 = vld [vmem:[#allocation9 + $0x1d8] sm:$0xff] }
 0x486   :  { %v1230_v19 = vmul.f32 %v3652_v9, %v1219_v16  ;;  %1649 = vmatpush.msrb.mxu2 %v1445_v28  ;;  %v1365_v28 = vld [vmem:[#allocation9 + $0x1a0] sm:$0xff] }
 0x487   :  { %1515 = vmatpush.msrb.mxu1 %v1341_v63  ;;  %1677 = vmatpush.msrb.mxu3 %v1455_v25  ;;  %v1364_v25 = vld [vmem:[#allocation9 + $0x198] sm:$0xff] }
 0x488   :  { %v3670_v20 = vsub.f32 %v1211_v54, %v1230_v19  ;;  %v1358_v54 = vld [vmem:[#allocation9 + $0x168] sm:$0xff]  ;;  %1650 = vmatpush.msrb.mxu2 %v1436_v38 }
 0x489   :  { %1484 = vmatpush.msra.mxu0 %v1358_v54  ;;  %1516 = vmatpush.msrb.mxu1 %v1332_v1  ;;  %v1399_v54 = vld [vmem:[#allocation9 + $0x2b0] sm:$0xff] }
 0x48a   :  { %v1238_v21 = vmul.f32 %v3670_v20, %v3670_v20  ;;  %1678 = vmatpush.msrb.mxu3 %v1446_v31  ;;  %1651 = vmatpush.msrb.mxu2 %v1427_v43  ;;  %v1353_v31 = vld [vmem:[#allocation9 + $0x140] sm:$0xff] }
 0x48b   :  { %1485 = vmatpush.msra.mxu0 %v1349_v37  ;;  %1517 = vmatpush.msrb.mxu1 %v1323_v5 }
 0x48c   :  { %1245 = vadd.xlane.f32.xlu1 %v1238_v21  ;;  %1679 = vmatpush.msrb.mxu3 %v1437_v39  ;;  %v1344_v39 = vld [vmem:[#allocation9 + $0xf8] sm:$0xff] }
 0x48d   :  { %1486 = vmatpush.msra.mxu0 %v1340_v60  ;;  %1518 = vmatpush.msrb.mxu1 %v1314_v10 }
 0x48e   :  { %1680 = vmatpush.msrb.mxu3 %v1428_v29  ;;  %1652 = vmatpush.msrb.mxu2 %v1418_v48  ;;  %v1336_v29 = vld [vmem:[#allocation9 + $0xb8] sm:$0xff]  ;;  %v1338_v48 = vld [vmem:[#allocation9 + $0xc8] sm:$0xff] }
 0x48f   :  { %1487 = vmatpush.msra.mxu0 %v1331_v0  ;;  %1619 = vmatpush.msra.mxu1 %v1453_v23  ;;  %v1362_v23 = vld [vmem:[#allocation9 + $0x188] sm:$0xff] }
 0x490   :  { %1681 = vmatpush.msrb.mxu3 %v1419_v18  ;;  %1653 = vmatpush.msrb.mxu2 %v1409_v51  ;;  %v1326_v51 = vld [vmem:[#allocation9 + $0x68] sm:$0xff] }
 0x491   :  { %1488 = vmatpush.msra.mxu0 %v1322_v4  ;;  %1620 = vmatpush.msra.mxu1 %v1444_v61  ;;  %v1382_v4 = vld [vmem:[#allocation9 + $0x228] sm:$0xff] }
 0x492   :  { %1682 = vmatpush.msrb.mxu3 %v1410_v33  ;;  %1654 = vmatpush.msrb.mxu2 %v1400_v55  ;;  %v1328_v33 = vld [vmem:[#allocation9 + $0x78] sm:$0xff]  ;;  %v1317_v55 = vld [vmem:[#allocation9 + $0x20] sm:$0xff] }
 0x493   :  { %1489 = vmatpush.msra.mxu0 %v1313_v8  ;;  %1621 = vmatpush.msra.mxu1 %v1435_v36  ;;  %v1356_v36 = vld [vmem:[#allocation9 + $0x158] sm:$0xff] }
 0x494   :  { %1683 = vmatpush.msrb.mxu3 %v1401_v2  ;;  %1655 = vmatpush.msrb.mxu2 %v1391_v59  ;;  %v1319_v2 = vld [vmem:[#allocation9 + $0x30] sm:$0xff] }
 0x495   :  { %1590 = vmatpush.msrb.mxu0 %v1452_v22  ;;  %1622 = vmatpush.msra.mxu1 %v1426_v15  ;;  %v1374_v22 = vld [vmem:[#allocation9 + $0x1e8] sm:$0xff]  ;;  %v1347_v15 = vld [vmem:[#allocation9 + $0x110] sm:$0xff] }
 0x496   :  { %1684 = vmatpush.msrb.mxu3 %v1392_v17  ;;  %1656 = vmatpush.msrb.mxu2 %v1382_v4  ;;  %v1429_v4 = vld [vmem:[#allocation9 + $0x3a0] sm:$0xff] }
 0x497   :  { %1591 = vmatpush.msrb.mxu0 %v1443_v26  ;;  %1623 = vmatpush.msra.mxu1 %v1417_v46 }
 0x498   :  { %1685 = vmatpush.msrb.mxu3 %v1383_v7 }
 0x499   :  { %1592 = vmatpush.msrb.mxu0 %v1434_v35  ;;  %1624 = vmatpush.msra.mxu1 %v1408_v50  ;;  %v1355_v35 = vld [vmem:[#allocation9 + $0x150] sm:$0xff] }
 0x49a   :  { %1686 = vmatpush.msrb.mxu3 %v1374_v22 }
 0x49b   :  { %1593 = vmatpush.msrb.mxu0 %v1425_v62  ;;  %1625 = vmatpush.msra.mxu1 %v1399_v54  ;;  %v1346_v62 = vld [vmem:[#allocation9 + $0x108] sm:$0xff] }
 0x49c   :  { %1687 = vmatpush.msrb.mxu3 %v1365_v28  ;;  %v1339_v28 = vld [vmem:[#allocation9 + $0xd0] sm:$0xff] }
 0x49d   :  { %1594 = vmatpush.msrb.mxu0 %v1416_v45  ;;  %1626 = vmatpush.msra.mxu1 %v1390_v41  ;;  %v1456_v41 = vld [vmem:[#allocation9 + $0x478] sm:$0xff] }
 0x49e   :  { %1688 = vmatpush.msrb.mxu3 %v1356_v36 }
 0x49f   :  { %1595 = vmatpush.msrb.mxu0 %v1407_v49  ;;  %1627 = vmatpush.msra.mxu1 %v1381_v3 }
 0x4a0   :  { %1689 = vmatpush.msrb.mxu3 %v1347_v15 }
 0x4a1   :  { %1596 = vmatpush.msrb.mxu0 %v1398_v53  ;;  %1628 = vmatpush.msra.mxu1 %v1372_v14  ;;  %v1329_v53 = vld [vmem:[#allocation9 + $0x80] sm:$0xff] }
 0x4a2   :  { %1690 = vmatpush.msrb.mxu3 %v1338_v48 }
 0x4a3   :  { %1597 = vmatpush.msrb.mxu0 %v1389_v58  ;;  %1629 = vmatpush.msra.mxu1 %v1363_v24 }
 0x4a4   :  { %1691 = vmatpush.msrb.mxu3 %v1329_v53 }
 0x4a5   :  { %1598 = vmatpush.msrb.mxu0 %v1380_v57 }
 0x4a7   :  { %1599 = vmatpush.msrb.mxu0 %v1371_v11 }
 0x4a9   :  { %1600 = vmatpush.msrb.mxu0 %v1362_v23 }
 0x4ab   :  { %1601 = vmatpush.msrb.mxu0 %v1353_v31  ;;  %v1321_v31 = vld [vmem:[#allocation9 + $0x40] sm:$0xff] }
 0x4ad   :  { %1602 = vmatpush.msrb.mxu0 %v1344_v39 }
 0x4df   :  { %v1240_v16 = vpop.xlane.xlu2 %1239 }
 0x4e0   :  { %v1247_v19 = vmul.f32 %v1240_v16, %v3652_v9  ;;  %v1373_v16 = vld [vmem:[#allocation9 + $0x1e0] sm:$0xff] }
 0x4e1   :  { %1657 = vmatpush.msrb.mxu2 %v1373_v16 }
 0x4e2   :  { %v3675_v21 = vadd.f32 1e-05, %v1247_v19 }
 0x4e3   :  { %1658 = vmatpush.msrb.mxu2 %v1364_v25  ;;  %v1384_v25 = vld [vmem:[#allocation9 + $0x238] sm:$0xff] }
 0x4e4   :  { %3084 = vrsqrt.f32 %v3675_v21  ;;  %vm1261_vm12 = vweird.f32 %v3675_v21 }
 0x4e5   :  { %1659 = vmatpush.msrb.mxu2 %v1355_v35 }
 0x4e7   :  { %v1242_v30 = vpop.xlane.xlu2 %1241  ;;  %1660 = vmatpush.msrb.mxu2 %v1346_v62 }
 0x4e8   :  { %v1248_v34 = vmul.f32 %v1242_v30, %v3652_v9 }
 0x4ea   :  { %v3085_v40 = vpop.eup %3084  ;;  %v3679_v42 = vadd.f32 1e-05, %v1248_v34  ;;  %v1354_v34 = vld [vmem:[#allocation9 + $0x148] sm:$0xff] }
 0x4eb   :  { %v1256_v44 = vmul.f32 %v3085_v40, %v3675_v21  ;;  %vm1262_vm11 = vweird.f32 %v3085_v40  ;;  %1630 = vmatpush.msra.mxu1 %v1354_v34 }
 0x4ec   :  { %3086 = vrsqrt.f32 %v3679_v42  ;;  %vm1263_vm13 = vmor %vm1261_vm12, %vm1262_vm11  ;;  %vm1271_vm15 = vweird.f32 %v3679_v42 }
 0x4ed   :  { %v1257_v47 = vmul.f32 %v3085_v40, %v1256_v44  ;;  %v1335_v44 = vld [vmem:[#allocation9 + $0xb0] sm:$0xff] }
 0x4ee   :  { %1603 = vmatpush.msrb.mxu0 %v1335_v44 }
 0x4ef   :  { %v1258_v52 = vmul.f32 0.5, %v1257_v47  ;;  %v1337_v47 = vld [vmem:[#allocation9 + $0xc0] sm:$0xff] }
 0x4f0   :  { %1661 = vmatpush.msrb.mxu2 %v1337_v47  ;;  %1604 = vmatpush.msrb.mxu0 %v1326_v51 }
 0x4f1   :  { %v1259_v56 = vsub.f32 1.5, %v1258_v52  ;;  %v1327_v52 = vld [vmem:[#allocation9 + $0x70] sm:$0xff] }
 0x4f2   :  { %v3683_v37 = vpop.eup %3086  ;;  %1662 = vmatpush.msrb.mxu2 %v1328_v33  ;;  %1605 = vmatpush.msrb.mxu0 %v1317_v55 }
 0x4f3   :  { %v1260_v60 = vmul.f32 %v3085_v40, %v1259_v56  ;;  %v1266_v63 = vmul.f32 %v3683_v37, %v3679_v42  ;;  %vm1272_vm14 = vweird.f32 %v3683_v37  ;;  %v1318_v56 = vld [vmem:[#allocation9 + $0x28] sm:$0xff] }
 0x4f4   :  { %vm1273_vm1 = vmor %vm1271_vm15, %vm1272_vm14  ;;  %1663 = vmatpush.msrb.mxu2 %v1319_v2 }
 0x4f5   :  { %v1264_v0 = vsel %vm1263_vm13, %v3085_v40, %v1260_v60  ;;  %v1267_v1 = vmul.f32 %v3683_v37, %v1266_v63  ;;  %v1345_v40 = vld [vmem:[#allocation9 + $0x100] sm:$0xff]  ;;  %v1447_v60 = vld [vmem:[#allocation9 + $0x430] sm:$0xff] }
 0x4f6   :  { %v1295_v5 = vmul.f32 %v1264_v0, %v3655_v13  ;;  %1631 = vmatpush.msra.mxu1 %v1345_v40 }
 0x4f7   :  { %v1268_v8 = vmul.f32 0.5, %v1267_v1  ;;  %v1244_v10 = vpop.xlane.xlu0 %1243  ;;  %v1438_v1 = vld [vmem:[#allocation9 + $0x3e8] sm:$0xff] }
 0x4f8   :  { %v1302_v19 = vmul.f32 %v3692_v27, %v1295_v5  ;;  %v1249_v21 = vmul.f32 %v1244_v10, %v3652_v9  ;;  %1632 = vmatpush.msra.mxu1 %v1336_v29 }
 0x4f9   :  { %v1269_v13 = vsub.f32 1.5, %v1268_v8  ;;  %v1420_v8 = vld [vmem:[#allocation9 + $0x358] sm:$0xff] }
 0x4fa   :  { %v3702_v26 = vadd.f32 %v3696_v6, %v1302_v19  ;;  %v3704_v61 = vadd.f32 1e-05, %v1249_v21  ;;  %1633 = vmatpush.msra.mxu1 %v1327_v52  ;;  %v1411_v19 = vld [vmem:[#allocation9 + $0x310] sm:$0xff]  ;;  %v1402_v21 = vld [vmem:[#allocation9 + $0x2c8] sm:$0xff] }
 0x4fb   :  { %v1270_v30 = vmul.f32 %v3683_v37, %v1269_v13  ;;  %v1393_v13 = vld [vmem:[#allocation9 + $0x280] sm:$0xff] }
 0x4fc   :  { %3088 = vrsqrt.f32 %v3704_v61  ;;  %1490 = vmatmul.f32.vlgmr.msra.gmra.mxu0 %v3702_v26  ;;  %1519 = vmatmul.f32.vlgmr.msrb.gmra.mxu1 %v3702_v26  ;;  %vm1281_vm3 = vweird.f32 %v3704_v61 }
 0x4fd   :  { %v1274_v38 = vsel %vm1273_vm1, %v3683_v37, %v1270_v30  ;;  %1548 = vmatmul.f32.vlgmr.msra.gmra.mxu2 %v3702_v26  ;;  %1577 = vmatmul.f32.vlgmr.msra.gmra.mxu3 %v3702_v26  ;;  %v1320_v37 = vld [vmem:[#allocation9 + $0x38] sm:$0xff]  ;;  %v1330_v30 = vld [vmem:[#allocation9 + $0x88] sm:$0xff] }
 0x4fe   :  { %v1296_v42 = vmul.f32 %v1274_v38, %v3660_v32  ;;  %1634 = vmatpush.msra.mxu1 %v1318_v56  ;;  %1692 = vmatpush.msrb.mxu3 %v1320_v37 }
 0x4ff   :  { %v1246_v43 = vpop.xlane.xlu1 %1245  ;;  %1706 = vmatpush.msra.mxu0 %v1456_v41 }
 0x500   :  { %v1303_v45 = vmul.f32 %v3692_v27, %v1296_v42  ;;  %v1250_v46 = vmul.f32 %v1246_v43, %v3652_v9 }
 0x501   :  { %1707 = vmatpush.msra.mxu0 %v1447_v60 }
 0x502   :  { %v3089_v32 = vpop.eup %3088  ;;  %v3720_v18 = vadd.f32 %v3696_v6, %v1303_v45  ;;  %v1254_v49 = vadd.f32 1e-05, %v1250_v46 }
 0x503   :  { %v1276_v50 = vmul.f32 %v3089_v32, %v3704_v61  ;;  %vm1282_vm2 = vweird.f32 %v3089_v32  ;;  %1708 = vmatpush.msra.mxu0 %v1438_v1  ;;  %v1375_v61 = vld [vmem:[#allocation9 + $0x1f0] sm:$0xff] }
 0x504   :  { %3090 = vrsqrt.f32 %v1254_v49  ;;  %1493 = vmatmul.f32.gmra.mxu0 %v3720_v18  ;;  %1522 = vmatmul.f32.gmra.mxu1 %v3720_v18  ;;  %vm1283_vm4 = vmor %vm1281_vm3, %vm1282_vm2  ;;  %vm1291_vm6 = vweird.f32 %v1254_v49 }
 0x505   :  { %v1277_v54 = vmul.f32 %v3089_v32, %v1276_v50  ;;  %1551 = vmatmul.f32.gmra.mxu2 %v3720_v18  ;;  %1580 = vmatmul.f32.gmra.mxu3 %v3720_v18 }
 0x506   :  { %1709 = vmatpush.msra.mxu0 %v1429_v4 }
 0x507   :  { %v1278_v58 = vmul.f32 0.5, %v1277_v54 }
 0x508   :  { %1710 = vmatpush.msra.mxu0 %v1420_v8 }
 0x509   :  { %v1279_v59 = vsub.f32 1.5, %v1278_v58 }
 0x50a   :  { %v3091_v63 = vpop.eup %3090  ;;  %1711 = vmatpush.msra.mxu0 %v1411_v19 }
 0x50b   :  { %v1280_v17 = vmul.f32 %v3089_v32, %v1279_v59  ;;  %v1286_v0 = vmul.f32 %v3091_v63, %v1254_v49  ;;  %vm1292_vm5 = vweird.f32 %v3091_v63 }
 0x50c   :  { %vm1293_vm7 = vmor %vm1291_vm6, %vm1292_vm5  ;;  %1712 = vmatpush.msra.mxu0 %v1402_v21 }
 0x50d   :  { %v1284_v57 = vsel %vm1283_vm4, %v3089_v32, %v1280_v17  ;;  %v1287_v3 = vmul.f32 %v3091_v63, %v1286_v0 }
 0x50e   :  { %v1297_v5 = vmul.f32 %v1284_v57, %v3665_v12  ;;  %1713 = vmatpush.msra.mxu0 %v1393_v13 }
 0x50f   :  { %v1288_v7 = vmul.f32 0.5, %v1287_v3 }
 0x510   :  { %v1304_v10 = vmul.f32 %v3692_v27, %v1297_v5  ;;  %1714 = vmatpush.msra.mxu0 %v1384_v25 }
 0x511   :  { %v1289_v11 = vsub.f32 1.5, %v1288_v7 }
 0x512   :  { %v3731_v14 = vadd.f32 %v3696_v6, %v1304_v10  ;;  %1715 = vmatpush.msra.mxu0 %v1375_v61 }
 0x513   :  { %v1290_v16 = vmul.f32 %v3091_v63, %v1289_v11 }
 0x514   :  { %1496 = vmatmul.f32.gmra.mxu0 %v3731_v14  ;;  %1525 = vmatmul.f32.gmra.mxu1 %v3731_v14 }
 0x515   :  { %v1294_v12 = vsel %vm1293_vm7, %v3091_v63, %v1290_v16  ;;  %1554 = vmatmul.f32.gmra.mxu2 %v3731_v14  ;;  %1583 = vmatmul.f32.gmra.mxu3 %v3731_v14 }
 0x516   :  { %v1298_v22 = vmul.f32 %v1294_v12, %v3670_v20  ;;  %v1366_v20 = vld [vmem:[#allocation9 + $0x1a8] sm:$0xff] }
 0x517   :  { %1716 = vmatpush.msra.mxu0 %v1366_v20 }
 0x518   :  { %v1305_v23 = vmul.f32 %v3692_v27, %v1298_v22  ;;  %v1357_v27 = vld [vmem:[#allocation9 + $0x160] sm:$0xff] }
 0x519   :  { %1717 = vmatpush.msra.mxu0 %v1357_v27 }
 0x51a   :  { %v3740_v24 = vadd.f32 %v3696_v6, %v1305_v23  ;;  %v1348_v6 = vld [vmem:[#allocation9 + $0x118] sm:$0xff] }
 0x51b   :  { %1718 = vmatpush.msra.mxu0 %v1348_v6 }
 0x51c   :  { %1499 = vmatmul.f32.gmra.mxu0 %v3740_v24  ;;  %1528 = vmatmul.f32.gmra.mxu1 %v3740_v24 }
 0x51d   :  { %1557 = vmatmul.f32.gmra.mxu2 %v3740_v24  ;;  %1586 = vmatmul.f32.gmra.mxu3 %v3740_v24 }
 0x51e   :  { %1719 = vmatpush.msra.mxu0 %v1339_v28 }
 0x520   :  { %1720 = vmatpush.msra.mxu0 %v1330_v30 }
 0x522   :  { %1721 = vmatpush.msra.mxu0 %v1321_v31 }
 0x524   :  { %1606 = vmatmul.f32.vlgmr.msrb.gmra.mxu0 %v3702_v26  ;;  %1635 = vmatmul.f32.vlgmr.msra.gmra.mxu1 %v3702_v26 }
 0x525   :  { %1664 = vmatmul.f32.vlgmr.msrb.gmra.mxu2 %v3702_v26  ;;  %1693 = vmatmul.f32.vlgmr.msrb.gmra.mxu3 %v3702_v26 }
 0x52c   :  { %1609 = vmatmul.f32.gmra.mxu0 %v3720_v18  ;;  %1638 = vmatmul.f32.gmra.mxu1 %v3720_v18 }
 0x52d   :  { %1667 = vmatmul.f32.gmra.mxu2 %v3720_v18  ;;  %1696 = vmatmul.f32.gmra.mxu3 %v3720_v18 }
 0x534   :  { %1612 = vmatmul.f32.gmra.mxu0 %v3731_v14  ;;  %1641 = vmatmul.f32.gmra.mxu1 %v3731_v14 }
 0x535   :  { %1670 = vmatmul.f32.gmra.mxu2 %v3731_v14  ;;  %1699 = vmatmul.f32.gmra.mxu3 %v3731_v14 }
 0x53c   :  { %1615 = vmatmul.f32.gmra.mxu0 %v3740_v24  ;;  %1644 = vmatmul.f32.gmra.mxu1 %v3740_v24 }
 0x53d   :  { %1673 = vmatmul.f32.gmra.mxu2 %v3740_v24  ;;  %1702 = vmatmul.f32.gmra.mxu3 %v3740_v24 }
 0x544   :  { %1722 = vmatmul.f32.vlgmr.msra.gmra.mxu0 %v3702_v26 }
 0x54c   :  { %1725 = vmatmul.f32.gmra.mxu0 %v3720_v18 }
 0x554   :  { %1728 = vmatmul.f32.gmra.mxu0 %v3731_v14 }
 0x55c   :  { %1731 = vmatmul.f32.gmra.mxu0 %v3740_v24 }
 0x579   :  { %v1491_v34 = vpop.f32.mrf.mxu0  ;;  %v1520_v35 = vpop.f32.mrf.mxu1 }
 0x580   :  { %v1578_v36 = vpop.f32.mrf.mxu3  ;;  %v3766_v38 = vpop.f32.mrf.mxu2 }
 0x581   :  { %v1494_v40 = vpop.f32.mrf.mxu0  ;;  %v1523_v42 = vpop.f32.mrf.mxu1 }
 0x588   :  { %v1581_v39 = vpop.f32.mrf.mxu3  ;;  %v3768_v62 = vpop.f32.mrf.mxu2 }
 0x589   :  { %1749 = vmatpush.xpose.msrb.mxu1 %v1581_v39 }
 0x58d   :  { %1750 = vmatpush.xpose.msrb.mxu1 %v1578_v36 }
 0x590   :  { %1751 = vmatmul.f32.vlgmr.msrb.gmra.mxu1 %v1491_v34 }
 0x591   :  { %v1497_v15 = vpop.f32.mrf.mxu0  ;;  %v1526_v43 = vpop.f32.mrf.mxu1 }
 0x598   :  { %v3770_v44 = vpop.f32.mrf.mxu2  ;;  %v1584_v29 = vpop.f32.mrf.mxu3  ;;  %1754 = vmatmul.f32.gmra.mxu1 %v1494_v40 }
 0x599   :  { %v1500_v45 = vpop.f32.mrf.mxu0  ;;  %v1529_v46 = vpop.f32.mrf.mxu1 }
 0x5a0   :  { %v3772_v47 = vpop.f32.mrf.mxu2  ;;  %v1587_v48 = vpop.f32.mrf.mxu3 }
 0x5a1   :  { %1772 = vmatpush.xpose.msra.mxu2 %v1587_v48  ;;  %v1607_v32 = vpop.f32.mrf.mxu0  ;;  %v1636_v49 = vpop.f32.mrf.mxu1 }
 0x5a5   :  { %1773 = vmatpush.xpose.msra.mxu2 %v1584_v29 }
 0x5a8   :  { %v1665_v50 = vpop.f32.mrf.mxu2  ;;  %v1694_v51 = vpop.f32.mrf.mxu3  ;;  %1774 = vmatmul.f32.vlgmr.msra.gmra.mxu2 %v1497_v15 }
 0x5a9   :  { %v1610_v52 = vpop.f32.mrf.mxu0  ;;  %v1639_v33 = vpop.f32.mrf.mxu1 }
 0x5aa   :  { %1875 = vmatpush.xpose.msra.mxu1 %v1610_v52 }
 0x5ae   :  { %1876 = vmatpush.xpose.msra.mxu1 %v1607_v32 }
 0x5b0   :  { %v1668_v53 = vpop.f32.mrf.mxu2  ;;  %v1697_v54 = vpop.f32.mrf.mxu3  ;;  %1777 = vmatmul.f32.gmra.mxu2 %v1500_v45 }
 0x5b1   :  { %2007 = vmatpush.msra.mxu3 %v1697_v54  ;;  %v1613_v55 = vpop.f32.mrf.mxu0  ;;  %1877 = vmatmul.f32.vlgmr.msra.gmra.mxu1 %v1520_v35  ;;  %v1642_v37 = vpop.f32.mrf.mxu1 }
 0x5b2   :  { %2065 = vmatpush.msrb.mxu1 %v1668_v53 }
 0x5b3   :  { %2008 = vmatpush.msra.mxu3 %v1694_v51 }
 0x5b4   :  { %2066 = vmatpush.msrb.mxu1 %v1665_v50 }
 0x5b5   :  { %2117 = vmatpush.xpose.msrb.mxu3 %v1639_v33 }
 0x5b8   :  { %v1671_v56 = vpop.f32.mrf.mxu2  ;;  %v1700_v2 = vpop.f32.mrf.mxu3 }
 0x5b9   :  { %2118 = vmatpush.xpose.msrb.mxu3 %v1636_v49  ;;  %v1616_v58 = vpop.f32.mrf.mxu0  ;;  %1880 = vmatmul.f32.gmra.mxu1 %v1523_v42  ;;  %v1645_v63 = vpop.f32.mrf.mxu1 }
 0x5ba   :  { %1898 = vmatpush.xpose.msrb.mxu2 %v1616_v58 }
 0x5be   :  { %1899 = vmatpush.xpose.msrb.mxu2 %v1613_v55 }
 0x5c0   :  { %v1674_v41 = vpop.f32.mrf.mxu2  ;;  %v1703_v59 = vpop.f32.mrf.mxu3 }
 0x5c1   :  { %2036 = vmatpush.msrb.mxu0 %v1703_v59  ;;  %v1723_v60 = vpop.f32.mrf.mxu0  ;;  %1900 = vmatmul.f32.vlgmr.msrb.gmra.mxu2 %v1526_v43 }
 0x5c2   :  { %2094 = vmatpush.msra.mxu2 %v1674_v41 }
 0x5c3   :  { %2037 = vmatpush.msrb.mxu0 %v1700_v2 }
 0x5c4   :  { %2095 = vmatpush.msra.mxu2 %v1671_v56 }
 0x5c5   :  { %2140 = vmatpush.xpose.msra.mxu0 %v1645_v63 }
 0x5c9   :  { %2141 = vmatpush.xpose.msra.mxu0 %v1642_v37  ;;  %v1726_v17 = vpop.f32.mrf.mxu0  ;;  %1903 = vmatmul.f32.gmra.mxu2 %v1529_v46 }
 0x5ca   :  { %2249 = vmatpush.msra.mxu1 %v1726_v17 }
 0x5cc   :  { %2250 = vmatpush.msra.mxu1 %v1723_v60 }
 0x5d1   :  { %v1729_v0 = vpop.f32.mrf.mxu0 }
 0x5d9   :  { %v1732_v1 = vpop.f32.mrf.mxu0 }
 0x5da   :  { %2278 = vmatpush.msrb.mxu2 %v1732_v1 }
 0x5dc   :  { %2279 = vmatpush.msrb.mxu2 %v1729_v0 }
 0x60d   :  { %v1752_v57 = vpop.f32.mrf.mxu1 }
 0x60e   :  { %v1781_v4 = vsel %vm156_vm0, %v1752_v57, -inf }
 0x615   :  { %v1755_v3 = vpop.f32.mrf.mxu1 }
 0x616   :  { %v1782_v5 = vsel %vm156_vm0, %v1755_v3, -inf }
 0x617   :  { %v1783_v7 = vmax.f32 %v1781_v4, %v1782_v5 }
 0x619   :  { %v1784_v8 = vrot.slane %v1783_v7, 4 }
 0x61b   :  { %v1785_v10 = vmax.f32 %v1783_v7, %v1784_v8 }
 0x61d   :  { %v1786_v11 = vrot.slane %v1785_v10, 2 }
 0x61f   :  { %v1787_v16 = vmax.f32 %v1785_v10, %v1786_v11 }
 0x621   :  { %v1788_v19 = vrot.slane %v1787_v16, 1 }
 0x623   :  { %v1789_v12 = vmax.f32 %v1787_v16, %v1788_v19 }
 0x625   :  { %v1799_v21 = vsub.f32 %v1752_v57, %v1789_v12  ;;  %v1800_v22 = vsub.f32 %v1755_v3, %v1789_v12 }
 0x627   :  { %v1803_v13 = vmul.f32 1.442695, %v1799_v21  ;;  %v1805_v23 = vmul.f32 1.442695, %v1800_v22 }
 0x629   :  { %3092 = vpow2.f32 %v1803_v13 }
 0x62a   :  { %3094 = vpow2.f32 %v1805_v23 }
 0x62b   :  { %v1775_v25 = vpop.f32.mrf.mxu2 }
 0x62c   :  { %v1790_v35 = vsel %vm156_vm0, %v1775_v25, -inf }
 0x62e   :  { %v1878_v20 = vpop.f32.mrf.mxu1 }
 0x62f   :  { %v3776_v61 = vpop.eup %3092  ;;  %v1907_v29 = vsel %vm156_vm0, %v1878_v20, -inf }
 0x630   :  { %v3778_v27 = vpop.eup %3094  ;;  %v1811_v6 = vsel %vm156_vm0, %v3776_v61, 0.0 }
 0x631   :  { %v1812_v28 = vsel %vm156_vm0, %v3778_v27, 0.0 }
 0x632   :  { %v1813_v30 = vadd.f32 %v1812_v28, %v1811_v6 }
 0x633   :  { %v1778_v31 = vpop.f32.mrf.mxu2 }
 0x634   :  { %v1814_v34 = vrot.slane %v1813_v30, 4  ;;  %v1791_v36 = vsel %vm156_vm0, %v1778_v31, -inf }
 0x635   :  { %v1792_v39 = vmax.f32 %v1790_v35, %v1791_v36 }
 0x636   :  { %v1815_v40 = vadd.f32 %v1814_v34, %v1813_v30  ;;  %v1881_v15 = vpop.f32.mrf.mxu1 }
 0x637   :  { %v1793_v42 = vrot.slane %v1792_v39, 4  ;;  %v1908_v45 = vsel %vm156_vm0, %v1881_v15, -inf }
 0x638   :  { %v1816_v43 = vrot.slane %v1815_v40, 2  ;;  %v1909_v48 = vmax.f32 %v1907_v29, %v1908_v45 }
 0x639   :  { %v1794_v46 = vmax.f32 %v1792_v39, %v1793_v42 }
 0x63a   :  { %v1817_v32 = vadd.f32 %v1816_v43, %v1815_v40  ;;  %v1910_v50 = vrot.slane %v1909_v48, 4 }
 0x63b   :  { %v1795_v49 = vrot.slane %v1794_v46, 2 }
 0x63c   :  { %v1818_v51 = vrot.slane %v1817_v32, 1  ;;  %v1911_v33 = vmax.f32 %v1909_v48, %v1910_v50 }
 0x63d   :  { %v1796_v52 = vmax.f32 %v1794_v46, %v1795_v49 }
 0x63e   :  { %v1819_v53 = vadd.f32 %v1818_v51, %v1817_v32  ;;  %v1912_v55 = vrot.slane %v1911_v33, 2 }
 0x63f   :  { %v1797_v54 = vrot.slane %v1796_v52, 1 }
 0x640   :  { %3096 = vrcp.f32 %v1819_v53  ;;  %v1913_v2 = vmax.f32 %v1911_v33, %v1912_v55  ;;  %v1840_v7 = vand.u32 2147483648, %v1819_v53  ;;  %v1838_v11 = vand.u32 2147483647, %v1819_v53 }
 0x641   :  { %v1798_v56 = vmax.f32 %v1796_v52, %v1797_v54  ;;  %vm1834_vm9 = vweird.f32 %v1819_v53 }
 0x642   :  { %v1914_v41 = vrot.slane %v1913_v2, 1  ;;  %v1841_v22 = vor.u32 1.1754944e-38, %v1840_v7  ;;  %vm1839_vm11 = vcmp.eq.f32.partialorder %v1838_v11, 8.507059e+37 }
 0x643   :  { %v1801_v37 = vsub.f32 %v1775_v25, %v1798_v56  ;;  %v1802_v58 = vsub.f32 %v1778_v31, %v1798_v56 }
 0x644   :  { %v1915_v63 = vmax.f32 %v1913_v2, %v1914_v41  ;;  %v1901_v17 = vpop.f32.mrf.mxu2 }
 0x645   :  { %v1807_v59 = vmul.f32 1.442695, %v1801_v37  ;;  %v1809_v60 = vmul.f32 1.442695, %v1802_v58  ;;  %v1916_v23 = vsel %vm156_vm0, %v1901_v17, -inf }
 0x646   :  { %v3097_v0 = vpop.eup %3096  ;;  %v1925_v57 = vsub.f32 %v1878_v20, %v1915_v63  ;;  %v1926_v3 = vsub.f32 %v1881_v15, %v1915_v63 }
 0x647   :  { %v1830_v1 = vmul.f32 %v3097_v0, %v1819_v53  ;;  %3098 = vpow2.f32 %v1807_v59  ;;  %vm1835_vm8 = vweird.f32 %v3097_v0 }
 0x648   :  { %3100 = vpow2.f32 %v1809_v60  ;;  %v1929_v5 = vmul.f32 1.442695, %v1925_v57  ;;  %v1931_v8 = vmul.f32 1.442695, %v1926_v3  ;;  %vm1836_vm10 = vmor %vm1834_vm9, %vm1835_vm8 }
 0x649   :  { %v1831_v4 = vsub.f32 1.0, %v1830_v1 }
 0x64a   :  { %3102 = vpow2.f32 %v1929_v5 }
 0x64b   :  { %v1832_v10 = vmul.f32 %v3097_v0, %v1831_v4  ;;  %3104 = vpow2.f32 %v1931_v8 }
 0x64c   :  { %v1904_v12 = vpop.f32.mrf.mxu2 }
 0x64d   :  { %v3788_v16 = vpop.eup %3098  ;;  %v1833_v19 = vadd.f32 %v3097_v0, %v1832_v10  ;;  %v1917_v25 = vsel %vm156_vm0, %v1904_v12, -inf }
 0x64e   :  { %v3790_v21 = vpop.eup %3100  ;;  %v1820_v13 = vsel %vm156_vm0, %v3788_v16, 0.0  ;;  %v1918_v28 = vmax.f32 %v1916_v23, %v1917_v25 }
 0x64f   :  { %v1837_v20 = vsel %vm1836_vm10, %v3097_v0, %v1833_v19  ;;  %v1821_v6 = vsel %vm156_vm0, %v3790_v21, 0.0 }
 0x650   :  { %v1842_v30 = vsel %vm1839_vm11, %v1841_v22, %v1837_v20  ;;  %v1822_v31 = vadd.f32 %v1821_v6, %v1820_v13  ;;  %v3798_v34 = vpop.eup %3102  ;;  %v1919_v36 = vrot.slane %v1918_v28, 4 }
 0x651   :  { %v1843_v35 = vmul.f32 %v3776_v61, %v1842_v30  ;;  %v3801_v39 = vpop.eup %3104  ;;  %v1937_v42 = vsel %vm156_vm0, %v3798_v34, 0.0  ;;  %v1844_v52 = vmul.f32 %v3778_v27, %v1842_v30 }
 0x652   :  { %v1823_v40 = vrot.slane %v1822_v31, 4  ;;  %v1938_v15 = vsel %vm156_vm0, %v3801_v39, 0.0  ;;  %v1920_v43 = vmax.f32 %v1918_v28, %v1919_v36 }
 0x653   :  { %2991 = vmatmul.msk.f32.vlgmr.msrb.gmra.mxu1 %vm156_vm0, %v1843_v35  ;;  %v1939_v45 = vadd.f32 %v1938_v15, %v1937_v42 }
 0x654   :  { %v1824_v29 = vadd.f32 %v1823_v40, %v1822_v31  ;;  %v1921_v46 = vrot.slane %v1920_v43, 2 }
 0x655   :  { %v1940_v32 = vrot.slane %v1939_v45, 4 }
 0x656   :  { %v1825_v48 = vrot.slane %v1824_v29, 2  ;;  %v1922_v49 = vmax.f32 %v1920_v43, %v1921_v46 }
 0x657   :  { %v1941_v50 = vadd.f32 %v1940_v32, %v1939_v45 }
 0x658   :  { %v1826_v61 = vadd.f32 %v1825_v48, %v1824_v29  ;;  %v1923_v51 = vrot.slane %v1922_v49, 1 }
 0x659   :  { %v1942_v53 = vrot.slane %v1941_v50, 2 }
 0x65a   :  { %v1827_v33 = vrot.slane %v1826_v61, 1  ;;  %v1924_v54 = vmax.f32 %v1922_v49, %v1923_v51 }
 0x65b   :  { %2992 = vmatmul.msk.f32.gmra.mxu1 %vm156_vm0, %v1844_v52  ;;  %v1943_v56 = vadd.f32 %v1942_v53, %v1941_v50 }
 0x65c   :  { %v1828_v55 = vadd.f32 %v1827_v33, %v1826_v61  ;;  %v1927_v2 = vsub.f32 %v1901_v17, %v1924_v54  ;;  %v1928_v37 = vsub.f32 %v1904_v12, %v1924_v54 }
 0x65d   :  { %v1944_v58 = vrot.slane %v1943_v56, 1 }
 0x65e   :  { %3106 = vrcp.f32 %v1828_v55  ;;  %v1933_v41 = vmul.f32 1.442695, %v1927_v2  ;;  %v1935_v59 = vmul.f32 1.442695, %v1928_v37  ;;  %v1856_v3 = vand.u32 2147483648, %v1828_v55 }
 0x65f   :  { %v1945_v60 = vadd.f32 %v1944_v58, %v1943_v56  ;;  %v1854_v17 = vand.u32 2147483647, %v1828_v55  ;;  %vm1850_vm13 = vweird.f32 %v1828_v55 }
 0x660   :  { %3108 = vpow2.f32 %v1933_v41  ;;  %v1857_v12 = vor.u32 1.1754944e-38, %v1856_v3 }
 0x661   :  { %3110 = vpow2.f32 %v1935_v59  ;;  %vm1855_vm15 = vcmp.eq.f32.partialorder %v1854_v17, 8.507059e+37  ;;  %v1964_v25 = vand.u32 2147483647, %v1945_v60  ;;  %v1966_v20 = vand.u32 2147483648, %v1945_v60 }
 0x662   :  { %3112 = vrcp.f32 %v1945_v60  ;;  %vm1960_vm2 = vweird.f32 %v1945_v60 }
 0x663   :  { %v1967_v40 = vor.u32 1.1754944e-38, %v1966_v20  ;;  %vm1965_vm4 = vcmp.eq.f32.partialorder %v1964_v25, 8.507059e+37 }
 0x664   :  { %v3107_v63 = vpop.eup %3106 }
 0x665   :  { %v1846_v0 = vmul.f32 %v3107_v63, %v1828_v55  ;;  %vm1851_vm12 = vweird.f32 %v3107_v63 }
 0x666   :  { %v3109_v27 = vpop.eup %3108  ;;  %vm1852_vm14 = vmor %vm1850_vm13, %vm1851_vm12 }
 0x667   :  { %v1847_v1 = vsub.f32 1.0, %v1846_v0  ;;  %v3111_v57 = vpop.eup %3110  ;;  %v1946_v4 = vsel %vm156_vm0, %v3109_v27, 0.0 }
 0x668   :  { %v3113_v5 = vpop.eup %3112  ;;  %v1947_v8 = vsel %vm156_vm0, %v3111_v57, 0.0 }
 0x669   :  { %v1848_v7 = vmul.f32 %v3107_v63, %v1847_v1  ;;  %v1956_v10 = vmul.f32 %v3113_v5, %v1945_v60  ;;  %v1948_v11 = vadd.f32 %v1947_v8, %v1946_v4  ;;  %vm1961_vm1 = vweird.f32 %v3113_v5 }
 0x66a   :  { %vm1962_vm3 = vmor %vm1960_vm2, %vm1961_vm1 }
 0x66b   :  { %v1849_v19 = vadd.f32 %v3107_v63, %v1848_v7  ;;  %v1957_v22 = vsub.f32 1.0, %v1956_v10  ;;  %v1949_v13 = vrot.slane %v1948_v11, 4 }
 0x66d   :  { %v1853_v23 = vsel %vm1852_vm14, %v3107_v63, %v1849_v19  ;;  %v1958_v28 = vmul.f32 %v3113_v5, %v1957_v22  ;;  %v1950_v30 = vadd.f32 %v1949_v13, %v1948_v11 }
 0x66e   :  { %v1858_v6 = vsel %vm1855_vm15, %v1857_v12, %v1853_v23 }
 0x66f   :  { %v1859_v31 = vmul.f32 %v3788_v16, %v1858_v6  ;;  %v1959_v35 = vadd.f32 %v3113_v5, %v1958_v28  ;;  %v1951_v36 = vrot.slane %v1950_v30, 2  ;;  %v1860_v48 = vmul.f32 %v3790_v21, %v1858_v6 }
 0x671   :  { %2993 = vmatmul.msk.f32.vlgmr.msra.gmra.mxu2 %vm156_vm0, %v1859_v31  ;;  %v1963_v42 = vsel %vm1962_vm3, %v3113_v5, %v1959_v35  ;;  %v1952_v15 = vadd.f32 %v1951_v36, %v1950_v30 }
 0x672   :  { %v1968_v43 = vsel %vm1965_vm4, %v1967_v40, %v1963_v42 }
 0x673   :  { %v1969_v29 = vmul.f32 %v3798_v34, %v1968_v43  ;;  %v1953_v45 = vrot.slane %v1952_v15, 1  ;;  %v1970_v16 = vmul.f32 %v3801_v39, %v1968_v43 }
 0x675   :  { %v1954_v46 = vadd.f32 %v1953_v45, %v1952_v15  ;;  %2987 = vmatmul.msk.f32.vlgmr.msra.gmra.mxu3 %vm156_vm0, %v1969_v29 }
 0x677   :  { %3114 = vrcp.f32 %v1954_v46  ;;  %v1982_v50 = vand.u32 2147483648, %v1954_v46  ;;  %v1980_v34 = vand.u32 2147483647, %v1954_v46  ;;  %vm1976_vm6 = vweird.f32 %v1954_v46 }
 0x679   :  { %2994 = vmatmul.msk.f32.gmra.mxu2 %vm156_vm0, %v1860_v48  ;;  %v1983_v33 = vor.u32 1.1754944e-38, %v1982_v50  ;;  %vm1981_vm8 = vcmp.eq.f32.partialorder %v1980_v34, 8.507059e+37 }
 0x67d   :  { %v3115_v32 = vpop.eup %3114  ;;  %2988 = vmatmul.msk.f32.gmra.mxu3 %vm156_vm0, %v1970_v16 }
 0x67e   :  { %v1972_v49 = vmul.f32 %v3115_v32, %v1954_v46  ;;  %vm1977_vm5 = vweird.f32 %v3115_v32 }
 0x67f   :  { %vm1978_vm7 = vmor %vm1976_vm6, %vm1977_vm5 }
 0x680   :  { %v1973_v61 = vsub.f32 1.0, %v1972_v49 }
 0x682   :  { %v1974_v51 = vmul.f32 %v3115_v32, %v1973_v61 }
 0x684   :  { %v1975_v52 = vadd.f32 %v3115_v32, %v1974_v51 }
 0x685   :  { %2119 = vmatmul.f32.vlgmr.msrb.gmra.mxu3 %v3766_v38 }
 0x686   :  { %v1979_v21 = vsel %vm1978_vm7, %v3115_v32, %v1975_v52 }
 0x687   :  { %v1984_v53 = vsel %vm1981_vm8, %v1983_v33, %v1979_v21 }
 0x688   :  { %v1985_v54 = vmul.f32 %v3109_v27, %v1984_v53  ;;  %v1986_v39 = vmul.f32 %v3111_v57, %v1984_v53 }
 0x68a   :  { %2989 = vmatmul.msk.f32.vlgmr.msrb.gmra.mxu0 %vm156_vm0, %v1985_v54 }
 0x68d   :  { %2122 = vmatmul.f32.gmra.mxu3 %v3768_v62 }
 0x692   :  { %2990 = vmatmul.msk.f32.gmra.mxu0 %vm156_vm0, %v1986_v39 }
 0x69a   :  { %2142 = vmatmul.f32.vlgmr.msra.gmra.mxu0 %v3770_v44 }
 0x6a2   :  { %2145 = vmatmul.f32.gmra.mxu0 %v3772_v47 }
 0x6f8   :  { %v3826_v55 = vpop.f32.mrf.mxu3 }
 0x700   :  { %v3828_v56 = vpop.f32.mrf.mxu3 }
 0x707   :  { %v3830_v38 = vpop.f32.mrf.mxu0 }
 0x708   :  { %v2120_v2 = vpop.f32.mrf.mxu3 }
 0x709   :  { %v2149_v41 = vsel %vm156_vm0, %v2120_v2, -inf }
 0x70f   :  { %v3832_v37 = vpop.f32.mrf.mxu0 }
 0x710   :  { %v2123_v58 = vpop.f32.mrf.mxu3 }
 0x711   :  { %v2150_v62 = vsel %vm156_vm0, %v2123_v58, -inf }
 0x712   :  { %v2151_v59 = vmax.f32 %v2149_v41, %v2150_v62  ;;  %v1471_v41 = vld [vmem:[%s4113_s6 + $0x70] sm:$0xff] }
 0x714   :  { %v2152_v60 = vrot.slane %v2151_v59, 4 }
 0x716   :  { %v2153_v63 = vmax.f32 %v2151_v59, %v2152_v60  ;;  %v1470_v60 = vld [vmem:[%s4113_s6 + $0x68] sm:$0xff] }
 0x717   :  { %v2143_v44 = vpop.f32.mrf.mxu0 }
 0x718   :  { %v2154_v0 = vrot.slane %v2153_v63, 2  ;;  %v2158_v5 = vsel %vm156_vm0, %v2143_v44, -inf }
 0x71a   :  { %v2155_v47 = vmax.f32 %v2153_v63, %v2154_v0 }
 0x71c   :  { %v2156_v27 = vrot.slane %v2155_v47, 1 }
 0x71e   :  { %v2157_v1 = vmax.f32 %v2155_v47, %v2156_v27  ;;  %v1469_v47 = vld [vmem:[%s4113_s6 + $0x60] sm:$0xff] }
 0x71f   :  { %v2146_v57 = vpop.f32.mrf.mxu0 }
 0x720   :  { %v2167_v3 = vsub.f32 %v2120_v2, %v2157_v1  ;;  %v2168_v4 = vsub.f32 %v2123_v58, %v2157_v1  ;;  %v2159_v7 = vsel %vm156_vm0, %v2146_v57, -inf  ;;  %v1472_v58 = vld [vmem:[%s4113_s6 + $0x78] sm:$0xff] }
 0x721   :  { %v2160_v17 = vmax.f32 %v2158_v5, %v2159_v7  ;;  %2294 = vmatpush.msra.mxu3 %v1472_v58 }
 0x722   :  { %v2171_v8 = vmul.f32 1.442695, %v2167_v3  ;;  %v2173_v10 = vmul.f32 1.442695, %v2168_v4  ;;  %v1467_v3 = vld [vmem:[%s4113_s6 + $0x50] sm:$0xff]  ;;  %v1466_v4 = vld [vmem:[%s4113_s6 + $0x48] sm:$0xff] }
 0x723   :  { %v2161_v11 = vrot.slane %v2160_v17, 4  ;;  %2295 = vmatpush.msra.mxu3 %v1471_v41 }
 0x724   :  { %3116 = vpow2.f32 %v2171_v8 }
 0x725   :  { %3118 = vpow2.f32 %v2173_v10  ;;  %v2162_v19 = vmax.f32 %v2160_v17, %v2161_v11  ;;  %2296 = vmatpush.msra.mxu3 %v1470_v60  ;;  %v1465_v17 = vld [vmem:[%s4113_s6 + $0x40] sm:$0xff]  ;;  %v1464_v11 = vld [vmem:[%s4113_s6 + $0x38] sm:$0xff] }
 0x727   :  { %v2163_v12 = vrot.slane %v2162_v19, 2  ;;  %2297 = vmatpush.msra.mxu3 %v1469_v47 }
 0x729   :  { %v2164_v22 = vmax.f32 %v2162_v19, %v2163_v12 }
 0x72a   :  { %v3117_v13 = vpop.eup %3116 }
 0x72b   :  { %v3838_v23 = vpop.eup %3118  ;;  %v2179_v25 = vsel %vm156_vm0, %v3117_v13, 0.0  ;;  %v2165_v20 = vrot.slane %v2164_v22, 1 }
 0x72c   :  { %v2180_v6 = vsel %vm156_vm0, %v3838_v23, 0.0 }
 0x72d   :  { %v2181_v28 = vadd.f32 %v2180_v6, %v2179_v25  ;;  %v2166_v30 = vmax.f32 %v2164_v22, %v2165_v20 }
 0x72f   :  { %v2182_v31 = vrot.slane %v2181_v28, 4  ;;  %v2169_v35 = vsub.f32 %v2143_v44, %v2166_v30  ;;  %v2170_v36 = vsub.f32 %v2146_v57, %v2166_v30  ;;  %v1468_v57 = vld [vmem:[%s4113_s6 + $0x58] sm:$0xff] }
 0x730   :  { %2298 = vmatpush.msra.mxu3 %v1468_v57 }
 0x731   :  { %v2183_v40 = vadd.f32 %v2182_v31, %v2181_v28  ;;  %v2175_v42 = vmul.f32 1.442695, %v2169_v35  ;;  %v2177_v15 = vmul.f32 1.442695, %v2170_v36  ;;  %v1461_v28 = vld [vmem:[%s4113_s6 + $0x20] sm:$0xff]  ;;  %v1460_v35 = vld [vmem:[%s4113_s6 + $0x18] sm:$0xff] }
 0x732   :  { %2299 = vmatpush.msra.mxu3 %v1467_v3  ;;  %v1459_v36 = vld [vmem:[%s4113_s6 + $0x10] sm:$0xff] }
 0x733   :  { %v2184_v43 = vrot.slane %v2183_v40, 2  ;;  %3120 = vpow2.f32 %v2175_v42  ;;  %v1458_v42 = vld [vmem:[%s4113_s6 + $0x8] sm:$0xff] }
 0x734   :  { %3122 = vpow2.f32 %v2177_v15  ;;  %2300 = vmatpush.msra.mxu3 %v1466_v4  ;;  %v1457_v15 = vld [vmem:[%s4113_s6] sm:$0xff] }
 0x735   :  { %v2185_v29 = vadd.f32 %v2184_v43, %v2183_v40  ;;  %v2068_v43 = vpop.f32.mrf.mxu1 }
 0x736   :  { %2301 = vmatpush.msra.mxu3 %v1465_v17 }
 0x737   :  { %v2186_v45 = vrot.slane %v2185_v29, 1 }
 0x738   :  { %2302 = vmatpush.msra.mxu3 %v1464_v11 }
 0x739   :  { %v3843_v46 = vpop.eup %3120  ;;  %v2187_v48 = vadd.f32 %v2186_v45, %v2185_v29  ;;  %v2069_v45 = vadd.f32 %v2068_v43, %v3826_v55  ;;  %v3045_v55 = vld [vmem:[#allocation11] ss:$0 sm:$0xff] }
 0x73a   :  { %v3845_v16 = vpop.eup %3122  ;;  %v2188_v32 = vsel %vm156_vm0, %v3843_v46, 0.0 }
 0x73b   :  { %3124 = vrcp.f32 %v2187_v48  ;;  %v2189_v49 = vsel %vm156_vm0, %v3845_v16, 0.0  ;;  %v2208_v53 = vand.u32 2147483648, %v2187_v48  ;;  %v2206_v2 = vand.u32 2147483647, %v2187_v48 }
 0x73c   :  { %v2190_v61 = vadd.f32 %v2189_v49, %v2188_v32  ;;  %vm2202_vm10 = vweird.f32 %v2187_v48 }
 0x73d   :  { %v2209_v63 = vor.u32 1.1754944e-38, %v2208_v53  ;;  %vm2207_vm12 = vcmp.eq.f32.partialorder %v2206_v2, 8.507059e+37  ;;  %v2071_v29 = vpop.f32.mrf.mxu1 }
 0x73e   :  { %v2191_v50 = vrot.slane %v2190_v61, 4  ;;  %v2072_v32 = vadd.f32 %v2071_v29, %v3828_v56 }
 0x740   :  { %v2192_v34 = vadd.f32 %v2191_v50, %v2190_v61 }
 0x741   :  { %v3125_v51 = vpop.eup %3124 }
 0x742   :  { %v2198_v52 = vmul.f32 %v3125_v51, %v2187_v48  ;;  %v2193_v33 = vrot.slane %v2192_v34, 2  ;;  %vm2203_vm9 = vweird.f32 %v3125_v51 }
 0x743   :  { %vm2204_vm11 = vmor %vm2202_vm10, %vm2203_vm9 }
 0x744   :  { %v2199_v21 = vsub.f32 1.0, %v2198_v52  ;;  %v2194_v54 = vadd.f32 %v2193_v33, %v2192_v34 }
 0x746   :  { %v2200_v39 = vmul.f32 %v3125_v51, %v2199_v21  ;;  %v2195_v62 = vrot.slane %v2194_v54, 1 }
 0x748   :  { %v2201_v59 = vadd.f32 %v3125_v51, %v2200_v39  ;;  %v2196_v44 = vadd.f32 %v2195_v62, %v2194_v54 }
 0x74a   :  { %v2205_v0 = vsel %vm2204_vm11, %v3125_v51, %v2201_v59  ;;  %3126 = vrcp.f32 %v2196_v44  ;;  %v2224_v19 = vand.u32 2147483648, %v2196_v44  ;;  %v2222_v22 = vand.u32 2147483647, %v2196_v44 }
 0x74b   :  { %v2210_v27 = vsel %vm2207_vm12, %v2209_v63, %v2205_v0  ;;  %vm2218_vm14 = vweird.f32 %v2196_v44 }
 0x74c   :  { %v2211_v1 = vmul.f32 %v3117_v13, %v2210_v27  ;;  %v2212_v10 = vmul.f32 %v3838_v23, %v2210_v27  ;;  %v1463_v13 = vld [vmem:[%s4113_s6 + $0x30] sm:$0xff]  ;;  %v1462_v23 = vld [vmem:[%s4113_s6 + $0x28] sm:$0xff]  ;;  %v2225_v20 = vor.u32 1.1754944e-38, %v2224_v19  ;;  %vm2223_vm1 = vcmp.eq.f32.partialorder %v2222_v22, 8.507059e+37  ;;  %v2426_v22 = vld [vmem:[%s4117_s10 + $0x58] sm:$0xff] }
 0x74d   :  { %2303 = vmatpush.msra.mxu3 %v1463_v13  ;;  %v2428_v19 = vld [vmem:[%s4117_s10 + $0x68] sm:$0xff]  ;;  %v2425_v13 = vld [vmem:[%s4117_s10 + $0x50] sm:$0xff] }
 0x74e   :  { %2995 = vmatmul.msk.f32.vlgmr.msra.gmra.mxu1 %vm156_vm0, %v2211_v1 }
 0x74f   :  { %2304 = vmatpush.msra.mxu3 %v1462_v23  ;;  %v2423_v23 = vld [vmem:[%s4117_s10 + $0x40] sm:$0xff] }
 0x750   :  { %v3127_v5 = vpop.eup %3126 }
 0x751   :  { %v2214_v7 = vmul.f32 %v3127_v5, %v2196_v44  ;;  %vm2219_vm13 = vweird.f32 %v3127_v5  ;;  %2305 = vmatpush.msra.mxu3 %v1461_v28  ;;  %v2420_v28 = vld [vmem:[%s4117_s10 + $0x28] sm:$0xff] }
 0x752   :  { %vm2220_vm15 = vmor %vm2218_vm14, %vm2219_vm13  ;;  %vm2925_vm13 = vcmask 74752  }
 0x753   :  { %v2215_v8 = vsub.f32 1.0, %v2214_v7  ;;  %2306 = vmatpush.msra.mxu3 %v1460_v35  ;;  %v2417_v35 = vld [vmem:[%s4117_s10 + $0x10] sm:$0xff] }
 0x755   :  { %v2216_v12 = vmul.f32 %v3127_v5, %v2215_v8  ;;  %2307 = vmatpush.msra.mxu3 %v1459_v36  ;;  %v2416_v36 = vld [vmem:[%s4117_s10 + $0x8] sm:$0xff] }
 0x756   :  { %2996 = vmatmul.msk.f32.gmra.mxu1 %vm156_vm0, %v2212_v10 }
 0x757   :  { %v2217_v25 = vadd.f32 %v3127_v5, %v2216_v12  ;;  %2308 = vmatpush.msra.mxu3 %v1458_v42  ;;  %v2427_v12 = vld [vmem:[%s4117_s10 + $0x60] sm:$0xff] }
 0x759   :  { %v2221_v6 = vsel %vm2220_vm15, %v3127_v5, %v2217_v25  ;;  %2309 = vmatpush.msra.mxu3 %v1457_v15  ;;  %v2424_v25 = vld [vmem:[%s4117_s10 + $0x48] sm:$0xff] }
 0x75a   :  { %v2226_v30 = vsel %vm2223_vm1, %v2225_v20, %v2221_v6  ;;  %v2422_v20 = vld [vmem:[%s4117_s10 + $0x38] sm:$0xff]  ;;  %v2421_v6 = vld [vmem:[%s4117_s10 + $0x30] sm:$0xff] }
 0x75b   :  { %v2227_v31 = vmul.f32 %v3843_v46, %v2226_v30  ;;  %v2228_v40 = vmul.f32 %v3845_v16, %v2226_v30  ;;  %v2097_v16 = vpop.f32.mrf.mxu2  ;;  %v2419_v30 = vld [vmem:[%s4117_s10 + $0x20] sm:$0xff] }
 0x75c   :  { %v2098_v51 = vadd.f32 %v2097_v16, %v3830_v38 }
 0x75d   :  { %2997 = vmatmul.msk.f32.vlgmr.msrb.gmra.mxu2 %vm156_vm0, %v2227_v31  ;;  %v2418_v31 = vld [vmem:[%s4117_s10 + $0x18] sm:$0xff] }
 0x763   :  { %v2100_v50 = vpop.f32.mrf.mxu2 }
 0x764   :  { %v2101_v33 = vadd.f32 %v2100_v50, %v3832_v37 }
 0x765   :  { %2998 = vmatmul.msk.f32.gmra.mxu2 %vm156_vm0, %v2228_v40  ;;  %v2415_v40 = vld [vmem:[%s4117_s10] sm:$0xff] }
 0x7cb   :  { %v2252_v46 = vpop.f32.mrf.mxu1 }
 0x7cc   :  { %v2287_v48 = vadd.f32 %v2252_v46, %v2069_v45 }
 0x7ce   :  { %2310 = vmatmul.f32.vlgmr.msra.gmra.mxu3 %v2287_v48 }
 0x7d3   :  { %v2255_v49 = vpop.f32.mrf.mxu1 }
 0x7d4   :  { %v2288_v61 = vadd.f32 %v2255_v49, %v2072_v32 }
 0x7d6   :  { %2313 = vmatmul.f32.gmra.mxu3 %v2288_v61 }
 0x7e0   :  { %v2281_v34 = vpop.f32.mrf.mxu2 }
 0x7e1   :  { %v2289_v52 = vadd.f32 %v2281_v34, %v2098_v51 }
 0x7e3   :  { %2316 = vmatmul.f32.gmra.mxu3 %v2289_v52 }
 0x7e8   :  { %v2284_v21 = vpop.f32.mrf.mxu2 }
 0x7e9   :  { %v2290_v53 = vadd.f32 %v2284_v21, %v2101_v33 }
 0x7eb   :  { %2319 = vmatmul.f32.gmra.mxu3 %v2290_v53 }
 0x851   :  { %v2311_v54 = vpop.f32.mrf.mxu3 }
 0x852   :  { %v2312_v39 = vadd.f32 %v3045_v55, %v2311_v54 }
 0x854   :  { %v2323_v2 = vadd.f32 %v2312_v39, %v3702_v26  ;;  %v3989_v39 = vld [vmem:[%s4115_s8] ss:$0 sm:$0xff] }
 0x856   :  { %2327 = vadd.xlane.f32.xlu2 %v2323_v2 }
 0x859   :  { %v2314_v56 = vpop.f32.mrf.mxu3 }
 0x85a   :  { %v2315_v58 = vadd.f32 %v3045_v55, %v2314_v56 }
 0x85c   :  { %v2324_v41 = vadd.f32 %v2315_v58, %v3720_v18  ;;  %v2430_v18 = vld [vmem:[%s4117_s10 + $0x78] sm:$0xff] }
 0x85d   :  { %2431 = vmatpush.msrb.mxu0 %v2430_v18 }
 0x85e   :  { %2329 = vadd.xlane.f32.xlu0 %v2324_v41 }
 0x866   :  { %v2317_v38 = vpop.f32.mrf.mxu3 }
 0x867   :  { %v2318_v62 = vadd.f32 %v3045_v55, %v2317_v38 }
 0x869   :  { %v2325_v59 = vadd.f32 %v2318_v62, %v3731_v14  ;;  %v2429_v14 = vld [vmem:[%s4117_s10 + $0x70] sm:$0xff] }
 0x86a   :  { %2432 = vmatpush.msrb.mxu0 %v2429_v14  ;;  %v2479_v62 = vld [vmem:[#allocation14 + $0x78] sm:$0xff] }
 0x86b   :  { %2331 = vadd.xlane.f32.xlu1 %v2325_v59  ;;  %2480 = vmatpush.msrb.mxu1 %v2479_v62  ;;  %v3013_v62 = vld [vmem:[%s4119_s12 + $0x80] sm:$0xff] }
 0x86c   :  { %2433 = vmatpush.msrb.mxu0 %v2428_v19  ;;  %v2471_v19 = vld [vmem:[#allocation14 + $0x38] sm:$0xff] }
 0x86e   :  { %v2320_v37 = vpop.f32.mrf.mxu3  ;;  %2434 = vmatpush.msrb.mxu0 %v2427_v12 }
 0x86f   :  { %v2321_v60 = vadd.f32 %v3045_v55, %v2320_v37 }
 0x870   :  { %2435 = vmatpush.msrb.mxu0 %v2426_v22 }
 0x871   :  { %v2326_v63 = vadd.f32 %v2321_v60, %v3740_v24  ;;  %v2477_v60 = vld [vmem:[#allocation14 + $0x68] sm:$0xff] }
 0x872   :  { %2436 = vmatpush.msrb.mxu0 %v2425_v13  ;;  %v2470_v13 = vld [vmem:[#allocation14 + $0x30] sm:$0xff] }
 0x873   :  { %2333 = vadd.xlane.f32.xlu1 %v2326_v63 }
 0x874   :  { %2437 = vmatpush.msrb.mxu0 %v2424_v25 }
 0x876   :  { %2438 = vmatpush.msrb.mxu0 %v2423_v23 }
 0x878   :  { %2439 = vmatpush.msrb.mxu0 %v2422_v20 }
 0x87a   :  { %2440 = vmatpush.msrb.mxu0 %v2421_v6  ;;  %v2469_v6 = vld [vmem:[#allocation14 + $0x28] sm:$0xff] }
 0x87c   :  { %2441 = vmatpush.msrb.mxu0 %v2420_v28 }
 0x87e   :  { %2442 = vmatpush.msrb.mxu0 %v2419_v30 }
 0x880   :  { %2443 = vmatpush.msrb.mxu0 %v2418_v31  ;;  %v2468_v31 = vld [vmem:[#allocation14 + $0x20] sm:$0xff] }
 0x882   :  { %2444 = vmatpush.msrb.mxu0 %v2417_v35 }
 0x884   :  { %2445 = vmatpush.msrb.mxu0 %v2416_v36 }
 0x886   :  { %2446 = vmatpush.msrb.mxu0 %v2415_v40  ;;  %v2467_v40 = vld [vmem:[#allocation14 + $0x18] sm:$0xff] }
 0x8c9   :  { %v2328_v44 = vpop.xlane.xlu2 %2327 }
 0x8ca   :  { %v2335_v0 = vmul.f32 %v2328_v44, %v3652_v9 }
 0x8cc   :  { %v3915_v26 = vsub.f32 %v2323_v2, %v2335_v0 }
 0x8ce   :  { %v2343_v47 = vmul.f32 %v3915_v26, %v3915_v26 }
 0x8d0   :  { %2347 = vadd.xlane.f32.xlu2 %v2343_v47  ;;  %v2476_v47 = vld [vmem:[#allocation14 + $0x60] sm:$0xff] }
 0x8d1   :  { %v2330_v24 = vpop.xlane.xlu0 %2329 }
 0x8d2   :  { %v2336_v27 = vmul.f32 %v2330_v24, %v3652_v9 }
 0x8d4   :  { %v3926_v1 = vsub.f32 %v2324_v41, %v2336_v27  ;;  %v3992_v41 = vld [vmem:[#allocation12] ss:$0 sm:$0xff] }
 0x8d5   :  { %v2475_v27 = vld [vmem:[#allocation14 + $0x58] sm:$0xff] }
 0x8d6   :  { %v2344_v57 = vmul.f32 %v3926_v1, %v3926_v1 }
 0x8d8   :  { %2349 = vadd.xlane.f32.xlu0 %v2344_v57 }
 0x8de   :  { %v2332_v3 = vpop.xlane.xlu1 %2331 }
 0x8df   :  { %v2337_v4 = vmul.f32 %v2332_v3, %v3652_v9 }
 0x8e1   :  { %v3931_v5 = vsub.f32 %v2325_v59, %v2337_v4  ;;  %v2478_v59 = vld [vmem:[#allocation14 + $0x70] sm:$0xff] }
 0x8e2   :  { %2481 = vmatpush.msrb.mxu1 %v2478_v59  ;;  %v2474_v4 = vld [vmem:[#allocation14 + $0x50] sm:$0xff]  ;;  %v3015_v59 = vld [vmem:[%s4119_s12 + $0x90] sm:$0xff] }
 0x8e3   :  { %v2345_v7 = vmul.f32 %v3931_v5, %v3931_v5 }
 0x8e4   :  { %2482 = vmatpush.msrb.mxu1 %v2477_v60 }
 0x8e5   :  { %2351 = vadd.xlane.f32.xlu2 %v2345_v7 }
 0x8e6   :  { %v2334_v17 = vpop.xlane.xlu1 %2333  ;;  %2483 = vmatpush.msrb.mxu1 %v2476_v47  ;;  %v3022_v47 = vld [vmem:[%s4119_s12 + $0xc8] sm:$0x3] }
 0x8e7   :  { %v2338_v8 = vmul.f32 %v2334_v17, %v3652_v9  ;;  %v2473_v17 = vld [vmem:[#allocation14 + $0x48] sm:$0xff] }
 0x8e8   :  { %2484 = vmatpush.msrb.mxu1 %v2475_v27 }
 0x8e9   :  { %v3936_v10 = vsub.f32 %v2326_v63, %v2338_v8 }
 0x8ea   :  { %2485 = vmatpush.msrb.mxu1 %v2474_v4  ;;  %v3021_v4 = vld [vmem:[%s4119_s12 + $0xc0] sm:$0xff] }
 0x8eb   :  { %v2346_v11 = vmul.f32 %v3936_v10, %v3936_v10 }
 0x8ec   :  { %2486 = vmatpush.msrb.mxu1 %v2473_v17 }
 0x8ed   :  { %2353 = vadd.xlane.f32.xlu0 %v2346_v11 }
 0x943   :  { %v2348_v42 = vpop.xlane.xlu2 %2347 }
 0x944   :  { %v2355_v15 = vmul.f32 %v2348_v42, %v3652_v9 }
 0x946   :  { %v2359_v43 = vadd.f32 1e-05, %v2355_v15  ;;  %v2466_v15 = vld [vmem:[#allocation14 + $0x10] sm:$0xff] }
 0x948   :  { %3128 = vrsqrt.f32 %v2359_v43  ;;  %vm2369_vm2 = vweird.f32 %v2359_v43 }
 0x94b   :  { %v2350_v29 = vpop.xlane.xlu0 %2349 }
 0x94c   :  { %v2356_v45 = vmul.f32 %v2350_v29, %v3652_v9 }
 0x94e   :  { %v3129_v46 = vpop.eup %3128  ;;  %v2360_v48 = vadd.f32 1e-05, %v2356_v45 }
 0x94f   :  { %v2364_v16 = vmul.f32 %v3129_v46, %v2359_v43  ;;  %vm2370_vm0 = vweird.f32 %v3129_v46 }
 0x950   :  { %3130 = vrsqrt.f32 %v2360_v48  ;;  %vm2371_vm3 = vmor %vm2369_vm2, %vm2370_vm0  ;;  %vm2379_vm5 = vweird.f32 %v2360_v48 }
 0x951   :  { %v2365_v32 = vmul.f32 %v3129_v46, %v2364_v16 }
 0x953   :  { %v2366_v49 = vmul.f32 0.5, %v2365_v32 }
 0x955   :  { %v2367_v61 = vsub.f32 1.5, %v2366_v49 }
 0x956   :  { %v3131_v50 = vpop.eup %3130 }
 0x957   :  { %v2368_v51 = vmul.f32 %v3129_v46, %v2367_v61  ;;  %v2374_v34 = vmul.f32 %v3131_v50, %v2360_v48  ;;  %vm2380_vm4 = vweird.f32 %v3131_v50  ;;  %v2464_v48 = vld [vmem:[#allocation14] sm:$0xff] }
 0x958   :  { %v2352_v21 = vpop.xlane.xlu2 %2351  ;;  %vm2381_vm6 = vmor %vm2379_vm5, %vm2380_vm4 }
 0x959   :  { %v2372_v52 = vsel %vm2371_vm3, %v3129_v46, %v2368_v51  ;;  %v2375_v33 = vmul.f32 %v3131_v50, %v2374_v34  ;;  %v2357_v55 = vmul.f32 %v2352_v21, %v3652_v9  ;;  %v2465_v46 = vld [vmem:[#allocation14 + $0x8] sm:$0xff]  ;;  %v3010_v21 = vld [vmem:[%s4119_s12 + $0x68] sm:$0x3] }
 0x95a   :  { %v2403_v53 = vmul.f32 %v2372_v52, %v3915_v26  ;;  %v3000_v52 = vld [vmem:[%s4119_s12 + $0x18] sm:$0x3]  ;;  %2684 = vmatpush.xpose.msra.mxu0 %v3010_v21 }
 0x95b   :  { %v2376_v54 = vmul.f32 0.5, %v2375_v33  ;;  %v2361_v56 = vadd.f32 1e-05, %v2357_v55  ;;  %v3008_v33 = vld [vmem:[%s4119_s12 + $0x58] sm:$0x3]  ;;  %2535 = vmatpush.xpose.msra.mxu2 %v3000_v52  ;;  %v3007_v55 = vld [vmem:[%s4119_s12 + $0x50] sm:$0xff] }
 0x95c   :  { %v2407_v2 = vmul.f32 %v3989_v39, %v2403_v53  ;;  %2658 = vmatpush.xpose.msrb.mxu3 %v3008_v33  ;;  %v2999_v53 = vld [vmem:[%s4119_s12 + $0x10] sm:$0xff] }
 0x95d   :  { %v2377_v58 = vsub.f32 1.5, %v2376_v54  ;;  %3132 = vrsqrt.f32 %v2361_v56  ;;  %vm2389_vm8 = vweird.f32 %v2361_v56  ;;  %v3009_v54 = vld [vmem:[%s4119_s12 + $0x60] sm:$0xff] }
 0x95e   :  { %v2411_v38 = vadd.f32 %v3992_v41, %v2407_v2  ;;  %2685 = vmatpush.xpose.msra.mxu0 %v3009_v54  ;;  %v2515_v2 = vld [vmem:[%s4119_s12 + $0x8] sm:$0x3] }
 0x95f   :  { %v2378_v37 = vmul.f32 %v3131_v50, %v2377_v58  ;;  %2536 = vmatpush.xpose.msra.mxu2 %v2999_v53  ;;  %v3016_v58 = vld [vmem:[%s4119_s12 + $0x98] sm:$0x3] }
 0x960   :  { %2447 = vmatmul.f32.vlgmr.msrb.gmra.mxu0 %v2411_v38  ;;  %v2354_v44 = vpop.xlane.xlu0 %2353  ;;  %2659 = vmatpush.xpose.msrb.mxu3 %v3007_v55  ;;  %v2514_v38 = vld [vmem:[%s4119_s12] sm:$0xff] }
 0x961   :  { %v2382_v63 = vsel %vm2381_vm6, %v3131_v50, %v2378_v37  ;;  %v2358_v0 = vmul.f32 %v2354_v44, %v3652_v9  ;;  %v3017_v37 = vld [vmem:[%s4119_s12 + $0xa0] sm:$0xff] }
 0x962   :  { %v2404_v26 = vmul.f32 %v2382_v63, %v3926_v1  ;;  %v2472_v1 = vld [vmem:[#allocation14 + $0x40] sm:$0xff]  ;;  %2762 = vmatpush.xpose.msrb.mxu0 %v3016_v58  ;;  %v3026_v63 = vld [vmem:[%s4119_s12 + $0xe8] sm:$0x3]  ;;  %v3025_v44 = vld [vmem:[%s4119_s12 + $0xe0] sm:$0xff] }
 0x963   :  { %v3133_v18 = vpop.eup %3132  ;;  %v2362_v14 = vadd.f32 1e-05, %v2358_v0  ;;  %2487 = vmatpush.msrb.mxu1 %v2472_v1  ;;  %2555 = vmatpush.xpose.msrb.mxu2 %v2515_v2 }
 0x964   :  { %v2408_v24 = vmul.f32 %v3989_v39, %v2404_v26  ;;  %v2384_v57 = vmul.f32 %v3133_v18, %v2361_v56  ;;  %vm2390_vm7 = vweird.f32 %v3133_v18  ;;  %v3014_v56 = vld [vmem:[%s4119_s12 + $0x88] sm:$0x3] }
 0x965   :  { %3134 = vrsqrt.f32 %v2362_v14  ;;  %vm2391_vm9 = vmor %vm2389_vm8, %vm2390_vm7  ;;  %2488 = vmatpush.msrb.mxu1 %v2471_v19  ;;  %vm2399_vm11 = vweird.f32 %v2362_v14  ;;  %2736 = vmatpush.xpose.msra.mxu3 %v3014_v56  ;;  %v3002_v26 = vld [vmem:[%s4119_s12 + $0x28] sm:$0x3]  ;;  %v3003_v19 = vld [vmem:[%s4119_s12 + $0x30] sm:$0xff] }
 0x966   :  { %v2412_v3 = vadd.f32 %v3992_v41, %v2408_v24  ;;  %v2385_v7 = vmul.f32 %v3133_v18, %v2384_v57  ;;  %2763 = vmatpush.xpose.msrb.mxu0 %v3015_v59 }
 0x967   :  { %2489 = vmatpush.msrb.mxu1 %v2470_v13  ;;  %2556 = vmatpush.xpose.msrb.mxu2 %v2514_v38 }
 0x968   :  { %2450 = vmatmul.f32.gmra.mxu0 %v2412_v3  ;;  %v2386_v9 = vmul.f32 0.5, %v2385_v7  ;;  %v3001_v3 = vld [vmem:[%s4119_s12 + $0x20] sm:$0xff]  ;;  %v3023_v7 = vld [vmem:[%s4119_s12 + $0xd0] sm:$0xff] }
 0x969   :  { %2490 = vmatpush.msrb.mxu1 %v2469_v6  ;;  %2737 = vmatpush.xpose.msra.mxu3 %v3013_v62  ;;  %v3012_v6 = vld [vmem:[%s4119_s12 + $0x78] sm:$0x3] }
 0x96a   :  { %v2387_v8 = vsub.f32 1.5, %v2386_v9  ;;  %v3004_v9 = vld [vmem:[%s4119_s12 + $0x38] sm:$0x3] }
 0x96b   :  { %v3135_v11 = vpop.eup %3134  ;;  %2491 = vmatpush.msrb.mxu1 %v2468_v31  ;;  %v3020_v31 = vld [vmem:[%s4119_s12 + $0xb8] sm:$0x3] }
 0x96c   :  { %v2388_v12 = vmul.f32 %v3133_v18, %v2387_v8  ;;  %v2394_v22 = vmul.f32 %v3135_v11, %v2362_v14  ;;  %vm2400_vm10 = vweird.f32 %v3135_v11 }
 0x96d   :  { %vm2401_vm12 = vmor %vm2399_vm11, %vm2400_vm10  ;;  %2492 = vmatpush.msrb.mxu1 %v2467_v40  ;;  %v3028_v40 = vld [vmem:[%s4119_s12 + $0xf8] sm:$0x3] }
 0x96e   :  { %v2392_v25 = vsel %vm2391_vm9, %v3133_v18, %v2388_v12  ;;  %v2395_v23 = vmul.f32 %v3135_v11, %v2394_v22  ;;  %v3024_v18 = vld [vmem:[%s4119_s12 + $0xd8] sm:$0x3]  ;;  %v3006_v12 = vld [vmem:[%s4119_s12 + $0x48] sm:$0x3] }
 0x96f   :  { %v2405_v20 = vmul.f32 %v2392_v25, %v3931_v5  ;;  %2493 = vmatpush.msrb.mxu1 %v2466_v15  ;;  %v3027_v15 = vld [vmem:[%s4119_s12 + $0xf0] sm:$0xff] }
 0x970   :  { %v2396_v28 = vmul.f32 0.5, %v2395_v23 }
 0x971   :  { %v2409_v30 = vmul.f32 %v3989_v39, %v2405_v20  ;;  %2494 = vmatpush.msrb.mxu1 %v2465_v46  ;;  %v3005_v20 = vld [vmem:[%s4119_s12 + $0x40] sm:$0xff] }
 0x972   :  { %v2397_v35 = vsub.f32 1.5, %v2396_v28 }
 0x973   :  { %v2413_v36 = vadd.f32 %v3992_v41, %v2409_v30  ;;  %2495 = vmatpush.msrb.mxu1 %v2464_v48  ;;  %v3011_v30 = vld [vmem:[%s4119_s12 + $0x70] sm:$0xff] }
 0x974   :  { %v2398_v42 = vmul.f32 %v3135_v11, %v2397_v35 }
 0x975   :  { %2453 = vmatmul.f32.gmra.mxu0 %v2413_v36  ;;  %v3019_v36 = vld [vmem:[%s4119_s12 + $0xb0] sm:$0xff] }
 0x976   :  { %v2402_v43 = vsel %vm2401_vm12, %v3135_v11, %v2398_v42 }
 0x977   :  { %v2406_v5 = vmul.f32 %v2402_v43, %v3936_v10 }
 0x979   :  { %v2410_v29 = vmul.f32 %v3989_v39, %v2406_v5 }
 0x97b   :  { %v2414_v45 = vadd.f32 %v3992_v41, %v2410_v29  ;;  %v3018_v41 = vld [vmem:[%s4119_s12 + $0xa8] sm:$0x3]  ;;  %s3356_s12 = smov [#allocation15]  }
 0x97c   :  { %2788 = vmatpush.xpose.msra.mxu1 %v3018_v41  ;;  %s2956_s28 = sshll.u32 %s3356_s12, 4  ;;  %s2957_s28 = int_to_ptr.vmem [resolvable:$true] %s2956_s28 }
 0x97d   :  { %2456 = vmatmul.f32.gmra.mxu0 %v2414_v45 }
 0x980   :  { %2789 = vmatpush.xpose.msra.mxu1 %v3017_v37 }
 0x9dd   :  { %v2448_v16 = vpop.f32.mrf.mxu0 }
 0x9de   :  { %v2460_v32 = vmax.f32 %v2448_v16, 0.0 }
 0x9e0   :  { %2496 = vmatmul.f32.vlgmr.msrb.gmra.mxu1 %v2460_v32 }
 0x9e1   :  { %2892 = vmatpush.xpose.msrb.mxu1 %v3026_v63 }
 0x9e5   :  { %v2451_v49 = vpop.f32.mrf.mxu0  ;;  %2893 = vmatpush.xpose.msrb.mxu1 %v3025_v44 }
 0x9e6   :  { %v2461_v61 = vmax.f32 %v2451_v49, 0.0 }
 0x9e8   :  { %2499 = vmatmul.f32.gmra.mxu1 %v2461_v61 }
 0x9f2   :  { %v2454_v50 = vpop.f32.mrf.mxu0 }
 0x9f3   :  { %v2462_v51 = vmax.f32 %v2454_v50, 0.0 }
 0x9f5   :  { %2502 = vmatmul.f32.gmra.mxu1 %v2462_v51 }
 0x9fa   :  { %v2457_v10 = vpop.f32.mrf.mxu0 }
 0x9fb   :  { %v2463_v34 = vmax.f32 %v2457_v10, 0.0 }
 0x9fd   :  { %2505 = vmatmul.f32.gmra.mxu1 %v2463_v34 }
 0xa5d   :  { %v2497_v39 = vpop.f32.mrf.mxu1 }
 0xa5e   :  { %2509 = vst [vmem:[#allocation2] sm:$0xff] %v2497_v39 }
 0xa65   :  { %v2500_v60 = vpop.f32.mrf.mxu1 }
 0xa66   :  { %2510 = vst [vmem:[#allocation2 + $0x8] sm:$0xff] %v2500_v60 }
 0xa72   :  { %v2503_v0 = vpop.f32.mrf.mxu1 }
 0xa73   :  { %2511 = vst [vmem:[#allocation2 + $0x10] sm:$0xff] %v2503_v0 }
 0xa7a   :  { %v2506_v14 = vpop.f32.mrf.mxu1  ;;  %v2517_v24 = vld [vmem:[#allocation2 + $0x1] ss:$16 sm:$0x3]  ;;  %v2640_v27 = vld [vmem:[#allocation2 + $0x5] ss:$16 sm:$0x3] }
 0xa7b   :  { %2512 = vst [vmem:[#allocation2 + $0x18] sm:$0xff] %v2506_v14  ;;  %2537 = vmatmul.f32.vlgmr.msra.gmra.mxu2 %v2517_v24  ;;  %2660 = vmatmul.f32.vlgmr.msrb.gmra.mxu3 %v2640_v27  ;;  %v2666_v57 = vld [vmem:[#allocation2 + $0x6] ss:$16 sm:$0x3] }
 0xa7c   :  { %2686 = vmatmul.f32.vlgmr.msra.gmra.mxu0 %v2666_v57  ;;  %2580 = vmatpush.xpose.msra.mxu2 %v3002_v26  ;;  %v2513_v17 = vld [vmem:[#allocation2] ss:$16 sm:$0x3]  ;;  %v2562_v22 = vld [vmem:[#allocation2 + $0x2] ss:$16 sm:$0x3] }
 0xa7d   :  { %2840 = vmatpush.xpose.msrb.mxu3 %v3022_v47  ;;  %2866 = vmatpush.xpose.msra.mxu0 %v3024_v18  ;;  %v2588_v28 = vld [vmem:[#allocation2 + $0x3] ss:$16 sm:$0x3]  ;;  %v2614_v35 = vld [vmem:[#allocation2 + $0x4] ss:$16 sm:$0x3] }
 0xa7e   :  { %v2692_v42 = vld [vmem:[#allocation2 + $0x7] ss:$16 sm:$0x3] }
 0xa80   :  { %2581 = vmatpush.xpose.msra.mxu2 %v3001_v3 }
 0xa81   :  { %2841 = vmatpush.xpose.msrb.mxu3 %v3021_v4  ;;  %2867 = vmatpush.xpose.msra.mxu0 %v3023_v7 }
 0xa82   :  { %v2718_v1 = vld [vmem:[#allocation2 + $0x8] ss:$16 sm:$0x3]  ;;  %v2744_v8 = vld [vmem:[#allocation2 + $0x9] ss:$16 sm:$0x3] }
 0xa83   :  { %2557 = vmatmul.f32.vlgmr.msrb.gmra.mxu2 %v2513_v17  ;;  %2738 = vmatmul.f32.vlgmr.msra.gmra.mxu3 %v2718_v1  ;;  %v2770_v11 = vld [vmem:[#allocation2 + $0xa] ss:$16 sm:$0x3]  ;;  %v2822_v13 = vld [vmem:[#allocation2 + $0xc] ss:$16 sm:$0x3] }
 0xa84   :  { %2764 = vmatmul.f32.vlgmr.msrb.gmra.mxu0 %v2744_v8  ;;  %2790 = vmatmul.f32.vlgmr.msra.gmra.mxu1 %v2770_v11  ;;  %v2848_v25 = vld [vmem:[#allocation2 + $0xd] ss:$16 sm:$0x3]  ;;  %v2874_v23 = vld [vmem:[#allocation2 + $0xe] ss:$16 sm:$0x3] }
 0xa85   :  { %2606 = vmatpush.xpose.msrb.mxu2 %v3004_v9  ;;  %v2796_v43 = vld [vmem:[#allocation2 + $0xb] ss:$16 sm:$0x3]  ;;  %v2900_v5 = vld [vmem:[#allocation2 + $0xf] ss:$16 sm:$0x3] }
 0xa89   :  { %2607 = vmatpush.xpose.msrb.mxu2 %v3003_v19 }
 0xa8b   :  { %2582 = vmatmul.f32.vlgmr.msra.gmra.mxu2 %v2562_v22  ;;  %2842 = vmatmul.f32.vlgmr.msrb.gmra.mxu3 %v2822_v13 }
 0xa8c   :  { %2868 = vmatmul.f32.vlgmr.msra.gmra.mxu0 %v2848_v25  ;;  %2894 = vmatmul.f32.vlgmr.msrb.gmra.mxu1 %v2874_v23 }
 0xa8d   :  { %2632 = vmatpush.xpose.msra.mxu2 %v3006_v12 }
 0xa91   :  { %2633 = vmatpush.xpose.msra.mxu2 %v3005_v20 }
 0xa93   :  { %2608 = vmatmul.f32.vlgmr.msrb.gmra.mxu2 %v2588_v28 }
 0xa95   :  { %2710 = vmatpush.xpose.msrb.mxu2 %v3012_v6 }
 0xa99   :  { %2711 = vmatpush.xpose.msrb.mxu2 %v3011_v30 }
 0xa9b   :  { %2634 = vmatmul.f32.vlgmr.msra.gmra.mxu2 %v2614_v35 }
 0xa9d   :  { %2814 = vmatpush.xpose.msra.mxu2 %v3020_v31 }
 0xaa1   :  { %2815 = vmatpush.xpose.msra.mxu2 %v3019_v36 }
 0xaa3   :  { %2712 = vmatmul.f32.vlgmr.msrb.gmra.mxu2 %v2692_v42 }
 0xaa5   :  { %2918 = vmatpush.xpose.msrb.mxu2 %v3028_v40 }
 0xaa9   :  { %2919 = vmatpush.xpose.msrb.mxu2 %v3027_v15 }
 0xaab   :  { %2816 = vmatmul.f32.vlgmr.msra.gmra.mxu2 %v2796_v43 }
 0xab3   :  { %2920 = vmatmul.f32.vlgmr.msrb.gmra.mxu2 %v2900_v5 }
 0xaf9   :  { %v2687_v50 = vpop.f32.mrf.mxu0 }
 0xafe   :  { %v2538_v29 = vpop.f32.mrf.mxu2  ;;  %v2661_v49 = vpop.f32.mrf.mxu3 }
 0xb01   :  { %v2765_v55 = vpop.f32.mrf.mxu0  ;;  %v2791_v39 = vpop.f32.mrf.mxu1 }
 0xb06   :  { %v2558_v45 = vpop.f32.mrf.mxu2  ;;  %v2739_v33 = vpop.f32.mrf.mxu3 }
 0xb07   :  { %v2559_v16 = vadd.f32 %v2558_v45, %v2538_v29 }
 0xb09   :  { %v2869_v59 = vpop.f32.mrf.mxu0  ;;  %v2895_v60 = vpop.f32.mrf.mxu1 }
 0xb0e   :  { %v2583_v46 = vpop.f32.mrf.mxu2  ;;  %v2843_v38 = vpop.f32.mrf.mxu3 }
 0xb0f   :  { %v2586_v32 = vadd.f32 %v2583_v46, %v2559_v16 }
 0xb16   :  { %v2609_v48 = vpop.f32.mrf.mxu2 }
 0xb17   :  { %v2612_v61 = vadd.f32 %v2609_v48, %v2586_v32 }
 0xb1e   :  { %v2635_v51 = vpop.f32.mrf.mxu2 }
 0xb1f   :  { %v2638_v10 = vadd.f32 %v2635_v51, %v2612_v61 }
 0xb21   :  { %v2664_v34 = vadd.f32 %v2661_v49, %v2638_v10 }
 0xb23   :  { %v2690_v52 = vadd.f32 %v2687_v50, %v2664_v34 }
 0xb26   :  { %v2713_v21 = vpop.f32.mrf.mxu2 }
 0xb27   :  { %v2716_v53 = vadd.f32 %v2713_v21, %v2690_v52 }
 0xb29   :  { %v2742_v54 = vadd.f32 %v2739_v33, %v2716_v53 }
 0xb2b   :  { %v2768_v2 = vadd.f32 %v2765_v55, %v2742_v54 }
 0xb2d   :  { %v2794_v56 = vadd.f32 %v2791_v39, %v2768_v2 }
 0xb2e   :  { %v2817_v58 = vpop.f32.mrf.mxu2 }
 0xb2f   :  { %v2820_v41 = vadd.f32 %v2817_v58, %v2794_v56 }
 0xb31   :  { %v2846_v62 = vadd.f32 %v2843_v38, %v2820_v41 }
 0xb33   :  { %v2872_v37 = vadd.f32 %v2869_v59, %v2846_v62 }
 0xb35   :  { %v2898_v63 = vadd.f32 %v2895_v60, %v2872_v37 }
 0xb36   :  { %v2921_v44 = vpop.f32.mrf.mxu2 }
 0xb37   :  { %v2924_v0 = vadd.f32 %v2921_v44, %v2898_v63 }
 0xb39   :  { %v2926_v26 = vsel %vm2925_vm13, %v2924_v0, -inf }
 0xb3a   :  { %2927 = vmax.xlane.f32.xlu1 %v2926_v26 }
 0xbad   :  { %v2928_v47 = vpop.xlane.xlu1 %2927 }
 0xbae   :  { %v2929_v18 = vsub.f32 %v2924_v0, %v2928_v47 }
 0xbb0   :  { %v2930_v14 = vmul.f32 1.442695, %v2929_v18 }
 0xbb2   :  { %3136 = vpow2.f32 %v2930_v14 }
 0xbb8   :  { %v3137_v24 = vpop.eup %3136 }
 0xbb9   :  { %v2932_v27 = vsel %vm2925_vm13, %v3137_v24, 0.0 }
 0xbba   :  { %2933 = vadd.xlane.f32.xlu2 %v2932_v27 }
 0xc2d   :  { %v2934_v57 = vpop.xlane.xlu2 %2933 }
 0xc2e   :  { %3138 = vrcp.f32 %v2934_v57  ;;  %v2946_v17 = vand.u32 2147483648, %v2934_v57  ;;  %v2944_v1 = vand.u32 2147483647, %v2934_v57  ;;  %vm2940_vm15 = vweird.f32 %v2934_v57 }
 0xc30   :  { %v2947_v11 = vor.u32 1.1754944e-38, %v2946_v17  ;;  %vm2945_vm0 = vcmp.eq.f32.partialorder %v2944_v1, 8.507059e+37 }
 0xc34   :  { %v3139_v3 = vpop.eup %3138 }
 0xc35   :  { %v2936_v4 = vmul.f32 %v3139_v3, %v2934_v57  ;;  %vm2941_vm14 = vweird.f32 %v3139_v3 }
 0xc36   :  { %vm2942_vm1 = vmor %vm2940_vm15, %vm2941_vm14 }
 0xc37   :  { %v2937_v7 = vsub.f32 1.0, %v2936_v4 }
 0xc39   :  { %v2938_v9 = vmul.f32 %v3139_v3, %v2937_v7 }
 0xc3b   :  { %v2939_v8 = vadd.f32 %v3139_v3, %v2938_v9 }
 0xc3d   :  { %v2943_v19 = vsel %vm2942_vm1, %v3139_v3, %v2939_v8 }
 0xc3e   :  { %v2948_v12 = vsel %vm2945_vm0, %v2947_v11, %v2943_v19 }
 0xc3f   :  { %v2949_v22 = vmul.f32 %v3137_v24, %v2948_v12 }
 0xc41   :  { %2950 = vst.msk [vmem:[#allocation15] sm:$0x3] %vm2925_vm13, %v2949_v22 }
 0xc42   :  { %2961 = dma.vmem_to_hbm [thread:$0]  %s2957_s28, 32, %s2959_s30, [#allocation5]  }
 0xc43   :  { %3342 = dma.done.wait [#allocation5], 32  }
 0xc44   :  { %3343 = vsyncadd [#allocation5], 4294967264 }
 0xc45   :  { %2966 = vsyncpa [#allocation4], 1 }
 0xc46   :  { %2967 = vsyncpa [#allocation7], 1 }
 0xc47   :  { %2968 = vsyncpa [#allocation10], 1 }
 0xc48   :  { %2969 = vsyncpa [#allocation13], 1 }
 0xc49   :  { %2970 = vsyncpa [#allocation5], 1 }

</bundles_post_ra>
